<compile_context>
chip_gen: v5e
topology: v5e:2x2
jax: 0.10.0
libtpu: 0.0.40
codegen_flags: <defaults>
</compile_context>

<pallas_src>
import jax
import jax.numpy as jnp
from jax.experimental import pallas as pl
from jax.experimental.pallas import tpu as pltpu


def _bf16_exp_ok():
    """bf16 exp is a win on v6e/v7x (bf16 EUP); keep f32 on v5e and older."""
    try:
        kind = jax.devices()[0].device_kind.lower()
    except Exception:
        return False
    for old in ("v2", "v3", "v4", "v5"):
        if old in kind:
            return False
    return True


def make_attention_kernel(C, N, heads, dh, dim_out, use_bf16_exp):
    """One grid step = one batch element; heads unrolled inside the body."""
    hidden = heads * dh

    def kernel(x_ref, wqkv_ref, wout_ref, b_ref, o_ref, hid_ref):
        x = x_ref[0]                                              # (C, N) bf16

        # Fused QKV projection for ALL heads: one (3*hidden, C) x (C, N) matmul.
        qkv = jnp.dot(wqkv_ref[...], x,
                      preferred_element_type=jnp.float32)         # (3*hidden, N) f32

        # Statically unrolled per-head attention; per-head (dh, N) results land
        # in the (hidden, N) VMEM scratch, concatenated along the sublane axis.
        for h in range(heads):
            q = qkv[h * dh:(h + 1) * dh].astype(jnp.bfloat16)                    # (dh, N)
            k = qkv[hidden + h * dh:hidden + (h + 1) * dh].astype(jnp.bfloat16)  # (dh, N)
            v = qkv[2 * hidden + h * dh:2 * hidden + (h + 1) * dh].astype(jnp.bfloat16)

            # simT[j, i] = sum_d k[d, j] * q[d, i]  (q already carries the scale).
            simT = jax.lax.dot_general(
                k, q, (((0,), (0,)), ((), ())),
                preferred_element_type=jnp.float32)                # (N_j, N_i) f32

            # Softmax over j (axis 0): stats in f32, exponent bf16 where the EUP
            # supports it.  Normalization is applied AFTER the V matmul.
            m = jnp.max(simT, axis=0, keepdims=True)               # (1, N)
            z = simT - m                                           # (N, N) f32
            if use_bf16_exp:
                p = jnp.exp(z.astype(jnp.bfloat16))                # (N, N) bf16
                s = jnp.sum(p.astype(jnp.float32), axis=0, keepdims=True)
            else:
                e = jnp.exp(z)                                     # (N, N) f32
                s = jnp.sum(e, axis=0, keepdims=True)
                p = e.astype(jnp.bfloat16)

            # out_t[d, i] = (sum_j v[d, j] * p[j, i]) / s[i]  -- exact divide on
            # only (dh, N) elements.
            out_t = jnp.dot(v, p, preferred_element_type=jnp.float32)   # (dh, N) f32
            out_t = out_t / s
            hid_ref[h * dh:(h + 1) * dh, :] = out_t.astype(jnp.bfloat16)

        # Single output projection over the concatenated heads (K = hidden=128),
        # plus bias, straight to the output block.
        proj = jnp.dot(wout_ref[...], hid_ref[...],
                       preferred_element_type=jnp.float32)         # (dim_out, N) f32
        o_ref[0] = (proj + b_ref[...]).astype(o_ref.dtype)

    return kernel


def attention_forward(x_nchw, w_qkv, w_out, b_out, heads=4, dim_head=32):
    """Matches PyTorch Attention.forward.

    x_nchw: (B, C, H, W); w_qkv: (3*heads*dim_head, C, 1, 1) [no bias];
    w_out: (C, heads*dim_head, 1, 1); b_out: (C,).  Returns (B, C, H, W) f32.
    """
    B, C, H, W = x_nchw.shape
    N = H * W
    dh = dim_head
    hidden = heads * dh
    dim_out = w_out.shape[0]
    scale = dh ** (-0.5)

    assert dh % 8 == 0, "dim_head must be a multiple of 8 for sublane slicing"
    # N = H*W is best as a multiple of 128 (lane-dense stores); a full-extent
    # block still works otherwise (masked partial stores).

    # NCHW -> (B, C, N): pure reshape, no HBM transpose pass. bf16 for the MXU.
    x = x_nchw.reshape(B, C, N).astype(jnp.bfloat16)

    # to_qkv weights (3*hidden, C, 1, 1) -> (3*hidden, C); fold q scale into the
    # q rows (weight-side, once).
    w3 = w_qkv.reshape(3, heads, dh, C).astype(jnp.float32)
    w3 = w3.at[0].multiply(scale)
    wqkv_r = w3.reshape(3 * hidden, C).astype(jnp.bfloat16)

    # to_out weights (dim, hidden, 1, 1) -> (dim, hidden); bias -> (dim, 1).
    wout_r = w_out.reshape(dim_out, hidden).astype(jnp.bfloat16)
    b2 = b_out.reshape(dim_out, 1).astype(jnp.float32)

    use_bf16_exp = _bf16_exp_ok()

    # Explicit VMEM budget from the per-step working set (double-buffered
    # x/out blocks + qkv, (N,N) softmax temps, hidden scratch, weights), with
    # 2x headroom, capped well under physical VMEM.
    est = (2 * C * N * 2                 # x block, double-buffered, bf16
           + 3 * hidden * N * 4          # qkv f32
           + 2 * N * N * 4               # simT + exp temps f32
           + hidden * N * 2              # hidden scratch bf16
           + 2 * dim_out * N * 4         # output block, double-buffered, f32
           + 2 * (3 * hidden * C + dim_out * hidden) * 2)   # weights bf16
    vmem_limit = int(min(max(32 << 20, 2 * est), 100 << 20))

    kernel = make_attention_kernel(C, N, heads, dh, dim_out, use_bf16_exp)
    out = pl.pallas_call(
        kernel,
        out_shape=jax.ShapeDtypeStruct((B, dim_out, N), jnp.float32),
        grid=(B,),
        in_specs=[
            pl.BlockSpec((1, C, N), lambda b: (b, 0, 0)),          # x
            pl.BlockSpec((3 * hidden, C), lambda b: (0, 0)),       # fused qkv weights
            pl.BlockSpec((dim_out, hidden), lambda b: (0, 0)),     # out-proj weights
            pl.BlockSpec((dim_out, 1), lambda b: (0, 0)),          # out-proj bias
        ],
        out_specs=pl.BlockSpec((1, dim_out, N), lambda b: (b, 0, 0)),
        scratch_shapes=[pltpu.VMEM((hidden, N), jnp.bfloat16)],
        compiler_params=pltpu.CompilerParams(
            dimension_semantics=("parallel",),
            vmem_limit_bytes=vmem_limit),
    )(x, wqkv_r, wout_r, b2)

    # (B, dim, N) -> NCHW: free reshape.
    return out.reshape(B, dim_out, H, W)


def attention_ref(x, w_qkv, w_out, b_out, heads=4, dim_head=32):
    """Pure-JAX f32 reference mirroring the PyTorch forward, for validation."""
    B, C, H, W = x.shape
    N = H * W
    hidden = heads * dim_head
    scale = dim_head ** (-0.5)

    qkv = jax.lax.conv_general_dilated(
        x, w_qkv, window_strides=(1, 1), padding='VALID',
        dimension_numbers=('NCHW', 'OIHW', 'NCHW'))
    q, k, v = jnp.split(qkv, 3, axis=1)
    q = q.reshape(B, heads, dim_head, N) * scale
    k = k.reshape(B, heads, dim_head, N)
    v = v.reshape(B, heads, dim_head, N)
    sim = jnp.einsum('bhdi,bhdj->bhij', q, k)
    attn = jax.nn.softmax(sim, axis=-1)
    out = jnp.einsum('bhij,bhdj->bhid', attn, v)
    out = jnp.transpose(out, (0, 1, 3, 2)).reshape(B, hidden, H, W)  # b (h d) x y
    y = jax.lax.conv_general_dilated(
        out, w_out, window_strides=(1, 1), padding='VALID',
        dimension_numbers=('NCHW', 'OIHW', 'NCHW'))
    return y + b_out.reshape(1, -1, 1, 1)


if __name__ == "__main__":
    B, C, H, W = 2, 32, 16, 16
    heads, dim_head = 4, 32
    hidden = heads * dim_head

    key = jax.random.PRNGKey(0)
    k1, k2, k3, k4 = jax.random.split(key, 4)
    x = jax.random.normal(k1, (B, C, H, W), jnp.float32)
    w_qkv = 0.1 * jax.random.normal(k2, (hidden * 3, C, 1, 1), jnp.float32)
    w_out = 0.1 * jax.random.normal(k3, (C, hidden, 1, 1), jnp.float32)
    b_out = 0.1 * jax.random.normal(k4, (C,), jnp.float32)

    out = attention_forward(x, w_qkv, w_out, b_out, heads=heads, dim_head=dim_head)
    out = jax.block_until_ready(out)

    ref = attention_ref(x, w_qkv, w_out, b_out, heads=heads, dim_head=dim_head)
    assert out.shape == (B, C, H, W)
    err = float(jnp.max(jnp.abs(out - ref)))
    assert jnp.allclose(out, ref, atol=3e-2, rtol=3e-2), err

    print("KERNEL_OK")
</pallas_src>

<mosaic_0001>
module attributes {stable_mosaic.version = 11 : i64} {
  func.func @kernel(%arg0: i32, %arg1: memref<1x32x256xbf16, #tpu.memory_space<vmem>>, %arg2: memref<384x32xbf16, #tpu.memory_space<vmem>>, %arg3: memref<32x128xbf16, #tpu.memory_space<vmem>>, %arg4: memref<32x1xf32, #tpu.memory_space<vmem>>, %arg5: memref<1x32x256xf32, #tpu.memory_space<vmem>>, %arg6: memref<128x256xbf16, #tpu.memory_space<vmem>>) attributes {dimension_semantics = [#tpu.dimension_semantics<parallel>], iteration_bounds = array<i64: 2>, scalar_prefetch = 0 : i64, scratch_operands = 1 : i64, tpu.core_type = #tpu.core_type<tc>, window_params = [{transform_indices = @transform_0, window_bounds = array<i64: 1, 32, 256>}, {pipeline_mode = #tpu.pipeline_mode<synchronous>, transform_indices = @transform_1, window_bounds = array<i64: 384, 32>}, {pipeline_mode = #tpu.pipeline_mode<synchronous>, transform_indices = @transform_2, window_bounds = array<i64: 32, 128>}, {pipeline_mode = #tpu.pipeline_mode<synchronous>, transform_indices = @transform_3, window_bounds = array<i64: 32, 1>}, {transform_indices = @transform_4, window_bounds = array<i64: 1, 32, 256>}]} {
    %c0 = arith.constant 0 : index
    %c0_0 = arith.constant 0 : index
    %c0_1 = arith.constant 0 : index
    %0 = vector.load %arg1[%c0, %c0_0, %c0_1] : memref<1x32x256xbf16, #tpu.memory_space<vmem>>, vector<1x32x256xbf16>
    %1 = vector.shape_cast %0 : vector<1x32x256xbf16> to vector<32x256xbf16>
    %c0_2 = arith.constant 0 : index
    %c0_3 = arith.constant 0 : index
    %2 = vector.load %arg2[%c0_2, %c0_3] : memref<384x32xbf16, #tpu.memory_space<vmem>>, vector<384x32xbf16>
    %cst = arith.constant dense<0.000000e+00> : vector<384x256xf32>
    %3 = tpu.matmul %2, %1, %cst {dimension_numbers = #tpu.dot_dimension_numbers<[1], [0], [0], [1], [0, 0, 1, 1], [], []>} : vector<384x32xbf16>, vector<32x256xbf16>, vector<384x256xf32> -> vector<384x256xf32>
    %4 = vector.extract_strided_slice %3 {offsets = [0, 0], sizes = [32, 256], strides = [1, 1]} : vector<384x256xf32> to vector<32x256xf32>
    %5 = arith.truncf %4 : vector<32x256xf32> to vector<32x256xbf16>
    %6 = vector.extract_strided_slice %3 {offsets = [128, 0], sizes = [32, 256], strides = [1, 1]} : vector<384x256xf32> to vector<32x256xf32>
    %7 = arith.truncf %6 : vector<32x256xf32> to vector<32x256xbf16>
    %8 = vector.extract_strided_slice %3 {offsets = [256, 0], sizes = [32, 256], strides = [1, 1]} : vector<384x256xf32> to vector<32x256xf32>
    %9 = arith.truncf %8 : vector<32x256xf32> to vector<32x256xbf16>
    %cst_4 = arith.constant dense<0.000000e+00> : vector<256x256xf32>
    %10 = tpu.matmul %7, %5, %cst_4 {dimension_numbers = #tpu.dot_dimension_numbers<[0], [0], [1], [1], [0, 1, 1, 1], [], []>} : vector<32x256xbf16>, vector<32x256xbf16>, vector<256x256xf32> -> vector<256x256xf32>
    %cst_5 = arith.constant dense<0xFF800000> : vector<256xf32>
    %11 = vector.multi_reduction <maximumf>, %10, %cst_5 [0] : vector<256x256xf32> to vector<256xf32>
    %12 = vector.shape_cast %11 : vector<256xf32> to vector<1x256xf32>
    %13 = vector.broadcast %12 : vector<1x256xf32> to vector<256x256xf32>
    %14 = arith.subf %10, %13 : vector<256x256xf32>
    %15 = arith.truncf %14 : vector<256x256xf32> to vector<256x256xbf16>
    %16 = math.exp %15 : vector<256x256xbf16>
    %17 = arith.extf %16 : vector<256x256xbf16> to vector<256x256xf32>
    %cst_6 = arith.constant dense<0.000000e+00> : vector<256xf32>
    %18 = vector.multi_reduction <add>, %17, %cst_6 [0] : vector<256x256xf32> to vector<256xf32>
    %19 = vector.shape_cast %18 : vector<256xf32> to vector<1x256xf32>
    %cst_7 = arith.constant dense<0.000000e+00> : vector<32x256xf32>
    %20 = tpu.matmul %9, %16, %cst_7 {dimension_numbers = #tpu.dot_dimension_numbers<[1], [0], [0], [1], [0, 0, 1, 1], [], []>} : vector<32x256xbf16>, vector<256x256xbf16>, vector<32x256xf32> -> vector<32x256xf32>
    %21 = vector.broadcast %19 : vector<1x256xf32> to vector<32x256xf32>
    %22 = arith.divf %20, %21 : vector<32x256xf32>
    %23 = arith.truncf %22 : vector<32x256xf32> to vector<32x256xbf16>
    %c0_8 = arith.constant 0 : index
    %c0_9 = arith.constant 0 : index
    %24 = vector.load %arg6[%c0_8, %c0_9] : memref<128x256xbf16, #tpu.memory_space<vmem>>, vector<32x256xbf16>
    tpu.vector_store %arg6[%c0_8, %c0_9], %23 {strides = array<i32>} : memref<128x256xbf16, #tpu.memory_space<vmem>>, vector<32x256xbf16>,
    %25 = vector.extract_strided_slice %3 {offsets = [32, 0], sizes = [32, 256], strides = [1, 1]} : vector<384x256xf32> to vector<32x256xf32>
    %26 = arith.truncf %25 : vector<32x256xf32> to vector<32x256xbf16>
    %27 = vector.extract_strided_slice %3 {offsets = [160, 0], sizes = [32, 256], strides = [1, 1]} : vector<384x256xf32> to vector<32x256xf32>
    %28 = arith.truncf %27 : vector<32x256xf32> to vector<32x256xbf16>
    %29 = vector.extract_strided_slice %3 {offsets = [288, 0], sizes = [32, 256], strides = [1, 1]} : vector<384x256xf32> to vector<32x256xf32>
    %30 = arith.truncf %29 : vector<32x256xf32> to vector<32x256xbf16>
    %cst_10 = arith.constant dense<0.000000e+00> : vector<256x256xf32>
    %31 = tpu.matmul %28, %26, %cst_10 {dimension_numbers = #tpu.dot_dimension_numbers<[0], [0], [1], [1], [0, 1, 1, 1], [], []>} : vector<32x256xbf16>, vector<32x256xbf16>, vector<256x256xf32> -> vector<256x256xf32>
    %cst_11 = arith.constant dense<0xFF800000> : vector<256xf32>
    %32 = vector.multi_reduction <maximumf>, %31, %cst_11 [0] : vector<256x256xf32> to vector<256xf32>
    %33 = vector.shape_cast %32 : vector<256xf32> to vector<1x256xf32>
    %34 = vector.broadcast %33 : vector<1x256xf32> to vector<256x256xf32>
    %35 = arith.subf %31, %34 : vector<256x256xf32>
    %36 = arith.truncf %35 : vector<256x256xf32> to vector<256x256xbf16>
    %37 = math.exp %36 : vector<256x256xbf16>
    %38 = arith.extf %37 : vector<256x256xbf16> to vector<256x256xf32>
    %cst_12 = arith.constant dense<0.000000e+00> : vector<256xf32>
    %39 = vector.multi_reduction <add>, %38, %cst_12 [0] : vector<256x256xf32> to vector<256xf32>
    %40 = vector.shape_cast %39 : vector<256xf32> to vector<1x256xf32>
    %cst_13 = arith.constant dense<0.000000e+00> : vector<32x256xf32>
    %41 = tpu.matmul %30, %37, %cst_13 {dimension_numbers = #tpu.dot_dimension_numbers<[1], [0], [0], [1], [0, 0, 1, 1], [], []>} : vector<32x256xbf16>, vector<256x256xbf16>, vector<32x256xf32> -> vector<32x256xf32>
    %42 = vector.broadcast %40 : vector<1x256xf32> to vector<32x256xf32>
    %43 = arith.divf %41, %42 : vector<32x256xf32>
    %44 = arith.truncf %43 : vector<32x256xf32> to vector<32x256xbf16>
    %c32 = arith.constant 32 : index
    %c0_14 = arith.constant 0 : index
    %45 = vector.load %arg6[%c32, %c0_14] : memref<128x256xbf16, #tpu.memory_space<vmem>>, vector<32x256xbf16>
    tpu.vector_store %arg6[%c32, %c0_14], %44 {strides = array<i32>} : memref<128x256xbf16, #tpu.memory_space<vmem>>, vector<32x256xbf16>,
    %46 = vector.extract_strided_slice %3 {offsets = [64, 0], sizes = [32, 256], strides = [1, 1]} : vector<384x256xf32> to vector<32x256xf32>
    %47 = arith.truncf %46 : vector<32x256xf32> to vector<32x256xbf16>
    %48 = vector.extract_strided_slice %3 {offsets = [192, 0], sizes = [32, 256], strides = [1, 1]} : vector<384x256xf32> to vector<32x256xf32>
    %49 = arith.truncf %48 : vector<32x256xf32> to vector<32x256xbf16>
    %50 = vector.extract_strided_slice %3 {offsets = [320, 0], sizes = [32, 256], strides = [1, 1]} : vector<384x256xf32> to vector<32x256xf32>
    %51 = arith.truncf %50 : vector<32x256xf32> to vector<32x256xbf16>
    %cst_15 = arith.constant dense<0.000000e+00> : vector<256x256xf32>
    %52 = tpu.matmul %49, %47, %cst_15 {dimension_numbers = #tpu.dot_dimension_numbers<[0], [0], [1], [1], [0, 1, 1, 1], [], []>} : vector<32x256xbf16>, vector<32x256xbf16>, vector<256x256xf32> -> vector<256x256xf32>
    %cst_16 = arith.constant dense<0xFF800000> : vector<256xf32>
    %53 = vector.multi_reduction <maximumf>, %52, %cst_16 [0] : vector<256x256xf32> to vector<256xf32>
    %54 = vector.shape_cast %53 : vector<256xf32> to vector<1x256xf32>
    %55 = vector.broadcast %54 : vector<1x256xf32> to vector<256x256xf32>
    %56 = arith.subf %52, %55 : vector<256x256xf32>
    %57 = arith.truncf %56 : vector<256x256xf32> to vector<256x256xbf16>
    %58 = math.exp %57 : vector<256x256xbf16>
    %59 = arith.extf %58 : vector<256x256xbf16> to vector<256x256xf32>
    %cst_17 = arith.constant dense<0.000000e+00> : vector<256xf32>
    %60 = vector.multi_reduction <add>, %59, %cst_17 [0] : vector<256x256xf32> to vector<256xf32>
    %61 = vector.shape_cast %60 : vector<256xf32> to vector<1x256xf32>
    %cst_18 = arith.constant dense<0.000000e+00> : vector<32x256xf32>
    %62 = tpu.matmul %51, %58, %cst_18 {dimension_numbers = #tpu.dot_dimension_numbers<[1], [0], [0], [1], [0, 0, 1, 1], [], []>} : vector<32x256xbf16>, vector<256x256xbf16>, vector<32x256xf32> -> vector<32x256xf32>
    %63 = vector.broadcast %61 : vector<1x256xf32> to vector<32x256xf32>
    %64 = arith.divf %62, %63 : vector<32x256xf32>
    %65 = arith.truncf %64 : vector<32x256xf32> to vector<32x256xbf16>
    %c64 = arith.constant 64 : index
    %c0_19 = arith.constant 0 : index
    %66 = vector.load %arg6[%c64, %c0_19] : memref<128x256xbf16, #tpu.memory_space<vmem>>, vector<32x256xbf16>
    tpu.vector_store %arg6[%c64, %c0_19], %65 {strides = array<i32>} : memref<128x256xbf16, #tpu.memory_space<vmem>>, vector<32x256xbf16>,
    %67 = vector.extract_strided_slice %3 {offsets = [96, 0], sizes = [32, 256], strides = [1, 1]} : vector<384x256xf32> to vector<32x256xf32>
    %68 = arith.truncf %67 : vector<32x256xf32> to vector<32x256xbf16>
    %69 = vector.extract_strided_slice %3 {offsets = [224, 0], sizes = [32, 256], strides = [1, 1]} : vector<384x256xf32> to vector<32x256xf32>
    %70 = arith.truncf %69 : vector<32x256xf32> to vector<32x256xbf16>
    %71 = vector.extract_strided_slice %3 {offsets = [352, 0], sizes = [32, 256], strides = [1, 1]} : vector<384x256xf32> to vector<32x256xf32>
    %72 = arith.truncf %71 : vector<32x256xf32> to vector<32x256xbf16>
    %cst_20 = arith.constant dense<0.000000e+00> : vector<256x256xf32>
    %73 = tpu.matmul %70, %68, %cst_20 {dimension_numbers = #tpu.dot_dimension_numbers<[0], [0], [1], [1], [0, 1, 1, 1], [], []>} : vector<32x256xbf16>, vector<32x256xbf16>, vector<256x256xf32> -> vector<256x256xf32>
    %cst_21 = arith.constant dense<0xFF800000> : vector<256xf32>
    %74 = vector.multi_reduction <maximumf>, %73, %cst_21 [0] : vector<256x256xf32> to vector<256xf32>
    %75 = vector.shape_cast %74 : vector<256xf32> to vector<1x256xf32>
    %76 = vector.broadcast %75 : vector<1x256xf32> to vector<256x256xf32>
    %77 = arith.subf %73, %76 : vector<256x256xf32>
    %78 = arith.truncf %77 : vector<256x256xf32> to vector<256x256xbf16>
    %79 = math.exp %78 : vector<256x256xbf16>
    %80 = arith.extf %79 : vector<256x256xbf16> to vector<256x256xf32>
    %cst_22 = arith.constant dense<0.000000e+00> : vector<256xf32>
    %81 = vector.multi_reduction <add>, %80, %cst_22 [0] : vector<256x256xf32> to vector<256xf32>
    %82 = vector.shape_cast %81 : vector<256xf32> to vector<1x256xf32>
    %cst_23 = arith.constant dense<0.000000e+00> : vector<32x256xf32>
    %83 = tpu.matmul %72, %79, %cst_23 {dimension_numbers = #tpu.dot_dimension_numbers<[1], [0], [0], [1], [0, 0, 1, 1], [], []>} : vector<32x256xbf16>, vector<256x256xbf16>, vector<32x256xf32> -> vector<32x256xf32>
    %84 = vector.broadcast %82 : vector<1x256xf32> to vector<32x256xf32>
    %85 = arith.divf %83, %84 : vector<32x256xf32>
    %86 = arith.truncf %85 : vector<32x256xf32> to vector<32x256xbf16>
    %c96 = arith.constant 96 : index
    %c0_24 = arith.constant 0 : index
    %87 = vector.load %arg6[%c96, %c0_24] : memref<128x256xbf16, #tpu.memory_space<vmem>>, vector<32x256xbf16>
    tpu.vector_store %arg6[%c96, %c0_24], %86 {strides = array<i32>} : memref<128x256xbf16, #tpu.memory_space<vmem>>, vector<32x256xbf16>,
    %c0_25 = arith.constant 0 : index
    %c0_26 = arith.constant 0 : index
    %88 = vector.load %arg3[%c0_25, %c0_26] : memref<32x128xbf16, #tpu.memory_space<vmem>>, vector<32x128xbf16>
    %c0_27 = arith.constant 0 : index
    %c0_28 = arith.constant 0 : index
    %89 = vector.load %arg6[%c0_27, %c0_28] : memref<128x256xbf16, #tpu.memory_space<vmem>>, vector<128x256xbf16>
    %cst_29 = arith.constant dense<0.000000e+00> : vector<32x256xf32>
    %90 = tpu.matmul %88, %89, %cst_29 {dimension_numbers = #tpu.dot_dimension_numbers<[1], [0], [0], [1], [0, 0, 1, 1], [], []>} : vector<32x128xbf16>, vector<128x256xbf16>, vector<32x256xf32> -> vector<32x256xf32>
    %c0_30 = arith.constant 0 : index
    %c0_31 = arith.constant 0 : index
    %91 = vector.load %arg4[%c0_30, %c0_31] : memref<32x1xf32, #tpu.memory_space<vmem>>, vector<32x1xf32>
    %92 = vector.broadcast %91 : vector<32x1xf32> to vector<32x256xf32>
    %93 = arith.addf %90, %92 : vector<32x256xf32>
    %c0_32 = arith.constant 0 : index
    %c0_33 = arith.constant 0 : index
    %c0_34 = arith.constant 0 : index
    %94 = vector.load %arg5[%c0_32, %c0_33, %c0_34] : memref<1x32x256xf32, #tpu.memory_space<vmem>>, vector<1x32x256xf32>
    %95 = vector.shape_cast %94 : vector<1x32x256xf32> to vector<32x256xf32>
    %96 = vector.shape_cast %93 : vector<32x256xf32> to vector<1x32x256xf32>
    tpu.vector_store %arg5[%c0_32, %c0_33, %c0_34], %96 {strides = array<i32>} : memref<1x32x256xf32, #tpu.memory_space<vmem>>, vector<1x32x256xf32>,
    return
  }
  func.func @transform_0(%arg0: i32) -> (i32, i32, i32) {
    %c0_i32 = arith.constant 0 : i32
    %c0_i32_0 = arith.constant 0 : i32
    %c0_i32_1 = arith.constant 0 : i32
    return %arg0, %c0_i32, %c0_i32_0 : i32, i32, i32
  }
  func.func @transform_1(%arg0: i32) -> (i32, i32) {
    %c0_i32 = arith.constant 0 : i32
    %c0_i32_0 = arith.constant 0 : i32
    %c0_i32_1 = arith.constant 0 : i32
    return %c0_i32, %c0_i32_0 : i32, i32
  }
  func.func @transform_2(%arg0: i32) -> (i32, i32) {
    %c0_i32 = arith.constant 0 : i32
    %c0_i32_0 = arith.constant 0 : i32
    %c0_i32_1 = arith.constant 0 : i32
    return %c0_i32, %c0_i32_0 : i32, i32
  }
  func.func @transform_3(%arg0: i32) -> (i32, i32) {
    %c0_i32 = arith.constant 0 : i32
    %c0_i32_0 = arith.constant 0 : i32
    %c0_i32_1 = arith.constant 0 : i32
    return %c0_i32, %c0_i32_0 : i32, i32
  }
  func.func @transform_4(%arg0: i32) -> (i32, i32, i32) {
    %c0_i32 = arith.constant 0 : i32
    %c0_i32_0 = arith.constant 0 : i32
    %c0_i32_1 = arith.constant 0 : i32
    return %arg0, %c0_i32, %c0_i32_0 : i32, i32, i32
  }
}

</mosaic_0001>

<bundles_post_ra>
// kernel: tpu_custom_call.1
= control target key start
LH: loop header
LB: loop body
LE: loop exit
PB: predicated region body
PF: predicated region fallthrough
CT: control target
= control target key end

     0   :  { %9 = vsyncpa [#allocation4], 0  ;;  %s9165_s0 = inlined_call_operand.vmem [shape: bf16[2,32,256], index: 0, kind: input, shape index: {}]   ;;  %s9166_s1 = inlined_call_operand.vmem [shape: bf16[384,32], index: 1, kind: input, shape index: {}]   ;;  %s9167_s2 = inlined_call_operand.vmem [shape: bf16[32,128], index: 2, kind: input, shape index: {}]   ;;  %s9168_s3 = inlined_call_operand.vmem [shape: f32[32,1], index: 3, kind: input, shape index: {}]   ;;  %s9169_s4 = inlined_call_operand.hbm [shape: f32[2,32,256], index: 4, kind: output, shape index: {}]  }
   0x1   :  { %11 = vsyncpa [#allocation4 + $0x1], 0  ;;  %s5725_s15 = smov 0   ;;  %s5727_s16 = smov 0  }
   0x2   :  { %s5729_s17 = smov 0   ;;  %s5731_s18 = smov 0  }
   0x3 LB: > { %s5746_s19 = sadd.s32 4294967295, %s5695_s18   ;;  %s4636_s20 = sadd.s32 4294967294, %s5695_s18   ;;  %s5695_s18 = sphi %s5731_s18, %s9685_s18   ;;  %s5691_s17 = sphi %s5729_s17, %s9684_s17   ;;  %s5687_s16 = sphi %s5727_s16, %s9683_s16   ;;  %s5683_s15 = sphi %s5725_s15, %s9682_s15  }
   0x4   : > { %s5750_s21 = sadd.s32 1, %s5695_s18   ;;  %s113_s22 = sadd.s32 1, %s5691_s17 }
   0x5   : > { %s110_s23 = ssub.s32 %s5695_s18, %s5750_s21  ;;  %p123_p0 = scmp.ne.s32.totalorder %s5691_s17, %s5687_s16 }
   0x6   : > { %p111_p1 = scmp.eq.s32.totalorder %s110_s23, 0  ;;  %p124_p2 = scmp.eq.s32.totalorder %s5746_s19, 1 }
   0x7   : > { %p129_p3 = scmp.ne.s32.totalorder %s5687_s16, %s5683_s15  ;;  %p130_p4 = scmp.eq.s32.totalorder %s4636_s20, 1 }
   0x8   : > { %s5761_s24 = scalar_select %p111_p1, %s5691_s17, %s113_s22  }
   0x9   : > { %p5763_p5 = por %p124_p2, %p123_p0  ;;  %p5767_p6 = por %p130_p4, %p129_p3 }
   0xa   : > { %p4639_p7 = scmp.ge.s32.totalorder %s5695_s18, 1  ;;  %p165_p8 = scmp.lt.s32.totalorder %s5695_s18, 3 }
   0xc   : > { %p166_p9 = pnand %p4639_p7, %p165_p8 }
   0xe   : > { %169 = sbr.rel (%p166_p9) target bundleno = 2991 (0xbaf), region = 36 }
  0x13   : > { %p191_p10 = scmp.lt.s32.totalorder %s5746_s19, 1  ;;  %v5013_v12 = vld [vmem:[%s9166_s1] sm:$0xff]  ;;  %vm389_vm0 = vcmask 261120   ;;  %v5014_v13 = vld [vmem:[%s9166_s1 + $0x8] sm:$0xff]  ;;  %v5015_v14 = vld [vmem:[%s9166_s1 + $0x10] sm:$0xff]  ;;  %s188_s20 = sand.u32 1, %s5687_s16  }
  0x14   : > { %v5016_v15 = vld [vmem:[%s9166_s1 + $0x18] sm:$0xff]  ;;  %v5017_v16 = vld [vmem:[%s9166_s1 + $0x20] sm:$0xff]  ;;  %v5018_v17 = vld [vmem:[%s9166_s1 + $0x28] sm:$0xff]  ;;  %s4640_s22 = sshll.u32 %s188_s20, 6  ;;  %s5653_s11 = scalar_lea.hbm %s9169_s4, 128 }
  0x15   : > { %s192_s27 = scalar_select %p191_p10, %s5746_s19, 1  ;;  %v5019_v18 = vld [vmem:[%s9166_s1 + $0x30] sm:$0xff]  ;;  %v5020_v19 = vld [vmem:[%s9166_s1 + $0x38] sm:$0xff]  ;;  %v5021_v20 = vld [vmem:[%s9166_s1 + $0x40] sm:$0xff] }
  0x16   : > { %v5022_v25 = vld [vmem:[%s9166_s1 + $0x48] sm:$0xff]  ;;  %v5023_v40 = vld [vmem:[%s9166_s1 + $0x50] sm:$0xff]  ;;  %v5024_v45 = vld [vmem:[%s9166_s1 + $0x58] sm:$0xff]  ;;  %s190_s23 = scalar_lea.vmem [#allocation3], %s4640_s22 }
  0x17   : > { %s5008_s28 = sshll.u32 %s192_s27, 5  ;;  %v5025_v50 = vld [vmem:[%s9166_s1 + $0x60] sm:$0xff]  ;;  %v5026_v55 = vld [vmem:[%s9166_s1 + $0x68] sm:$0xff]  ;;  %v5027_v60 = vld [vmem:[%s9166_s1 + $0x70] sm:$0xff]  ;;  %s5055_s27 = sshll.u32 %s5746_s19, 6 }
  0x18   : > { %s195_s5 = scalar_lea.vmem %s9165_s0, %s5008_s28  ;;  %s4570_s30 = scalar_lea.hbm %s9169_s4, %s5055_s27 }
  0x19   : > { %v4749_v0 = vld [vmem:[%s195_s5 + $0x10] sm:$0xf]  ;;  %v5012_v1 = vld [vmem:[%s195_s5 + $0x14] sm:$0xf0]  ;;  %v5011_v2 = vld [vmem:[%s195_s5 + $0x14] sm:$0xf] }
  0x1a   : > { %v4750_v3 = vor.u32 %v5012_v1, %v4749_v0  ;;  %v4751_v4 = vld [vmem:[%s195_s5 + $0x18] sm:$0xf0]  ;;  %v4741_v5 = vld [vmem:[%s195_s5] sm:$0xf]  ;;  %v5010_v6 = vld [vmem:[%s195_s5 + $0x4] sm:$0xf0] }
  0x1b   : > { %v4754_v7 = vor.u32 %v5011_v2, %v4751_v4  ;;  %v5009_v8 = vld [vmem:[%s195_s5 + $0x4] sm:$0xf]  ;;  %v4743_v9 = vld [vmem:[%s195_s5 + $0x8] sm:$0xf0]  ;;  %v4742_v10 = vor.u32 %v5010_v6, %v4741_v5  ;;  %v5028_v1 = vld [vmem:[%s9166_s1 + $0x78] sm:$0xff]  ;;  %s4571_s5 = sshll.u32 %s190_s23, 4  ;;  %s4572_s5 = int_to_ptr.vmem [resolvable:$true] %s4571_s5 }
  0x1c   : > { %468 = vmatpush.bf16.msra.mxu0 %v4750_v3  ;;  %v4746_v11 = vor.u32 %v5009_v8, %v4743_v9  ;;  %v5029_v8 = vld [vmem:[%s9166_s1 + $0x80] sm:$0xff]  ;;  %s4573_s6 = sshll.u32 %s4570_s30, 4  ;;  %s4559_s19 = scalar_lea.sflag [#allocation4], %s188_s20  ;;  %s4574_s6 = int_to_ptr.hbm [resolvable:$true] %s4573_s6 }
  0x1d   : > { %597 = vmatpush.bf16.msra.mxu1 %v4754_v7  ;;  %s5647_s7 = sshra.s32 %s4574_s6, 4  ;;  %s5648_s7 = int_to_ptr.hbm [resolvable:$true] %s5647_s7 }
  0x1e   : > { %s5649_s8 = scalar_lea.hbm %s5648_s7, 64  ;;  %p5654_p0 = scmp.lt.s32.totalorder %s5648_s7, %s9169_s4 }
  0x1f   : > { %p5650_p11 = scmp.ne.s32.totalorder %s5648_s7, %s5649_s8  ;;  %p5655_p1 = scmp.lt.s32.totalorder %s5653_s11, %s5649_s8 }
  0x20   : > { %469 = vmatpush.bf16.msra.mxu0 %v4742_v10 }
  0x21   : > { %598 = vmatpush.bf16.msra.mxu1 %v4746_v11  ;;  %p5651_p12 = pnand %p5650_p11, %p5763_p5  ;;  %p5656_p2 = por %p5655_p1, %p5654_p0 }
  0x23   : > { %4755 = vmatmul.msk.bf16.vlgmr.msra.gmra.mxu0 %vm389_vm0, %v5013_v12  ;;  %p5652_p13 = pneg %p5651_p12 }
  0x24   : > { %4779 = vmatmul.msk.bf16.vlgmr.msra.gmra.mxu1 %vm389_vm0, %v5013_v12 }
  0x25   : > { %p5657_p3 = pnand %p5656_p2, %p5652_p13 }
  0x33   : > { %4756 = vmatmul.msk.bf16.gmra.mxu0 %vm389_vm0, %v5014_v13 }
  0x34   : > { %4780 = vmatmul.msk.bf16.gmra.mxu1 %vm389_vm0, %v5014_v13  ;;  %v5030_v13 = vld [vmem:[%s9166_s1 + $0x88] sm:$0xff] }
  0x43   : > { %4757 = vmatmul.msk.bf16.gmra.mxu0 %vm389_vm0, %v5015_v14 }
  0x44   : > { %4781 = vmatmul.msk.bf16.gmra.mxu1 %vm389_vm0, %v5015_v14  ;;  %v5031_v14 = vld [vmem:[%s9166_s1 + $0x90] sm:$0xff] }
  0x53   : > { %4758 = vmatmul.msk.bf16.gmra.mxu0 %vm389_vm0, %v5016_v15 }
  0x54   : > { %4782 = vmatmul.msk.bf16.gmra.mxu1 %vm389_vm0, %v5016_v15 }
  0x63   : > { %4759 = vmatmul.msk.bf16.gmra.mxu0 %vm389_vm0, %v5017_v16 }
  0x64   : > { %4783 = vmatmul.msk.bf16.gmra.mxu1 %vm389_vm0, %v5017_v16 }
  0x73   : > { %4760 = vmatmul.msk.bf16.gmra.mxu0 %vm389_vm0, %v5018_v17 }
  0x74   : > { %4784 = vmatmul.msk.bf16.gmra.mxu1 %vm389_vm0, %v5018_v17 }
  0x83   : > { %4761 = vmatmul.msk.bf16.gmra.mxu0 %vm389_vm0, %v5019_v18 }
  0x84   : > { %4785 = vmatmul.msk.bf16.gmra.mxu1 %vm389_vm0, %v5019_v18 }
  0x93   : > { %4762 = vmatmul.msk.bf16.gmra.mxu0 %vm389_vm0, %v5020_v19 }
  0x94   : > { %4786 = vmatmul.msk.bf16.gmra.mxu1 %vm389_vm0, %v5020_v19  ;;  %v5032_v19 = vld [vmem:[%s9166_s1 + $0x98] sm:$0xff] }
  0xa0   : > { %v471_v21 = vpop.f32.mrf.mxu0 }
  0xa1   : > { %v600_v22 = vpop.f32.mrf.mxu1 }
  0xa3   : > { %4763 = vmatmul.msk.bf16.gmra.mxu0 %vm389_vm0, %v5021_v20 }
  0xa4   : > { %4787 = vmatmul.msk.bf16.gmra.mxu1 %vm389_vm0, %v5021_v20 }
  0xa8   : > { %v473_v23 = vpop.f32.mrf.mxu0 }
  0xa9   : > { %v602_v24 = vpop.f32.mrf.mxu1  ;;  %v720_v32 = vpack.c.bf16 %v473_v23, %v471_v21 }
  0xaa   : > { %v721_v33 = vpack.c.bf16 %v602_v24, %v600_v22 }
  0xb0   : > { %v476_v26 = vpop.f32.mrf.mxu0 }
  0xb1   : > { %v605_v27 = vpop.f32.mrf.mxu1 }
  0xb3   : > { %4764 = vmatmul.msk.bf16.gmra.mxu0 %vm389_vm0, %v5022_v25 }
  0xb4   : > { %4788 = vmatmul.msk.bf16.gmra.mxu1 %vm389_vm0, %v5022_v25 }
  0xb8   : > { %v478_v28 = vpop.f32.mrf.mxu0 }
  0xb9   : > { %v607_v29 = vpop.f32.mrf.mxu1  ;;  %v722_v30 = vpack.c.bf16 %v478_v28, %v476_v26  ;;  %v5033_v26 = vld [vmem:[%s9166_s1 + $0xa0] sm:$0xff] }
  0xba   : > { %v723_v31 = vpack.c.bf16 %v607_v29, %v605_v27 }
  0xbb   : > { %810 = vmatpush.bf16.msrb.mxu0 %v722_v30  ;;  %5056 = vmatpush.bf16.msra.mxu2 %v722_v30 }
  0xbc   : > { %899 = vmatpush.bf16.msrb.mxu1 %v723_v31  ;;  %5058 = vmatpush.bf16.msra.mxu3 %v723_v31  ;;  %v5034_v31 = vld [vmem:[%s9166_s1 + $0xa8] sm:$0xff] }
  0xbf   : > { %811 = vmatpush.bf16.msrb.mxu0 %v720_v32  ;;  %5057 = vmatpush.bf16.msra.mxu2 %v720_v32 }
  0xc0   : > { %900 = vmatpush.bf16.msrb.mxu1 %v721_v33  ;;  %5059 = vmatpush.bf16.msra.mxu3 %v721_v33  ;;  %v5828_v34 = vpop.f32.mrf.mxu0 }
  0xc1   : > { %9277 = vst [vmem:[#allocation6_spill] sm:$0xff] %v5828_v34  ;;  %v5830_v35 = vpop.f32.mrf.mxu1 }
  0xc2   : > { %9278 = vst [vmem:[#allocation7_spill] sm:$0xff] %v5830_v35 }
  0xc3   : > { %4765 = vmatmul.msk.bf16.gmra.mxu0 %vm389_vm0, %v5023_v40 }
  0xc4   : > { %4789 = vmatmul.msk.bf16.gmra.mxu1 %vm389_vm0, %v5023_v40 }
  0xc8   : > { %v5832_v36 = vpop.f32.mrf.mxu0 }
  0xc9   : > { %9279 = vst [vmem:[#allocation8_spill] sm:$0xff] %v5832_v36  ;;  %v5834_v37 = vpop.f32.mrf.mxu1 }
  0xca   : > { %9280 = vst [vmem:[#allocation9_spill] sm:$0xff] %v5834_v37 }
  0xd0   : > { %v5836_v38 = vpop.f32.mrf.mxu0 }
  0xd1   : > { %9281 = vst [vmem:[#allocation10_spill] sm:$0xff] %v5836_v38  ;;  %v5838_v39 = vpop.f32.mrf.mxu1 }
  0xd2   : > { %9282 = vst [vmem:[#allocation11_spill] sm:$0xff] %v5838_v39 }
  0xd3   : > { %4766 = vmatmul.msk.bf16.gmra.mxu0 %vm389_vm0, %v5024_v45 }
  0xd4   : > { %4790 = vmatmul.msk.bf16.gmra.mxu1 %vm389_vm0, %v5024_v45 }
  0xd8   : > { %v5843_v41 = vpop.f32.mrf.mxu0 }
  0xd9   : > { %9283 = vst [vmem:[#allocation12_spill] sm:$0xff] %v5843_v41  ;;  %v5845_v42 = vpop.f32.mrf.mxu1 }
  0xda   : > { %9284 = vst [vmem:[#allocation13_spill] sm:$0xff] %v5845_v42 }
  0xe0   : > { %v5849_v43 = vpop.f32.mrf.mxu0 }
  0xe1   : > { %9285 = vst [vmem:[#allocation14_spill] sm:$0xff] %v5849_v43  ;;  %v5851_v44 = vpop.f32.mrf.mxu1 }
  0xe2   : > { %9286 = vst [vmem:[#allocation15_spill] sm:$0xff] %v5851_v44 }
  0xe3   : > { %4767 = vmatmul.msk.bf16.gmra.mxu0 %vm389_vm0, %v5025_v50 }
  0xe4   : > { %4791 = vmatmul.msk.bf16.gmra.mxu1 %vm389_vm0, %v5025_v50  ;;  %v5035_v50 = vld [vmem:[%s9166_s1 + $0xb0] sm:$0xff] }
  0xe8   : > { %v5856_v46 = vpop.f32.mrf.mxu0 }
  0xe9   : > { %9287 = vst [vmem:[#allocation16_spill] sm:$0xff] %v5856_v46  ;;  %v5858_v47 = vpop.f32.mrf.mxu1 }
  0xea   : > { %9288 = vst [vmem:[#allocation17_spill] sm:$0xff] %v5858_v47 }
  0xf0   : > { %v5862_v48 = vpop.f32.mrf.mxu0 }
  0xf1   : > { %9289 = vst [vmem:[#allocation18_spill] sm:$0xff] %v5862_v48  ;;  %v5864_v49 = vpop.f32.mrf.mxu1 }
  0xf2   : > { %9290 = vst [vmem:[#allocation19_spill] sm:$0xff] %v5864_v49 }
  0xf3   : > { %4768 = vmatmul.msk.bf16.gmra.mxu0 %vm389_vm0, %v5026_v55 }
  0xf4   : > { %4792 = vmatmul.msk.bf16.gmra.mxu1 %vm389_vm0, %v5026_v55 }
  0xf8   : > { %v5869_v51 = vpop.f32.mrf.mxu0 }
  0xf9   : > { %9291 = vst [vmem:[#allocation20_spill] sm:$0xff] %v5869_v51  ;;  %v5871_v52 = vpop.f32.mrf.mxu1 }
  0xfa   : > { %9292 = vst [vmem:[#allocation21_spill] sm:$0xff] %v5871_v52 }
 0x100   : > { %v5875_v53 = vpop.f32.mrf.mxu0 }
 0x101   : > { %9293 = vst [vmem:[#allocation22_spill] sm:$0xff] %v5875_v53  ;;  %v5877_v54 = vpop.f32.mrf.mxu1 }
 0x102   : > { %9294 = vst [vmem:[#allocation23_spill] sm:$0xff] %v5877_v54 }
 0x103   : > { %4769 = vmatmul.msk.bf16.gmra.mxu0 %vm389_vm0, %v5027_v60 }
 0x104   : > { %4793 = vmatmul.msk.bf16.gmra.mxu1 %vm389_vm0, %v5027_v60 }
 0x108   : > { %v5882_v56 = vpop.f32.mrf.mxu0 }
 0x109   : > { %9295 = vst [vmem:[#allocation24_spill] sm:$0xff] %v5882_v56  ;;  %v5884_v57 = vpop.f32.mrf.mxu1 }
 0x10a   : > { %9296 = vst [vmem:[#allocation25_spill] sm:$0xff] %v5884_v57 }
 0x110   : > { %v5888_v58 = vpop.f32.mrf.mxu0 }
 0x111   : > { %9297 = vst [vmem:[#allocation26_spill] sm:$0xff] %v5888_v58  ;;  %v5890_v59 = vpop.f32.mrf.mxu1 }
 0x112   : > { %9298 = vst [vmem:[#allocation27_spill] sm:$0xff] %v5890_v59 }
 0x113   : > { %4770 = vmatmul.msk.bf16.gmra.mxu0 %vm389_vm0, %v5028_v1 }
 0x114   : > { %4794 = vmatmul.msk.bf16.gmra.mxu1 %vm389_vm0, %v5028_v1  ;;  %v5036_v1 = vld [vmem:[%s9166_s1 + $0xb8] sm:$0xff] }
 0x118   : > { %v5895_v61 = vpop.f32.mrf.mxu0 }
 0x119   : > { %9299 = vst [vmem:[#allocation28_spill] sm:$0xff] %v5895_v61  ;;  %v5897_v62 = vpop.f32.mrf.mxu1 }
 0x11a   : > { %9300 = vst [vmem:[#allocation29_spill] sm:$0xff] %v5897_v62 }
 0x120   : > { %v511_v63 = vpop.f32.mrf.mxu0 }
 0x121   : > { %v640_v0 = vpop.f32.mrf.mxu1 }
 0x123   : > { %4771 = vmatmul.msk.bf16.gmra.mxu0 %vm389_vm0, %v5029_v8 }
 0x124   : > { %4795 = vmatmul.msk.bf16.gmra.mxu1 %vm389_vm0, %v5029_v8 }
 0x128   : > { %v513_v2 = vpop.f32.mrf.mxu0 }
 0x129   : > { %v642_v3 = vpop.f32.mrf.mxu1  ;;  %v724_v4 = vpack.c.bf16 %v513_v2, %v511_v63 }
 0x12a   : > { %v725_v5 = vpack.c.bf16 %v642_v3, %v640_v0 }
 0x12c   : > { %732 = vxpose.binary.xlu0.c.b16.start [1/4] (short) %v725_v5, %v724_v4, 128 }
 0x130   : > { %v516_v6 = vpop.f32.mrf.mxu0 }
 0x131   : > { %v645_v7 = vpop.f32.mrf.mxu1 }
 0x133   : > { %4772 = vmatmul.msk.bf16.gmra.mxu0 %vm389_vm0, %v5030_v13 }
 0x134   : > { %4796 = vmatmul.msk.bf16.gmra.mxu1 %vm389_vm0, %v5030_v13 }
 0x138   : > { %v518_v9 = vpop.f32.mrf.mxu0 }
 0x139   : > { %v726_v10 = vpack.c.bf16 %v518_v9, %v516_v6  ;;  %v647_v11 = vpop.f32.mrf.mxu1 }
 0x13a   : > { %v727_v12 = vpack.c.bf16 %v647_v11, %v645_v7 }
 0x13c   : > { %733 = vxpose.binary.xlu0.c.b16.end [2/4] (short) %v727_v12, %v726_v10, 128 }
 0x140   : > { %v5919_v15 = vpop.f32.mrf.mxu0 }
 0x141   : > { %v5921_v16 = vpop.f32.mrf.mxu1 }
 0x143   : > { %4773 = vmatmul.msk.bf16.gmra.mxu0 %vm389_vm0, %v5031_v14 }
 0x144   : > { %4797 = vmatmul.msk.bf16.gmra.mxu1 %vm389_vm0, %v5031_v14 }
 0x148   : > { %v5925_v17 = vpop.f32.mrf.mxu0 }
 0x149   : > { %v5927_v18 = vpop.f32.mrf.mxu1 }
 0x150   : > { %v5932_v20 = vpop.f32.mrf.mxu0 }
 0x151   : > { %v5934_v21 = vpop.f32.mrf.mxu1 }
 0x153   : > { %4774 = vmatmul.msk.bf16.gmra.mxu0 %vm389_vm0, %v5032_v19 }
 0x154   : > { %4798 = vmatmul.msk.bf16.gmra.mxu1 %vm389_vm0, %v5032_v19 }
 0x158   : > { %v528_v22 = vpop.f32.mrf.mxu0 }
 0x159   : > { %v657_v23 = vpop.f32.mrf.mxu1  ;;  %v1640_v24 = vpack.c.bf16 %v528_v22, %v5932_v20  ;;  %v1638_v22 = vpack.c.bf16 %v5925_v17, %v5919_v15 }
 0x15a   : > { %v1641_v25 = vpack.c.bf16 %v657_v23, %v5934_v21  ;;  %v1639_v23 = vpack.c.bf16 %v5927_v18, %v5921_v16 }
 0x15c   : > { %1646 = vxpose.binary.xlu1.c.b16.start [1/4] (short) %v1639_v23, %v1638_v22, 128 }
 0x160   : > { %v5943_v27 = vpop.f32.mrf.mxu0 }
 0x161   : > { %v660_v28 = vpop.f32.mrf.mxu1 }
 0x163   : > { %4775 = vmatmul.msk.bf16.gmra.mxu0 %vm389_vm0, %v5033_v26 }
 0x164   : > { %4799 = vmatmul.msk.bf16.gmra.mxu1 %vm389_vm0, %v5033_v26 }
 0x168   : > { %v533_v29 = vpop.f32.mrf.mxu0 }
 0x169   : > { %v662_v30 = vpop.f32.mrf.mxu1 }
 0x16c   : > { %1647 = vxpose.binary.xlu1.c.b16.end [2/4] (short) %v1641_v25, %v1640_v24, 128 }
 0x170   : > { %v5950_v32 = vpop.f32.mrf.mxu0 }
 0x171   : > { %v665_v33 = vpop.f32.mrf.mxu1 }
 0x173   : > { %4776 = vmatmul.msk.bf16.gmra.mxu0 %vm389_vm0, %v5034_v31 }
 0x174   : > { %4800 = vmatmul.msk.bf16.gmra.mxu1 %vm389_vm0, %v5034_v31 }
 0x178   : > { %v538_v40 = vpop.f32.mrf.mxu0 }
 0x179   : > { %v667_v45 = vpop.f32.mrf.mxu1  ;;  %v2554_v16 = vpack.c.bf16 %v538_v40, %v5950_v32 }
 0x17a   : > { %v2555_v17 = vpack.c.bf16 %v667_v45, %v665_v33 }
 0x180   : > { %v541_v55 = vpop.f32.mrf.mxu0 }
 0x181   : > { %v670_v60 = vpop.f32.mrf.mxu1 }
 0x183   : > { %4777 = vmatmul.msk.bf16.gmra.mxu0 %vm389_vm0, %v5035_v50 }
 0x184   : > { %4801 = vmatmul.msk.bf16.gmra.mxu1 %vm389_vm0, %v5035_v50 }
 0x188   : > { %v543_v63 = vpop.f32.mrf.mxu0 }
 0x189   : > { %v672_v0 = vpop.f32.mrf.mxu1  ;;  %v3466_v2 = vpack.c.bf16 %v543_v63, %v541_v55  ;;  %v2552_v55 = vpack.c.bf16 %v533_v29, %v5943_v27 }
 0x18a   : > { %v3467_v3 = vpack.c.bf16 %v672_v0, %v670_v60  ;;  %v2553_v60 = vpack.c.bf16 %v662_v30, %v660_v28 }
 0x18c   : > { %2560 = vxpose.binary.xlu2.c.b16.start [1/4] (short) %v2553_v60, %v2552_v55, 128 }
 0x190   : > { %v546_v4 = vpop.f32.mrf.mxu0 }
 0x191   : > { %v675_v5 = vpop.f32.mrf.mxu1 }
 0x193   : > { %4778 = vmatmul.msk.bf16.gmra.mxu0 %vm389_vm0, %v5036_v1 }
 0x194   : > { %4802 = vmatmul.msk.bf16.gmra.mxu1 %vm389_vm0, %v5036_v1 }
 0x198   : > { %v548_v6 = vpop.f32.mrf.mxu0 }
 0x199   : > { %v677_v7 = vpop.f32.mrf.mxu1  ;;  %v3468_v8 = vpack.c.bf16 %v548_v6, %v546_v4 }
 0x19a   : > { %v3469_v9 = vpack.c.bf16 %v677_v7, %v675_v5 }
 0x19c   : > { %2561 = vxpose.binary.xlu2.c.b16.end [2/4] (short) %v2555_v17, %v2554_v16, 128 }
 0x1a0   : > { %v5990_v27 = vpop.f32.mrf.mxu0 }
 0x1a1   : > { %9301 = vst [vmem:[#allocation30_spill] sm:$0xff] %v5990_v27  ;;  %v5994_v28 = vpop.f32.mrf.mxu1 }
 0x1a2   : > { %9302 = vst [vmem:[#allocation31_spill] sm:$0xff] %v5994_v28 }
 0x1a8   : > { %v5996_v29 = vpop.f32.mrf.mxu0 }
 0x1a9   : > { %9303 = vst [vmem:[#allocation32_spill] sm:$0xff] %v5996_v29  ;;  %v5998_v30 = vpop.f32.mrf.mxu1 }
 0x1aa   : > { %9304 = vst [vmem:[#allocation33_spill] sm:$0xff] %v5998_v30 }
 0x1ac   : > { %3474 = vxpose.binary.xlu0.c.b16.start [1/4] (short) %v3467_v3, %v3466_v2, 128 }
 0x1b0   : > { %v6000_v32 = vpop.f32.mrf.mxu0 }
 0x1b1   : > { %9305 = vst [vmem:[#allocation34_spill] sm:$0xff] %v6000_v32  ;;  %v6008_v45 = vpop.f32.mrf.mxu1 }
 0x1b2   : > { %9306 = vst [vmem:[#allocation35_spill] sm:$0xff] %v6008_v45 }
 0x1b8   : > { %v6010_v63 = vpop.f32.mrf.mxu0 }
 0x1b9   : > { %9307 = vst [vmem:[#allocation36_spill] sm:$0xff] %v6010_v63  ;;  %v6018_v2 = vpop.f32.mrf.mxu1 }
 0x1ba   : > { %9310 = vst [vmem:[#allocation39_spill] sm:$0xff] %v6018_v2 }
 0x1bc   : > { %3475 = vxpose.binary.xlu0.c.b16.end [2/4] (short) %v3469_v9, %v3468_v8, 128 }
 0x1c0   : > { %v6020_v3 = vpop.f32.mrf.mxu0 }
 0x1c1   : > { %9311 = vst [vmem:[#allocation40_spill] sm:$0xff] %v6020_v3  ;;  %v6030_v8 = vpop.f32.mrf.mxu1 }
 0x1c2   : > { %9313 = vst [vmem:[#allocation42_spill] sm:$0xff] %v6030_v8 }
 0x1c8   : > { %v6032_v9 = vpop.f32.mrf.mxu0 }
 0x1c9   : > { %9314 = vst [vmem:[#allocation43_spill] sm:$0xff] %v6032_v9 }
 0x1d8   : > { %v740_v10 = vpop.trf.xlu0 }
 0x1d9   : > { %4803 = vmatmul.msk.bf16.vlgmr.msrb.gmra.mxu0 %vm389_vm0, %v740_v10  ;;  %4819 = vmatmul.msk.bf16.vlgmr.msrb.gmra.mxu1 %vm389_vm0, %v740_v10 }
 0x1e0   : > { %v741_v11 = vpop.trf.xlu0 }
 0x1e8   : > { %v742_v12 = vpop.trf.xlu0 }
 0x1e9   : > { %4804 = vmatmul.msk.bf16.gmra.mxu0 %vm389_vm0, %v742_v12  ;;  %4820 = vmatmul.msk.bf16.gmra.mxu1 %vm389_vm0, %v742_v12  ;;  %v6040_v12 = vpop.f32.mrf.mxu1 }
 0x1ea   : > { %9315 = vst [vmem:[#allocation44_spill] sm:$0xff] %v6040_v12 }
 0x1f0   : > { %v743_v13 = vpop.trf.xlu0 }
 0x1f8   : > { %v744_v14 = vpop.trf.xlu0 }
 0x1f9   : > { %4805 = vmatmul.msk.bf16.gmra.mxu0 %vm389_vm0, %v744_v14  ;;  %4821 = vmatmul.msk.bf16.gmra.mxu1 %vm389_vm0, %v744_v14 }
 0x200   : > { %v745_v19 = vpop.trf.xlu0 }
 0x208   : > { %v746_v20 = vpop.trf.xlu0 }
 0x209   : > { %4806 = vmatmul.msk.bf16.vlgmr.msra.gmra.mxu2 %vm389_vm0, %v746_v20  ;;  %4822 = vmatmul.msk.bf16.vlgmr.msra.gmra.mxu3 %vm389_vm0, %v746_v20  ;;  %v6048_v20 = vpop.f32.mrf.mxu1 }
 0x20a   : > { %9318 = vst [vmem:[#allocation47_spill] sm:$0xff] %v6048_v20 }
 0x210   : > { %v747_v21 = vpop.trf.xlu0 }
 0x218   : > { %v748_v26 = vpop.trf.xlu0 }
 0x219   : > { %4807 = vmatmul.msk.bf16.gmra.mxu2 %vm389_vm0, %v748_v26  ;;  %4823 = vmatmul.msk.bf16.gmra.mxu3 %vm389_vm0, %v748_v26  ;;  %v6058_v26 = vpop.f32.mrf.mxu1 }
 0x21a   : > { %9320 = vst [vmem:[#allocation49_spill] sm:$0xff] %v6058_v26 }
 0x220   : > { %v749_v31 = vpop.trf.xlu0 }
 0x221   : > { %v6072_v17 = vpop.f32.mrf.mxu1 }
 0x222   : > { %9323 = vst [vmem:[#allocation52_spill] sm:$0xff] %v6072_v17 }
 0x228   : > { %v750_v50 = vpop.trf.xlu0 }
 0x229   : > { %4808 = vmatmul.msk.bf16.gmra.mxu2 %vm389_vm0, %v750_v50  ;;  %4824 = vmatmul.msk.bf16.gmra.mxu3 %vm389_vm0, %v750_v50  ;;  %v6080_v57 = vpop.f32.mrf.mxu1 }
 0x22a   : > { %9326 = vst [vmem:[#allocation55_spill] sm:$0xff] %v6080_v57 }
 0x230   : > { %v751_v15 = vpop.trf.xlu0 }
 0x238   : > { %v752_v18 = vpop.trf.xlu0 }
 0x239   : > { %4809 = vmatmul.msk.bf16.gmra.mxu2 %vm389_vm0, %v752_v18  ;;  %4825 = vmatmul.msk.bf16.gmra.mxu3 %vm389_vm0, %v752_v18 }
 0x240   : > { %v753_v24 = vpop.trf.xlu0 }
 0x248   : > { %v754_v25 = vpop.trf.xlu0 }
 0x249   : > { %4810 = vmatmul.msk.bf16.gmra.mxu2 %vm389_vm0, %v754_v25  ;;  %4826 = vmatmul.msk.bf16.gmra.mxu3 %vm389_vm0, %v754_v25 }
 0x250   : > { %v755_v60 = vpop.trf.xlu0 }
 0x259   : > { %4811 = vmatmul.msk.bf16.gmra.mxu2 %vm389_vm0, %v741_v11  ;;  %4827 = vmatmul.msk.bf16.gmra.mxu3 %vm389_vm0, %v741_v11 }
 0x269   : > { %4812 = vmatmul.msk.bf16.gmra.mxu2 %vm389_vm0, %v743_v13  ;;  %4828 = vmatmul.msk.bf16.gmra.mxu3 %vm389_vm0, %v743_v13  ;;  %v6042_v13 = vpop.f32.mrf.mxu0 }
 0x26a   : > { %9316 = vst [vmem:[#allocation45_spill] sm:$0xff] %v6042_v13 }
 0x279   : > { %4813 = vmatmul.msk.bf16.gmra.mxu2 %vm389_vm0, %v745_v19  ;;  %4829 = vmatmul.msk.bf16.gmra.mxu3 %vm389_vm0, %v745_v19 }
 0x289   : > { %4814 = vmatmul.msk.bf16.gmra.mxu2 %vm389_vm0, %v747_v21  ;;  %4830 = vmatmul.msk.bf16.gmra.mxu3 %vm389_vm0, %v747_v21  ;;  %v6050_v21 = vpop.f32.mrf.mxu0 }
 0x28a   : > { %9319 = vst [vmem:[#allocation48_spill] sm:$0xff] %v6050_v21 }
 0x28c   : > { %v6004_v33 = vpop.f32.mrf.mxu2  ;;  %v6006_v40 = vpop.f32.mrf.mxu3 }
 0x294   : > { %v6012_v0 = vpop.f32.mrf.mxu2  ;;  %v6014_v1 = vpop.f32.mrf.mxu3 }
 0x295   : > { %9308 = vst [vmem:[#allocation37_spill] sm:$0xff] %v6012_v0 }
 0x296   : > { %9309 = vst [vmem:[#allocation38_spill] sm:$0xff] %v6014_v1 }
 0x299   : > { %4815 = vmatmul.msk.bf16.gmra.mxu2 %vm389_vm0, %v749_v31  ;;  %4831 = vmatmul.msk.bf16.gmra.mxu3 %vm389_vm0, %v749_v31  ;;  %v6060_v31 = vpop.f32.mrf.mxu0 }
 0x29a   : > { %9321 = vst [vmem:[#allocation50_spill] sm:$0xff] %v6060_v31 }
 0x29c   : > { %v6022_v4 = vpop.f32.mrf.mxu2  ;;  %v6024_v5 = vpop.f32.mrf.mxu3 }
 0x2a1   : > { %v6074_v18 = vpop.f32.mrf.mxu0 }
 0x2a2   : > { %9324 = vst [vmem:[#allocation53_spill] sm:$0xff] %v6074_v18 }
 0x2a4   : > { %v6026_v6 = vpop.f32.mrf.mxu2  ;;  %v6028_v7 = vpop.f32.mrf.mxu3 }
 0x2a5   : > { %9312 = vst [vmem:[#allocation41_spill] sm:$0xff] %v6026_v6 }
 0x2a9   : > { %4816 = vmatmul.msk.bf16.gmra.mxu2 %vm389_vm0, %v751_v15  ;;  %4832 = vmatmul.msk.bf16.gmra.mxu3 %vm389_vm0, %v751_v15  ;;  %v6082_v54 = vpop.f32.mrf.mxu0 }
 0x2aa   : > { %9327 = vst [vmem:[#allocation56_spill] sm:$0xff] %v6082_v54 }
 0x2ac   : > { %v6036_v10 = vpop.f32.mrf.mxu2  ;;  %v6038_v11 = vpop.f32.mrf.mxu3 }
 0x2b1   : > { %v6090_v56 = vpop.f32.mrf.mxu0 }
 0x2b2   : > { %9330 = vst [vmem:[#allocation59_spill] sm:$0xff] %v6090_v56 }
 0x2b4   : > { %v6044_v14 = vpop.f32.mrf.mxu2  ;;  %v6046_v19 = vpop.f32.mrf.mxu3 }
 0x2b5   : > { %9317 = vst [vmem:[#allocation46_spill] sm:$0xff] %v6044_v14 }
 0x2b9   : > { %4817 = vmatmul.msk.bf16.gmra.mxu2 %vm389_vm0, %v753_v24  ;;  %4833 = vmatmul.msk.bf16.gmra.mxu3 %vm389_vm0, %v753_v24  ;;  %v6098_v17 = vpop.f32.mrf.mxu0 }
 0x2ba   : > { %9334 = vst [vmem:[#allocation63_spill] sm:$0xff] %v6098_v17 }
 0x2bc   : > { %v6054_v22 = vpop.f32.mrf.mxu2  ;;  %v6056_v23 = vpop.f32.mrf.mxu3 }
 0x2c4   : > { %v6062_v50 = vpop.f32.mrf.mxu2  ;;  %v6064_v55 = vpop.f32.mrf.mxu3 }
 0x2c5   : > { %9322 = vst [vmem:[#allocation51_spill] sm:$0xff] %v6064_v55 }
 0x2c9   : > { %4818 = vmatmul.msk.bf16.gmra.mxu2 %vm389_vm0, %v755_v60  ;;  %4834 = vmatmul.msk.bf16.gmra.mxu3 %vm389_vm0, %v755_v60  ;;  %v6088_v60 = vpop.f32.mrf.mxu1 }
 0x2ca   : > { %9329 = vst [vmem:[#allocation58_spill] sm:$0xff] %v6088_v60  ;;  %v6110_v60 = vpop.f32.mrf.mxu0 }
 0x2cb   : > { %9340 = vst [vmem:[#allocation69_spill] sm:$0xff] %v6110_v60 }
 0x2cc   : > { %v6068_v15 = vpop.f32.mrf.mxu2  ;;  %v6070_v16 = vpop.f32.mrf.mxu3 }
 0x2d1   : > { %v6096_v58 = vpop.f32.mrf.mxu1 }
 0x2d2   : > { %9333 = vst [vmem:[#allocation62_spill] sm:$0xff] %v6096_v58  ;;  %v6118_v58 = vpop.f32.mrf.mxu0 }
 0x2d3   : > { %9343 = vst [vmem:[#allocation72_spill] sm:$0xff] %v6118_v58 }
 0x2d4   : > { %v6076_v24 = vpop.f32.mrf.mxu2  ;;  %v6078_v25 = vpop.f32.mrf.mxu3 }
 0x2d5   : > { %9325 = vst [vmem:[#allocation54_spill] sm:$0xff] %v6078_v25 }
 0x2d9   : > { %v6108_v47 = vpop.f32.mrf.mxu1 }
 0x2da   : > { %9339 = vst [vmem:[#allocation68_spill] sm:$0xff] %v6108_v47  ;;  %v6126_v20 = vpop.f32.mrf.mxu0 }
 0x2db   : > { %9347 = vst [vmem:[#allocation76_spill] sm:$0xff] %v6126_v20 }
 0x2dc   : > { %v6084_v62 = vpop.f32.mrf.mxu2  ;;  %v6086_v59 = vpop.f32.mrf.mxu3 }
 0x2dd   : > { %9328 = vst [vmem:[#allocation57_spill] sm:$0xff] %v6086_v59 }
 0x2e1   : > { %v6116_v52 = vpop.f32.mrf.mxu1 }
 0x2e2   : > { %9342 = vst [vmem:[#allocation71_spill] sm:$0xff] %v6116_v52  ;;  %v6134_v43 = vpop.f32.mrf.mxu0 }
 0x2e4   : > { %v6092_v53 = vpop.f32.mrf.mxu2  ;;  %v6094_v61 = vpop.f32.mrf.mxu3 }
 0x2e5   : > { %9331 = vst [vmem:[#allocation60_spill] sm:$0xff] %v6092_v53 }
 0x2e6   : > { %9332 = vst [vmem:[#allocation61_spill] sm:$0xff] %v6094_v61 }
 0x2e9   : > { %v6124_v26 = vpop.f32.mrf.mxu1 }
 0x2ea   : > { %9346 = vst [vmem:[#allocation75_spill] sm:$0xff] %v6124_v26  ;;  %v6144_v12 = vpop.f32.mrf.mxu0 }
 0x2eb   : > { %9351 = vst [vmem:[#allocation80_spill] sm:$0xff] %v6144_v12 }
 0x2ec   : > { %v6100_v18 = vpop.f32.mrf.mxu2  ;;  %v6102_v57 = vpop.f32.mrf.mxu3 }
 0x2ed   : > { %9335 = vst [vmem:[#allocation64_spill] sm:$0xff] %v6100_v18 }
 0x2ee   : > { %9336 = vst [vmem:[#allocation65_spill] sm:$0xff] %v6102_v57 }
 0x2f1   : > { %v6132_v60 = vpop.f32.mrf.mxu1 }
 0x2f2   : > { %9349 = vst [vmem:[#allocation78_spill] sm:$0xff] %v6132_v60  ;;  %v6152_v21 = vpop.f32.mrf.mxu0 }
 0x2f3   : > { %v982_v38 = vmax.f32 %v6134_v43, %v6152_v21 }
 0x2f4   : > { %v6104_v54 = vpop.f32.mrf.mxu2  ;;  %v6106_v31 = vpop.f32.mrf.mxu3 }
 0x2f5   : > { %9337 = vst [vmem:[#allocation66_spill] sm:$0xff] %v6104_v54 }
 0x2f6   : > { %9338 = vst [vmem:[#allocation67_spill] sm:$0xff] %v6106_v31 }
 0x2f9   : > { %v6142_v48 = vpop.f32.mrf.mxu1 }
 0x2fa   : > { %v6160_v3 = vpop.f32.mrf.mxu0 }
 0x2fb   : > { %9355 = vst [vmem:[#allocation84_spill] sm:$0xff] %v6160_v3  ;;  %v983_v41 = vmax.f32 %v6144_v12, %v6160_v3 }
 0x2fc   : > { %v6112_v56 = vpop.f32.mrf.mxu2  ;;  %v6114_v44 = vpop.f32.mrf.mxu3 }
 0x2fd   : > { %9341 = vst [vmem:[#allocation70_spill] sm:$0xff] %v6112_v56 }
 0x301   : > { %v6150_v8 = vpop.f32.mrf.mxu1 }
 0x302   : > { %9352 = vst [vmem:[#allocation81_spill] sm:$0xff] %v6150_v8  ;;  %v6168_v39 = vpop.f32.mrf.mxu0 }
 0x303   : > { %v984_v28 = vmax.f32 %v982_v38, %v6168_v39 }
 0x304   : > { %v6120_v17 = vpop.f32.mrf.mxu2  ;;  %v6122_v49 = vpop.f32.mrf.mxu3 }
 0x305   : > { %9344 = vst [vmem:[#allocation73_spill] sm:$0xff] %v6120_v17  ;;  %v986_v27 = vmax.f32 %v984_v28, %v6004_v33 }
 0x306   : > { %9345 = vst [vmem:[#allocation74_spill] sm:$0xff] %v6122_v49 }
 0x309   : > { %v6158_v9 = vpop.f32.mrf.mxu1 }
 0x30a   : > { %9354 = vst [vmem:[#allocation83_spill] sm:$0xff] %v6158_v9  ;;  %v6176_v34 = vpop.f32.mrf.mxu0 }
 0x30b   : > { %v985_v30 = vmax.f32 %v983_v41, %v6176_v34 }
 0x30c   : > { %v6128_v46 = vpop.f32.mrf.mxu2  ;;  %v6130_v47 = vpop.f32.mrf.mxu3 }
 0x30d   : > { %9348 = vst [vmem:[#allocation77_spill] sm:$0xff] %v6128_v46  ;;  %v987_v63 = vmax.f32 %v985_v30, %v6012_v0  ;;  %v1019_v0 = vmax.f32 %v6142_v48, %v6158_v9 }
 0x311   : > { %v6166_v42 = vpop.f32.mrf.mxu1 }
 0x312   : > { %9357 = vst [vmem:[#allocation86_spill] sm:$0xff] %v6166_v42  ;;  %v1020_v41 = vmax.f32 %v6150_v8, %v6166_v42 }
 0x314   : > { %v6136_v51 = vpop.f32.mrf.mxu2  ;;  %v6138_v52 = vpop.f32.mrf.mxu3 }
 0x315   : > { %9350 = vst [vmem:[#allocation79_spill] sm:$0xff] %v6138_v52 }
 0x319   : > { %v6174_v36 = vpop.f32.mrf.mxu1 }
 0x31c   : > { %v6140_v58 = vpop.f32.mrf.mxu2  ;;  %v6146_v26 = vpop.f32.mrf.mxu3 }
 0x321   : > { %v6193_v12 = vpop.f32.mrf.mxu1 }
 0x322   : > { %v1022_v28 = vmax.f32 %v1020_v41, %v6193_v12 }
 0x324   : > { %v6148_v20 = vpop.f32.mrf.mxu2  ;;  %v6154_v60 = vpop.f32.mrf.mxu3 }
 0x325   : > { %9353 = vst [vmem:[#allocation82_spill] sm:$0xff] %v6154_v60 }
 0x32c   : > { %v6156_v13 = vpop.f32.mrf.mxu2  ;;  %v6162_v37 = vpop.f32.mrf.mxu3 }
 0x32d   : > { %9356 = vst [vmem:[#allocation85_spill] sm:$0xff] %v6162_v37  ;;  %v989_v37 = vmax.f32 %v987_v63, %v6026_v6 }
 0x32f   : > { %v991_v3 = vmax.f32 %v989_v37, %v6044_v14  ;;  %v1021_v37 = vmax.f32 %v1019_v0, %v6174_v36  ;;  %v1024_v14 = vmax.f32 %v1022_v28, %v6014_v1 }
 0x331   : > { %v993_v30 = vmax.f32 %v991_v3, %v6062_v50  ;;  %v1023_v8 = vmax.f32 %v1021_v37, %v6006_v40  ;;  %v1026_v9 = vmax.f32 %v1024_v14, %v6028_v7 }
 0x333   : > { %v1028_v0 = vmax.f32 %v1026_v9, %v6046_v19 }
 0x334   : > { %v6164_v35 = vpop.f32.mrf.mxu2  ;;  %v6170_v2 = vpop.f32.mrf.mxu3 }
 0x335   : > { %9358 = vst [vmem:[#allocation87_spill] sm:$0xff] %v6170_v2  ;;  %v988_v2 = vmax.f32 %v986_v27, %v6022_v4  ;;  %v995_v27 = vmax.f32 %v993_v30, %v6076_v24  ;;  %v1025_v30 = vmax.f32 %v1023_v8, %v6024_v5  ;;  %v1030_v1 = vmax.f32 %v1028_v0, %v6064_v55 }
 0x337   : > { %v990_v38 = vmax.f32 %v988_v2, %v6036_v10  ;;  %v997_v42 = vmax.f32 %v995_v27, %v6092_v53  ;;  %v1027_v27 = vmax.f32 %v1025_v30, %v6038_v11 }
 0x339   : > { %v992_v63 = vmax.f32 %v990_v38, %v6054_v22  ;;  %v999_v38 = vmax.f32 %v997_v42, %v6104_v54  ;;  %v1032_v42 = vmax.f32 %v1030_v1, %v6078_v25 }
 0x33b   : > { %v994_v6 = vmax.f32 %v992_v63, %v6068_v15  ;;  %v1001_v63 = vmax.f32 %v999_v38, %v6120_v17  ;;  %v1034_v38 = vmax.f32 %v1032_v42, %v6094_v61 }
 0x33c   : > { %v6172_v45 = vpop.f32.mrf.mxu2  ;;  %v6185_v32 = vpop.f32.mrf.mxu3 }
 0x33d   : > { %v996_v41 = vmax.f32 %v994_v6, %v6084_v62  ;;  %v1003_v14 = vmax.f32 %v1001_v63, %v6136_v51  ;;  %v1029_v6 = vmax.f32 %v1027_v27, %v6056_v23  ;;  %v1036_v27 = vmax.f32 %v1034_v38, %v6106_v31 }
 0x33f   : > { %v998_v28 = vmax.f32 %v996_v41, %v6100_v18  ;;  %v1005_v9 = vmax.f32 %v1003_v14, %v6148_v20  ;;  %v1031_v41 = vmax.f32 %v1029_v6, %v6070_v16  ;;  %v1038_v6 = vmax.f32 %v1036_v27, %v6122_v49 }
 0x341   : > { %v1000_v37 = vmax.f32 %v998_v28, %v6112_v56  ;;  %v1007_v0 = vmax.f32 %v1005_v9, %v6164_v35  ;;  %v1033_v63 = vmax.f32 %v1031_v41, %v6086_v59  ;;  %v1040_v61 = vmax.f32 %v1038_v6, %v6138_v52 }
 0x343   : > { %v1002_v8 = vmax.f32 %v1000_v37, %v6128_v46  ;;  %v1035_v14 = vmax.f32 %v1033_v63, %v6102_v57  ;;  %v1042_v38 = vmax.f32 %v1040_v61, %v6154_v60  ;;  %v9361_v57 = vld [vmem:[#allocation85_spill] sm:$0xff] }
 0x344   : > { %v6187_v29 = vpop.f32.mrf.mxu2  ;;  %v6208_v2 = vpop.f32.mrf.mxu3 }
 0x345   : > { %9359 = vst [vmem:[#allocation88_spill] sm:$0xff] %v6208_v2  ;;  %v1004_v30 = vmax.f32 %v1002_v8, %v6140_v58  ;;  %v1009_v37 = vmax.f32 %v1007_v0, %v6187_v29  ;;  %v1037_v9 = vmax.f32 %v1035_v14, %v6114_v44  ;;  %v9360_v0 = vld [vmem:[#allocation87_spill] sm:$0xff] }
 0x346   : > { %v1044_v59 = vmax.f32 %v1042_v38, %v9360_v0 }
 0x347   : > { %v1006_v1 = vmax.f32 %v1004_v30, %v6156_v13  ;;  %v1039_v41 = vmax.f32 %v1037_v9, %v6130_v47 }
 0x349   : > { %v1008_v42 = vmax.f32 %v1006_v1, %v6172_v45  ;;  %v1041_v30 = vmax.f32 %v1039_v41, %v6146_v26  ;;  %v1046_v1 = vmax.f32 %v1044_v59, %v6208_v2 }
 0x34b   : > { %v1043_v27 = vmax.f32 %v1041_v30, %v9361_v57 }
 0x34c   : > { %v888_v3 = vpop.f32.mrf.mxu2  ;;  %v6230_v55 = vpop.f32.mrf.mxu3 }
 0x34d   : > { %v1010_v25 = vmax.f32 %v1008_v42, %v888_v3  ;;  %v1045_v14 = vmax.f32 %v1043_v27, %v6185_v32 }
 0x34f   : > { %v1047_v6 = vmax.f32 %v1045_v14, %v6230_v55  ;;  %v9362_v14 = vld [vmem:[#allocation30_spill] sm:$0xff] }
 0x354   : > { %v890_v28 = vpop.f32.mrf.mxu2  ;;  %v979_v63 = vpop.f32.mrf.mxu3 }
 0x355   : > { %v1011_v8 = vmax.f32 %v1009_v37, %v890_v28  ;;  %v1048_v49 = vmax.f32 %v1046_v1, %v979_v63 }
 0x357   : > { %v1012_v31 = vmax.f32 %v1010_v25, %v1011_v8  ;;  %v1049_v9 = vmax.f32 %v1047_v6, %v1048_v49 }
 0x359   : > { %v1013_v37 = vrot.slane %v1012_v31, 4  ;;  %v1050_v61 = vrot.slane %v1049_v9, 4 }
 0x35b   : > { %v1014_v42 = vmax.f32 %v1012_v31, %v1013_v37  ;;  %v1051_v8 = vmax.f32 %v1049_v9, %v1050_v61  ;;  %v9363_v31 = vld [vmem:[#allocation32_spill] sm:$0xff]  ;;  %v9365_v37 = vld [vmem:[#allocation34_spill] sm:$0xff] }
 0x35c   : > { %v6257_v49 = vpack.c.bf16 %v9363_v31, %v9362_v14  ;;  %v9373_v14 = vld [vmem:[#allocation81_spill] sm:$0xff] }
 0x35d   : > { %v1015_v52 = vrot.slane %v1014_v42, 2  ;;  %v1052_v60 = vrot.slane %v1051_v8, 2 }
 0x35e   : > { %9364 = vst [vmem:[#allocation85_spill] sm:$0xff] %v6257_v49 }
 0x35f   : > { %v1016_v25 = vmax.f32 %v1014_v42, %v1015_v52  ;;  %v1053_v0 = vmax.f32 %v1051_v8, %v1052_v60  ;;  %v9366_v52 = vld [vmem:[#allocation36_spill] sm:$0xff] }
 0x360   : > { %v6261_v6 = vpack.c.bf16 %v9366_v52, %v9365_v37  ;;  %v9371_v37 = vld [vmem:[#allocation41_spill] sm:$0xff] }
 0x361   : > { %v1017_v41 = vrot.slane %v1016_v25, 1  ;;  %v1054_v2 = vrot.slane %v1053_v0, 1 }
 0x362   : > { %9367 = vst [vmem:[#allocation30_spill] sm:$0xff] %v6261_v6 }
 0x363   : > { %v6249_v38 = vmax.f32 %v1016_v25, %v1017_v41  ;;  %v6253_v1 = vmax.f32 %v1053_v0, %v1054_v2  ;;  %v9369_v0 = vld [vmem:[#allocation84_spill] sm:$0xff] }
 0x365   : > { %v1116_v30 = vsub.f32 %v888_v3, %v6249_v38  ;;  %v1118_v59 = vsub.f32 %v890_v28, %v6249_v38  ;;  %v9368_v3 = vld [vmem:[#allocation80_spill] sm:$0xff]  ;;  %v1117_v41 = vsub.f32 %v6230_v55, %v6253_v1  ;;  %v9372_v55 = vld [vmem:[#allocation46_spill] sm:$0xff]  ;;  %v1102_v8 = vsub.f32 %v6136_v51, %v6249_v38 }
 0x366   : > { %v1104_v61 = vsub.f32 %v6140_v58, %v6249_v38  ;;  %v1110_v31 = vsub.f32 %v6164_v35, %v6249_v38  ;;  %v1112_v52 = vsub.f32 %v6172_v45, %v6249_v38  ;;  %v1057_v58 = vsub.f32 %v6142_v48, %v6253_v1  ;;  %v9376_v48 = vld [vmem:[#allocation38_spill] sm:$0xff] }
 0x367   : > { %v1150_v27 = vpack.c.bf16 %v1118_v59, %v1116_v30  ;;  %v1119_v30 = vsub.f32 %v979_v63, %v6253_v1  ;;  %v1065_v45 = vsub.f32 %v6174_v36, %v6253_v1  ;;  %v1069_v2 = vsub.f32 %v6006_v40, %v6253_v1 }
 0x368   : > { %v1071_v28 = vsub.f32 %v9376_v48, %v6253_v1  ;;  %v1079_v36 = vsub.f32 %v6046_v19, %v6253_v1  ;;  %v9378_v48 = vld [vmem:[#allocation51_spill] sm:$0xff]  ;;  %v9381_v19 = vld [vmem:[#allocation57_spill] sm:$0xff] }
 0x369   : > { %v1212_v42 = vunpack.c.l.bf16 %v1150_v27  ;;  %v1214_v9 = vunpack.c.h.bf16 %v1150_v27  ;;  %v9370_v27 = vld [vmem:[#allocation37_spill] sm:$0xff]  ;;  %v1151_v63 = vpack.c.bf16 %v1119_v30, %v1117_v41  ;;  %v1106_v41 = vsub.f32 %v6148_v20, %v6249_v38 }
 0x36a   : > { %v1108_v30 = vsub.f32 %v6156_v13, %v6249_v38  ;;  %v1059_v20 = vsub.f32 %v9373_v14, %v6253_v1  ;;  %v1073_v14 = vsub.f32 %v6024_v5, %v6253_v1  ;;  %v1083_v60 = vsub.f32 %v9378_v48, %v6253_v1  ;;  %v9384_v48 = vld [vmem:[#allocation67_spill] sm:$0xff] }
 0x36b   : > { %v1336_v25 = vmul.f32 1.442695, %v1212_v42  ;;  %v1340_v59 = vmul.f32 1.442695, %v1214_v9  ;;  %v1213_v51 = vunpack.c.l.bf16 %v1151_v63  ;;  %v9374_v9 = vld [vmem:[#allocation83_spill] sm:$0xff]  ;;  %v9375_v42 = vld [vmem:[#allocation86_spill] sm:$0xff]  ;;  %v1085_v5 = vsub.f32 %v6070_v16, %v6253_v1 }
 0x36c   : > { %v1061_v13 = vsub.f32 %v9374_v9, %v6253_v1  ;;  %v1063_v35 = vsub.f32 %v9375_v42, %v6253_v1  ;;  %v1077_v42 = vsub.f32 %v6038_v11, %v6253_v1  ;;  %v1089_v46 = vsub.f32 %v9381_v19, %v6253_v1 }
 0x36d   : > { %5105 = vpow2.f32 %v1336_v25  ;;  %v1114_v25 = vsub.f32 %v6187_v29, %v6249_v38  ;;  %v1067_v29 = vsub.f32 %v6193_v12, %v6253_v1  ;;  %v1081_v12 = vsub.f32 %v6056_v23, %v6253_v1  ;;  %v9382_v23 = vld [vmem:[#allocation61_spill] sm:$0xff] }
 0x36e   : > { %5107 = vpow2.f32 %v1340_v59  ;;  %v1215_v59 = vunpack.c.h.bf16 %v1151_v63  ;;  %v1075_v63 = vsub.f32 %v6028_v7, %v6253_v1  ;;  %v1338_v40 = vmul.f32 1.442695, %v1213_v51  ;;  %v9379_v7 = vld [vmem:[#allocation54_spill] sm:$0xff]  ;;  %v9383_v51 = vld [vmem:[#allocation65_spill] sm:$0xff] }
 0x36f   : > { %v1087_v6 = vsub.f32 %v9379_v7, %v6253_v1  ;;  %v1091_v17 = vsub.f32 %v9382_v23, %v6253_v1  ;;  %v1095_v56 = vsub.f32 %v9384_v48, %v6253_v1  ;;  %v1097_v16 = vsub.f32 %v6114_v44, %v6253_v1  ;;  %v9385_v7 = vld [vmem:[#allocation74_spill] sm:$0xff] }
 0x370   : > { %v1342_v11 = vmul.f32 1.442695, %v1215_v59  ;;  %v1099_v54 = vsub.f32 %v9385_v7, %v6253_v1  ;;  %v9386_v59 = vsub.f32 %v6134_v43, %v6249_v38  ;;  %v9387_v19 = vsub.f32 %v9368_v3, %v6249_v38  ;;  %v9389_v7 = vld [vmem:[#allocation82_spill] sm:$0xff]  ;;  %v9390_v3 = vld [vmem:[#allocation87_spill] sm:$0xff] }
 0x371   : > { %v1101_v23 = vsub.f32 %v6130_v47, %v6253_v1  ;;  %v1105_v48 = vsub.f32 %v6146_v26, %v6253_v1  ;;  %v1121_v44 = vpack.c.bf16 %v1059_v20, %v1057_v58  ;;  %5109 = vpow2.f32 %v1338_v40 }
 0x372   : > { %v1107_v53 = vsub.f32 %v9389_v7, %v6253_v1  ;;  %5111 = vpow2.f32 %v1342_v11  ;;  %v9392_v26 = vsub.f32 %v6152_v21, %v6249_v38  ;;  %v9393_v58 = vsub.f32 %v9369_v0, %v6249_v38 }
 0x373   : > { %v6352_v9 = vpop.eup %5105  ;;  %v9394_v40 = vsub.f32 %v6168_v39, %v6249_v38  ;;  %v9395_v7 = vsub.f32 %v6176_v34, %v6249_v38  ;;  %v9396_v47 = vsub.f32 %v6004_v33, %v6249_v38  ;;  %v9398_v21 = vsub.f32 %v6022_v4, %v6249_v38 }
 0x374   : > { %9377 = vst [vmem:[#allocation32_spill] sm:$0xff] %v6352_v9  ;;  %v6360_v49 = vpop.eup %5107  ;;  %v1093_v9 = vsub.f32 %v9383_v51, %v6253_v1  ;;  %v9388_v51 = vld [vmem:[#allocation79_spill] sm:$0xff]  ;;  %v1122_v20 = vpack.c.bf16 %v9393_v58, %v9392_v26  ;;  %v9399_v0 = vsub.f32 %v9371_v37, %v6249_v38  ;;  %v9400_v34 = vsub.f32 %v6036_v10, %v6249_v38 }
 0x375   : > { %9380 = vst [vmem:[#allocation34_spill] sm:$0xff] %v6360_v49  ;;  %v1120_v49 = vpack.c.bf16 %v9387_v19, %v9386_v59  ;;  %v1103_v18 = vsub.f32 %v9388_v51, %v6253_v1  ;;  %v9391_v19 = vld [vmem:[#allocation88_spill] sm:$0xff]  ;;  %v6408_v11 = vpack.c.bf16 %v9395_v7, %v9394_v40  ;;  %v9397_v51 = vsub.f32 %v9370_v27, %v6249_v38 }
 0x376   : > { %v6424_v39 = vpack.c.bf16 %v9399_v0, %v9398_v21  ;;  %v9401_v33 = vsub.f32 %v9372_v55, %v6249_v38  ;;  %v9402_v27 = vsub.f32 %v6054_v22, %v6249_v38  ;;  %v9403_v4 = vsub.f32 %v6062_v50, %v6249_v38  ;;  %v9407_v21 = vld [vmem:[#allocation60_spill] sm:$0xff] }
 0x377   : > { %v6416_v59 = vpack.c.bf16 %v9397_v51, %v9396_v47  ;;  %v1152_v26 = vunpack.c.l.bf16 %v1120_v49  ;;  %v6440_v51 = vpack.c.bf16 %v1063_v35, %v1061_v13  ;;  %v1153_v37 = vunpack.c.l.bf16 %v1121_v44  ;;  %v9409_v50 = vld [vmem:[#allocation64_spill] sm:$0xff]  ;;  %v9411_v35 = vld [vmem:[#allocation66_spill] sm:$0xff] }
 0x378   : > { %v6432_v58 = vpack.c.bf16 %v9401_v33, %v9400_v34  ;;  %v1132_v47 = vpack.c.bf16 %v9403_v4, %v9402_v27  ;;  %v9404_v40 = vsub.f32 %v6068_v15, %v6249_v38  ;;  %v9405_v10 = vsub.f32 %v6076_v24, %v6249_v38  ;;  %v9413_v27 = vld [vmem:[#allocation70_spill] sm:$0xff]  ;;  %v9415_v4 = vld [vmem:[#allocation73_spill] sm:$0xff] }
 0x379   : > { %v9406_v55 = vsub.f32 %v6084_v62, %v6249_v38  ;;  %v9408_v22 = vsub.f32 %v9407_v21, %v6249_v38  ;;  %v9410_v13 = vsub.f32 %v9409_v50, %v6249_v38  ;;  %v9412_v34 = vsub.f32 %v9411_v35, %v6249_v38  ;;  %v6479_v35 = vpop.eup %5109 }
 0x37a   : > { %v1134_v7 = vpack.c.bf16 %v9405_v10, %v9404_v40  ;;  %v1154_v15 = vunpack.c.h.bf16 %v1120_v49  ;;  %v9414_v24 = vsub.f32 %v9413_v27, %v6249_v38  ;;  %v9416_v62 = vsub.f32 %v9415_v4, %v6249_v38  ;;  %v9417_v10 = vld [vmem:[#allocation77_spill] sm:$0xff]  ;;  %v6485_v43 = vpop.eup %5111 }
 0x37b   : > { %v6454_v0 = vpack.c.bf16 %v9408_v22, %v9406_v55  ;;  %v6462_v33 = vpack.c.bf16 %v9412_v34, %v9410_v13  ;;  %v9418_v55 = vsub.f32 %v9417_v10, %v6249_v38  ;;  %v6477_v22 = vpack.c.bf16 %v1106_v41, %v1104_v61 }
 0x37c   : > { %v6470_v40 = vpack.c.bf16 %v9416_v62, %v9414_v24  ;;  %v1155_v50 = vunpack.c.h.bf16 %v1121_v44  ;;  %v6481_v13 = vpack.c.bf16 %v1110_v31, %v1108_v30  ;;  %v6483_v49 = vpack.c.bf16 %v1114_v25, %v1112_v52 }
 0x37d   : > { %v6475_v21 = vpack.c.bf16 %v1102_v8, %v9418_v55  ;;  %v1156_v34 = vunpack.c.l.bf16 %v1122_v20  ;;  %v1216_v27 = vmul.f32 1.442695, %v1152_v26  ;;  %v6487_v24 = vpack.c.bf16 %v1067_v29, %v1065_v45 }
 0x37e   : > { %v6489_v4 = vpack.c.bf16 %v1071_v28, %v1069_v2  ;;  %v1157_v38 = vunpack.c.l.bf16 %v6440_v51  ;;  %v1218_v8 = vmul.f32 1.442695, %v1153_v37  ;;  %v6492_v61 = vpack.c.bf16 %v1075_v63, %v1073_v14 }
 0x37f   : > { %v6494_v41 = vpack.c.bf16 %v1079_v36, %v1077_v42  ;;  %v1180_v44 = vunpack.c.l.bf16 %v1134_v7  ;;  %v1220_v31 = vmul.f32 1.442695, %v1154_v15  ;;  %v6496_v30 = vpack.c.bf16 %v1083_v60, %v1081_v12 }
 0x380   : > { %v6498_v52 = vpack.c.bf16 %v1087_v6, %v1085_v5  ;;  %v1158_v25 = vunpack.c.h.bf16 %v1122_v20  ;;  %v1222_v26 = vmul.f32 1.442695, %v1155_v50  ;;  %v6500_v62 = vpack.c.bf16 %v1091_v17, %v1089_v46  ;;  %v9419_v5 = vld [vmem:[#allocation32_spill] sm:$0xff] }
 0x381   : > { %v1182_v45 = vunpack.c.h.bf16 %v1134_v7  ;;  %5113 = vpow2.f32 %v1216_v27  ;;  %v1224_v28 = vmul.f32 1.442695, %v1156_v34  ;;  %v6502_v2 = vpack.c.bf16 %v1095_v56, %v1093_v9 }
 0x382   : > { %v1176_v29 = vunpack.c.l.bf16 %v1132_v47  ;;  %5115 = vpow2.f32 %v1218_v8  ;;  %v1226_v14 = vmul.f32 1.442695, %v1157_v38  ;;  %v6504_v63 = vpack.c.bf16 %v1099_v54, %v1097_v16  ;;  %v9420_v16 = vld [vmem:[#allocation34_spill] sm:$0xff] }
 0x383   : > { %v1178_v42 = vunpack.c.h.bf16 %v1132_v47  ;;  %5117 = vpow2.f32 %v1220_v31  ;;  %v1272_v60 = vmul.f32 1.442695, %v1180_v44  ;;  %v6506_v36 = vpack.c.bf16 %v1103_v18, %v1101_v23 }
 0x384   : > { %v1160_v6 = vunpack.c.l.bf16 %v6408_v11  ;;  %5119 = vpow2.f32 %v1222_v26  ;;  %v1228_v46 = vmul.f32 1.442695, %v1158_v25  ;;  %v6509_v17 = vpack.c.bf16 %v1107_v53, %v1105_v48 }
 0x385   : > { %v1162_v12 = vunpack.c.h.bf16 %v6408_v11  ;;  %5121 = vpow2.f32 %v1224_v28  ;;  %v1276_v56 = vmul.f32 1.442695, %v1182_v45  ;;  %v1172_v9 = vunpack.c.l.bf16 %v6432_v58 }
 0x386   : > { %5123 = vpow2.f32 %v1226_v14  ;;  %v1264_v54 = vmul.f32 1.442695, %v1176_v29  ;;  %v6515_v20 = vpack.c.bf16 %v9420_v16, %v9419_v5  ;;  %v9421_v23 = vsub.f32 %v9361_v57, %v6253_v1 }
 0x387   : > { %v6517_v18 = vpop.eup %5113  ;;  %v9422_v53 = vsub.f32 %v9390_v3, %v6253_v1  ;;  %v1174_v11 = vunpack.c.h.bf16 %v6432_v58  ;;  %v1268_v47 = vmul.f32 1.442695, %v1178_v42  ;;  %5125 = vpow2.f32 %v1272_v60 }
 0x388   : > { %v6528_v37 = vpop.eup %5115  ;;  %v9423_v7 = vsub.f32 %v6185_v32, %v6253_v1  ;;  %v9424_v15 = vsub.f32 %v9391_v19, %v6253_v1  ;;  %v1164_v57 = vunpack.c.l.bf16 %v6416_v59  ;;  %5127 = vpow2.f32 %v1228_v46  ;;  %1533 = vmatpush.bf16.msrb.mxu3 %v6515_v20 }
 0x389   : > { %v6525_v48 = vpack.c.bf16 %v9422_v53, %v9421_v23  ;;  %v1232_v3 = vmul.f32 1.442695, %v1160_v6  ;;  %v5118_v55 = vpop.eup %5117  ;;  %v1159_v58 = vunpack.c.h.bf16 %v6440_v51  ;;  %v1166_v50 = vunpack.c.h.bf16 %v6416_v59 }
 0x38a   : > { %v6536_v10 = vpack.c.bf16 %v9424_v15, %v9423_v7  ;;  %v1236_v34 = vmul.f32 1.442695, %v1162_v12  ;;  %5129 = vpow2.f32 %v1276_v56  ;;  %v6542_v27 = vpop.eup %5119  ;;  %v1161_v32 = vunpack.c.l.bf16 %v6487_v24 }
 0x38b   : > { %v1168_v1 = vunpack.c.l.bf16 %v6424_v39  ;;  %v1256_v19 = vmul.f32 1.442695, %v1172_v9  ;;  %5131 = vpow2.f32 %v1264_v54  ;;  %v5122_v38 = vpop.eup %5121  ;;  %v1163_v8 = vunpack.c.h.bf16 %v6487_v24 }
 0x38c   : > { %v1170_v44 = vunpack.c.h.bf16 %v6424_v39  ;;  %v1260_v31 = vmul.f32 1.442695, %v1174_v11  ;;  %5133 = vpow2.f32 %v1268_v47  ;;  %v6548_v51 = vpop.eup %5123  ;;  %v1165_v59 = vunpack.c.l.bf16 %v6489_v4 }
 0x38d   : > { %v1167_v25 = vunpack.c.h.bf16 %v6489_v4  ;;  %5135 = vpow2.f32 %v1232_v3  ;;  %v1240_v26 = vmul.f32 1.442695, %v1164_v57  ;;  %v5126_v45 = vpop.eup %5125  ;;  %v1169_v28 = vunpack.c.l.bf16 %v6492_v61 }
 0x38e   : > { %v1171_v29 = vunpack.c.h.bf16 %v6492_v61  ;;  %5137 = vpow2.f32 %v1236_v34  ;;  %v1244_v14 = vmul.f32 1.442695, %v1166_v50  ;;  %v5128_v24 = vpop.eup %5127  ;;  %v1173_v39 = vunpack.c.l.bf16 %v6494_v41 }
 0x38f   : > { %v1175_v42 = vunpack.c.h.bf16 %v6494_v41  ;;  %v1248_v60 = vmul.f32 1.442695, %v1168_v1  ;;  %5139 = vpow2.f32 %v1256_v19  ;;  %v1177_v46 = vunpack.c.l.bf16 %v6496_v30 }
 0x390   : > { %v5130_v6 = vpop.eup %5129  ;;  %v1179_v4 = vunpack.c.h.bf16 %v6496_v30  ;;  %v1252_v12 = vmul.f32 1.442695, %v1170_v44  ;;  %5141 = vpow2.f32 %v1260_v31  ;;  %v1181_v9 = vunpack.c.l.bf16 %v6498_v52 }
 0x391   : > { %v5132_v56 = vpop.eup %5131  ;;  %v1230_v61 = vmul.f32 1.442695, %v1159_v58  ;;  %5143 = vpow2.f32 %v1240_v26  ;;  %v6559_v54 = vpack.c.bf16 %v5130_v6, %v5126_v45  ;;  %v1183_v16 = vunpack.c.h.bf16 %v6498_v52 }
 0x392   : > { %v5134_v5 = vpop.eup %5133  ;;  %v1184_v41 = vunpack.c.l.bf16 %v6454_v0  ;;  %v1234_v23 = vmul.f32 1.442695, %v1161_v32  ;;  %5145 = vpow2.f32 %v1244_v14  ;;  %v1185_v11 = vunpack.c.l.bf16 %v6500_v62 }
 0x393   : > { %v5136_v53 = vpop.eup %5135  ;;  %v1186_v30 = vunpack.c.h.bf16 %v6454_v0  ;;  %v1238_v47 = vmul.f32 1.442695, %v1163_v8  ;;  %5147 = vpow2.f32 %v1248_v60  ;;  %1514 = vmatpush.bf16.msrb.mxu2 %v6559_v54  ;;  %v1242_v15 = vmul.f32 1.442695, %v1165_v59 }
 0x394   : > { %v5138_v7 = vpop.eup %5137  ;;  %5149 = vpow2.f32 %v1252_v12  ;;  %v6566_v57 = vpack.c.bf16 %v5128_v24, %v5122_v38  ;;  %v6569_v52 = vpack.c.bf16 %v5118_v55, %v6517_v18  ;;  %v1187_v58 = vunpack.c.h.bf16 %v6500_v62 }
 0x395   : > { %v5140_v3 = vpop.eup %5139  ;;  %5151 = vpow2.f32 %v1230_v61  ;;  %v1246_v50 = vmul.f32 1.442695, %v1167_v25  ;;  %v6572_v34 = vpack.c.bf16 %v5134_v5, %v5132_v56  ;;  %v1250_v1 = vmul.f32 1.442695, %v1169_v28 }
 0x396   : > { %v5142_v32 = vpop.eup %5141  ;;  %5153 = vpow2.f32 %v1234_v23  ;;  %v1376_v19 = vunpack.c.l.bf16 %v6569_v52  ;;  %v1378_v8 = vunpack.c.h.bf16 %v6569_v52  ;;  %v1188_v38 = vunpack.c.l.bf16 %v6462_v33 }
 0x397   : > { %v5144_v44 = vpop.eup %5143  ;;  %5155 = vpow2.f32 %v1238_v47  ;;  %v1254_v18 = vmul.f32 1.442695, %v1171_v29  ;;  %v1258_v55 = vmul.f32 1.442695, %v1173_v39  ;;  %1515 = vmatpush.bf16.msrb.mxu2 %v6572_v34  ;;  %v6578_v59 = vpack.c.bf16 %v5138_v7, %v5136_v53 }
 0x398   : > { %v5146_v31 = vpop.eup %5145  ;;  %5157 = vpow2.f32 %v1242_v15  ;;  %v1380_v25 = vunpack.c.l.bf16 %v6566_v57  ;;  %v1440_v26 = vadd.f32 %v1378_v8, %v1376_v19  ;;  %v1189_v28 = vunpack.c.l.bf16 %v6502_v2 }
 0x399   : > { %v5148_v45 = vpop.eup %5147  ;;  %5159 = vpow2.f32 %v1246_v50  ;;  %v1262_v14 = vmul.f32 1.442695, %v1175_v42  ;;  %v6582_v24 = vpack.c.bf16 %v5142_v32, %v5140_v3  ;;  %v1266_v29 = vmul.f32 1.442695, %v1177_v46 }
 0x39a   : > { %v5150_v60 = vpop.eup %5149  ;;  %5161 = vpow2.f32 %v1250_v1  ;;  %v1382_v39 = vunpack.c.h.bf16 %v6566_v57  ;;  %v1441_v6 = vadd.f32 %v1440_v26, %v1380_v25  ;;  %v1208_v56 = vunpack.c.l.bf16 %v6483_v49 }
 0x39b   : > { %v6585_v12 = vpop.eup %5151  ;;  %5163 = vpow2.f32 %v1254_v18  ;;  %v1270_v61 = vmul.f32 1.442695, %v1179_v4  ;;  %v1274_v5 = vmul.f32 1.442695, %v1181_v9  ;;  %1516 = vmatpush.bf16.msrb.mxu2 %v6582_v24  ;;  %v1350_v42 = vpack.c.bf16 %v5146_v31, %v5144_v44 }
 0x39c   : > { %v6589_v23 = vpop.eup %5153  ;;  %5165 = vpow2.f32 %v1258_v55  ;;  %v1384_v53 = vunpack.c.l.bf16 %v6578_v59  ;;  %v1442_v47 = vadd.f32 %v1441_v6, %v1382_v39  ;;  %v1210_v7 = vunpack.c.h.bf16 %v6483_v49 }
 0x39d   : > { %v6592_v46 = vpop.eup %5155  ;;  %5167 = vpow2.f32 %v1262_v14  ;;  %v1278_v15 = vmul.f32 1.442695, %v1183_v16  ;;  %v1352_v3 = vpack.c.bf16 %v5150_v60, %v5148_v45  ;;  %v1280_v4 = vmul.f32 1.442695, %v1184_v41 }
 0x39e   : > { %v6595_v50 = vpop.eup %5157  ;;  %5169 = vpow2.f32 %v1266_v29  ;;  %v1386_v9 = vunpack.c.h.bf16 %v6578_v59  ;;  %v1443_v32 = vadd.f32 %v1442_v47, %v1384_v53  ;;  %v1204_v19 = vunpack.c.l.bf16 %v6481_v13 }
 0x39f   : > { %v6598_v1 = vpop.eup %5159  ;;  %v1206_v8 = vunpack.c.h.bf16 %v6481_v13  ;;  %5171 = vpow2.f32 %v1270_v61  ;;  %v1284_v49 = vmul.f32 1.442695, %v1186_v30  ;;  %1517 = vmatpush.bf16.msrb.mxu2 %v1352_v3  ;;  %v1328_v44 = vmul.f32 1.442695, %v1208_v56 }
 0x3a0   : > { %v6604_v16 = vpop.eup %5161  ;;  %5173 = vpow2.f32 %v1274_v5  ;;  %v1388_v18 = vunpack.c.l.bf16 %v1350_v42  ;;  %v1444_v41 = vadd.f32 %v1443_v32, %v1386_v9  ;;  %v1190_v31 = vunpack.c.h.bf16 %v6462_v33 }
 0x3a1   : > { %v6606_v55 = vpop.eup %5163  ;;  %v1192_v25 = vunpack.c.l.bf16 %v6470_v40  ;;  %5175 = vpow2.f32 %v1278_v15  ;;  %v1288_v26 = vmul.f32 1.442695, %v1188_v38  ;;  %v1332_v0 = vmul.f32 1.442695, %v1210_v7 }
 0x3a2   : > { %v6610_v13 = vpop.eup %5165  ;;  %5177 = vpow2.f32 %v1280_v4  ;;  %v1390_v30 = vunpack.c.h.bf16 %v1350_v42  ;;  %v1445_v45 = vadd.f32 %v1444_v41, %v1388_v18  ;;  %v1200_v60 = vunpack.c.l.bf16 %v6477_v22 }
 0x3a3   : > { %v6612_v14 = vpop.eup %5167  ;;  %v1202_v29 = vunpack.c.h.bf16 %v6477_v22  ;;  %5179 = vpow2.f32 %v1284_v49  ;;  %v1320_v39 = vmul.f32 1.442695, %v1204_v19  ;;  %1518 = vmatpush.bf16.msrb.mxu2 %v1350_v42  ;;  %v1324_v6 = vmul.f32 1.442695, %v1206_v8 }
 0x3a4   : > { %v6616_v33 = vpop.eup %5169  ;;  %5181 = vpow2.f32 %v1328_v44  ;;  %v1392_v38 = vunpack.c.l.bf16 %v1352_v3  ;;  %v1446_v56 = vadd.f32 %v1445_v45, %v1390_v30  ;;  %v1191_v5 = vunpack.c.h.bf16 %v6502_v2 }
 0x3a5   : > { %v6618_v61 = vpop.eup %5171  ;;  %v1194_v53 = vunpack.c.h.bf16 %v6470_v40  ;;  %5183 = vpow2.f32 %v1288_v26  ;;  %v1292_v47 = vmul.f32 1.442695, %v1190_v31  ;;  %v1296_v15 = vmul.f32 1.442695, %v1192_v25 }
 0x3a6   : > { %v5174_v7 = vpop.eup %5173  ;;  %5185 = vpow2.f32 %v1332_v0  ;;  %v1394_v22 = vunpack.c.h.bf16 %v1352_v3  ;;  %v1447_v4 = vadd.f32 %v1446_v56, %v1392_v38  ;;  %v1196_v9 = vunpack.c.l.bf16 %v6475_v21 }
 0x3a7   : > { %v5176_v42 = vpop.eup %5175  ;;  %v1198_v32 = vunpack.c.h.bf16 %v6475_v21  ;;  %v1312_v19 = vmul.f32 1.442695, %v1200_v60  ;;  %5187 = vpow2.f32 %v1320_v39  ;;  %1519 = vmatpush.bf16.msrb.mxu2 %v6578_v59  ;;  %v1316_v49 = vmul.f32 1.442695, %v1202_v29 }
 0x3a8   : > { %v5178_v8 = vpop.eup %5177  ;;  %5189 = vpow2.f32 %v1324_v6  ;;  %v1396_v40 = vunpack.c.l.bf16 %v6582_v24  ;;  %v1448_v44 = vadd.f32 %v1447_v4, %v1394_v22  ;;  %v1193_v41 = vunpack.c.l.bf16 %v6504_v63 }
 0x3a9   : > { %v5180_v18 = vpop.eup %5179  ;;  %5191 = vpow2.f32 %v1292_v47  ;;  %v6629_v3 = vpack.c.bf16 %v6585_v12, %v6548_v51  ;;  %v6633_v21 = vpack.c.bf16 %v6542_v27, %v6528_v37  ;;  %v1300_v59 = vmul.f32 1.442695, %v1194_v53 }
 0x3aa   : > { %v5182_v31 = vpop.eup %5181  ;;  %5193 = vpow2.f32 %v1296_v15  ;;  %v1398_v25 = vunpack.c.h.bf16 %v6582_v24  ;;  %v1449_v26 = vadd.f32 %v1448_v44, %v1396_v40  ;;  %v1304_v30 = vmul.f32 1.442695, %v1196_v9 }
 0x3ab   : > { %v5184_v0 = vpop.eup %5183  ;;  %5195 = vpow2.f32 %v1312_v19  ;;  %1520 = vmatpush.bf16.msrb.mxu2 %v6566_v57  ;;  %v1377_v45 = vunpack.c.l.bf16 %v6633_v21  ;;  %v1379_v51 = vunpack.c.h.bf16 %v6633_v21  ;;  %v1308_v60 = vmul.f32 1.442695, %v1198_v32 }
 0x3ac   : > { %v5186_v12 = vpop.eup %5185  ;;  %5197 = vpow2.f32 %v1316_v49  ;;  %v1400_v37 = vunpack.c.l.bf16 %v6572_v34  ;;  %v1450_v27 = vadd.f32 %v1449_v26, %v1398_v25  ;;  %v6644_v24 = vpack.c.bf16 %v6592_v46, %v6589_v23 }
 0x3ad   : > { %v5188_v29 = vpop.eup %5187  ;;  %v6640_v39 = vpack.c.bf16 %v5186_v12, %v5182_v31  ;;  %v1381_v6 = vunpack.c.l.bf16 %v6629_v3  ;;  %v1477_v57 = vadd.f32 %v1379_v51, %v1377_v45  ;;  %5199 = vpow2.f32 %v1300_v59 }
 0x3ae   : > { %v5190_v38 = vpop.eup %5189  ;;  %v1402_v56 = vunpack.c.h.bf16 %v6572_v34  ;;  %v1451_v53 = vadd.f32 %v1450_v27, %v1400_v37  ;;  %v6648_v47 = vpack.c.bf16 %v5176_v42, %v5174_v7  ;;  %v1195_v22 = vunpack.c.h.bf16 %v6504_v63 }
 0x3af   : > { %v5192_v15 = vpop.eup %5191  ;;  %5201 = vpow2.f32 %v1304_v30  ;;  %1534 = vmatpush.bf16.msrb.mxu3 %v6640_v39  ;;  %1521 = vmatpush.bf16.msrb.mxu2 %v6569_v52  ;;  %v1383_v23 = vunpack.c.h.bf16 %v6629_v3  ;;  %v1478_v46 = vadd.f32 %v1477_v57, %v1381_v6  ;;  %v1404_v9 = vunpack.c.l.bf16 %v6559_v54 }
 0x3b0   : > { %v5194_v4 = vpop.eup %5193  ;;  %5203 = vpow2.f32 %v1308_v60  ;;  %v6655_v32 = vpack.c.bf16 %v5180_v18, %v5178_v8  ;;  %v1452_v34 = vadd.f32 %v1451_v53, %v1402_v56  ;;  %v6658_v42 = vpack.c.bf16 %v5190_v38, %v5188_v29  ;;  %v9425_v18 = vld [vmem:[#allocation85_spill] sm:$0xff] }
 0x3b1   : > { %v5196_v7 = vpop.eup %5195  ;;  %v6662_v19 = vpack.c.bf16 %v6598_v1, %v6595_v50  ;;  %v1385_v52 = vunpack.c.l.bf16 %v6644_v24  ;;  %v1479_v49 = vadd.f32 %v1478_v46, %v1383_v23  ;;  %v1197_v44 = vunpack.c.l.bf16 %v6506_v36 }
 0x3b2   : > { %v5198_v40 = vpop.eup %5197  ;;  %v1406_v31 = vunpack.c.h.bf16 %v6559_v54  ;;  %v1453_v8 = vadd.f32 %v1452_v34, %v1404_v9  ;;  %1522 = vmatmul.bf16.vlgmr.msrb.gmra.mxu2 %v9425_v18  ;;  %v6670_v59 = vpack.c.bf16 %v6618_v61, %v6616_v33  ;;  %v1199_v25 = vunpack.c.h.bf16 %v6506_v36 }
 0x3b3   : > { %1552 = vmatpush.bf16.msra.mxu2 %v6648_v47  ;;  %v1201_v50 = vunpack.c.l.bf16 %v6509_v17  ;;  %1535 = vmatpush.bf16.msrb.mxu3 %v6658_v42  ;;  %v1387_v1 = vunpack.c.h.bf16 %v6644_v24  ;;  %v1480_v26 = vadd.f32 %v1479_v49, %v1385_v52  ;;  %v5200_v30 = vpop.eup %5199  ;;  %v1203_v45 = vunpack.c.h.bf16 %v6509_v17 }
 0x3b4   : > { %v6677_v54 = vpack.c.bf16 %v5192_v15, %v5184_v0  ;;  %v1408_v51 = vunpack.c.l.bf16 %v6655_v32  ;;  %v1454_v12 = vadd.f32 %v1453_v8, %v1406_v31  ;;  %v6681_v61 = vpack.c.bf16 %v5198_v40, %v5196_v7 }
 0x3b5   : > { %v5202_v33 = vpop.eup %5201  ;;  %v1353_v60 = vpack.c.bf16 %v6606_v55, %v6604_v16  ;;  %v1389_v37 = vunpack.c.l.bf16 %v6662_v19  ;;  %v1481_v27 = vadd.f32 %v1480_v26, %v1387_v1  ;;  %v1205_v6 = vunpack.c.l.bf16 %v6525_v48 }
 0x3b6   : > { %v5204_v29 = vpop.eup %5203  ;;  %v1410_v0 = vunpack.c.h.bf16 %v6655_v32  ;;  %v1455_v57 = vadd.f32 %v1454_v12, %v1408_v51  ;;  %v1355_v38 = vpack.c.bf16 %v6612_v14, %v6610_v13  ;;  %v1209_v56 = vunpack.c.l.bf16 %v6536_v10 }
 0x3b7   : > { %1553 = vmatpush.bf16.msra.mxu2 %v6670_v59  ;;  %v1282_v53 = vmul.f32 1.442695, %v1185_v11  ;;  %1536 = vmatpush.bf16.msrb.mxu3 %v6681_v61  ;;  %v1391_v16 = vunpack.c.h.bf16 %v6662_v19  ;;  %v1482_v55 = vadd.f32 %v1481_v27, %v1389_v37  ;;  %v1286_v15 = vmul.f32 1.442695, %v1187_v58 }
 0x3b8   : > { %v1364_v23 = vpack.c.bf16 %v5200_v30, %v5194_v4  ;;  %v1412_v46 = vunpack.c.l.bf16 %v6677_v54  ;;  %v1456_v9 = vadd.f32 %v1455_v57, %v1410_v0  ;;  %v1211_v13 = vunpack.c.h.bf16 %v6536_v10 }
 0x3b9   : > { %v1366_v14 = vpack.c.bf16 %v5204_v29, %v5202_v33  ;;  %v1393_v34 = vunpack.c.l.bf16 %v1353_v60  ;;  %v1483_v7 = vadd.f32 %v1482_v55, %v1391_v16  ;;  %v1207_v11 = vunpack.c.h.bf16 %v6525_v48 }
 0x3ba   : > { %v1290_v52 = vmul.f32 1.442695, %v1189_v28  ;;  %v1414_v49 = vunpack.c.h.bf16 %v6677_v54  ;;  %v1457_v40 = vadd.f32 %v1456_v9, %v1412_v46  ;;  %5205 = vpow2.f32 %v1282_v53 }
 0x3bb   : > { %1554 = vmatpush.bf16.msra.mxu2 %v1355_v38  ;;  %v1294_v62 = vmul.f32 1.442695, %v1191_v5  ;;  %1537 = vmatpush.bf16.msrb.mxu3 %v1366_v14  ;;  %v1395_v58 = vunpack.c.h.bf16 %v1353_v60  ;;  %v1484_v4 = vadd.f32 %v1483_v7, %v1393_v34  ;;  %5207 = vpow2.f32 %v1286_v15  ;;  %v9427_v34 = vld [vmem:[#allocation31_spill] sm:$0xff]  ;;  %v9428_v7 = vld [vmem:[#allocation33_spill] sm:$0xff] }
 0x3bc   : > { %v1330_v10 = vmul.f32 1.442695, %v1209_v56  ;;  %v1416_v31 = vunpack.c.l.bf16 %v1364_v23  ;;  %v1458_v8 = vadd.f32 %v1457_v40, %v1414_v49  ;;  %v1298_v48 = vmul.f32 1.442695, %v1193_v41  ;;  %v9426_v56 = vld [vmem:[#allocation30_spill] sm:$0xff] }
 0x3bd   : > { %v1334_v1 = vmul.f32 1.442695, %v1211_v13  ;;  %v1397_v28 = vunpack.c.l.bf16 %v1355_v38  ;;  %v1485_v26 = vadd.f32 %v1484_v4, %v1395_v58  ;;  %5209 = vpow2.f32 %v1290_v52 }
 0x3be   : > { %v1302_v30 = vmul.f32 1.442695, %v1195_v22  ;;  %v1418_v2 = vunpack.c.h.bf16 %v1364_v23  ;;  %v1459_v5 = vadd.f32 %v1458_v8, %v1416_v31  ;;  %5211 = vpow2.f32 %v1294_v62  ;;  %v9430_v31 = vld [vmem:[#allocation12_spill] sm:$0xff] }
 0x3bf   : > { %1555 = vmatpush.bf16.msra.mxu2 %v1353_v60  ;;  %v1306_v51 = vmul.f32 1.442695, %v1197_v44  ;;  %1538 = vmatpush.bf16.msrb.mxu3 %v1364_v23  ;;  %v1399_v12 = vunpack.c.h.bf16 %v1355_v38  ;;  %v1486_v33 = vadd.f32 %v1485_v26, %v1397_v28  ;;  %v1322_v37 = vmul.f32 1.442695, %v1205_v6 }
 0x3c0   : > { %5213 = vpow2.f32 %v1330_v10  ;;  %v1420_v60 = vunpack.c.l.bf16 %v1366_v14  ;;  %v1460_v27 = vadd.f32 %v1459_v5, %v1418_v2  ;;  %v5206_v41 = vpop.eup %5205  ;;  %v1326_v29 = vmul.f32 1.442695, %v1207_v11  ;;  %v9429_v10 = vld [vmem:[#allocation10_spill] sm:$0xff] }
 0x3c1   : > { %5215 = vpow2.f32 %v1334_v1  ;;  %v1401_v0 = vunpack.c.l.bf16 %v6670_v59  ;;  %v1487_v63 = vadd.f32 %v1486_v33, %v1399_v12  ;;  %v5208_v22 = vpop.eup %5207  ;;  %v1310_v44 = vmul.f32 1.442695, %v1199_v25 }
 0x3c2   : > { %5217 = vpow2.f32 %v1298_v48  ;;  %v1422_v57 = vunpack.c.h.bf16 %v1366_v14  ;;  %v1461_v38 = vadd.f32 %v1460_v27, %v1420_v60  ;;  %1527 = vmatmul.bf16.gmra.mxu2 %v9426_v56  ;;  %v1314_v6 = vmul.f32 1.442695, %v1201_v50  ;;  %v9431_v27 = vld [vmem:[#allocation6_spill] sm:$0xff] }
 0x3c3   : > { %1556 = vmatpush.bf16.msra.mxu2 %v6662_v19  ;;  %5219 = vpow2.f32 %v1302_v30  ;;  %1539 = vmatpush.bf16.msrb.mxu3 %v6677_v54  ;;  %v1403_v19 = vunpack.c.h.bf16 %v6670_v59  ;;  %v1488_v53 = vadd.f32 %v1487_v63, %v1401_v0  ;;  %v5210_v16 = vpop.eup %5209  ;;  %v1318_v55 = vmul.f32 1.442695, %v1203_v45 }
 0x3c4   : > { %5221 = vpow2.f32 %v1322_v37  ;;  %v1424_v36 = vunpack.c.l.bf16 %v6681_v61  ;;  %v1462_v25 = vadd.f32 %v1461_v38, %v1422_v57  ;;  %v5212_v15 = vpop.eup %5211  ;;  %v1405_v23 = vunpack.c.l.bf16 %v6648_v47 }
 0x3c5   : > { %5223 = vpow2.f32 %v1326_v29  ;;  %v6723_v50 = vpack.c.bf16 %v5208_v22, %v5206_v41  ;;  %v1489_v54 = vadd.f32 %v1488_v53, %v1403_v19  ;;  %v1426_v59 = vunpack.c.h.bf16 %v6681_v61  ;;  %v9432_v41 = vld [vmem:[#allocation8_spill] sm:$0xff] }
 0x3c6   : > { %v5214_v46 = vpop.eup %5213  ;;  %5225 = vpow2.f32 %v1306_v51  ;;  %v1463_v9 = vadd.f32 %v1462_v25, %v1424_v36  ;;  %v6728_v17 = vpack.c.bf16 %v6485_v43, %v6479_v35  ;;  %v6734_v11 = vpack.c.bf16 %v9428_v7, %v9427_v34  ;;  %v1654_v7 = vpop.trf.xlu1 }
 0x3c7   : > { %1557 = vmatpush.bf16.msra.mxu2 %v6644_v24  ;;  %v5216_v45 = vpop.eup %5215  ;;  %5227 = vpow2.f32 %v1310_v44  ;;  %1540 = vmatpush.bf16.msrb.mxu3 %v6655_v32  ;;  %v1407_v24 = vunpack.c.h.bf16 %v6648_v47  ;;  %v1490_v13 = vadd.f32 %v1489_v54, %v1405_v23  ;;  %v1428_v61 = vunpack.c.l.bf16 %v6658_v42  ;;  %v9433_v54 = vld [vmem:[#allocation35_spill] sm:$0xff] }
 0x3c8   : > { %v5218_v14 = vpop.eup %5217  ;;  %5229 = vpow2.f32 %v1314_v6  ;;  %v1464_v52 = vadd.f32 %v1463_v9, %v1426_v59  ;;  %v1363_v35 = vpack.c.bf16 %v5212_v15, %v5210_v16  ;;  %v1409_v32 = vunpack.c.l.bf16 %v6723_v50 }
 0x3c9   : > { %v5220_v43 = vpop.eup %5219  ;;  %5231 = vpow2.f32 %v1318_v55  ;;  %v1491_v47 = vadd.f32 %v1490_v13, %v1407_v24  ;;  %v1430_v40 = vunpack.c.h.bf16 %v6658_v42  ;;  %v6742_v58 = vpack.c.bf16 %v5216_v45, %v5214_v46  ;;  %v9434_v46 = vld [vmem:[#allocation39_spill] sm:$0xff] }
 0x3ca   : > { %v5222_v49 = vpop.eup %5221  ;;  %v1465_v62 = vadd.f32 %v1464_v52, %v1428_v61  ;;  %1541 = vmatmul.bf16.vlgmr.msrb.gmra.mxu3 %v6734_v11  ;;  %v1636_v8 = vpack.c.bf16 %v9430_v31, %v9429_v10  ;;  %v1432_v28 = vunpack.c.l.bf16 %v6640_v39  ;;  %v1365_v30 = vpack.c.bf16 %v5220_v43, %v5218_v14  ;;  %v9435_v43 = vld [vmem:[#allocation11_spill] sm:$0xff] }
 0x3cb   : > { %1571 = vmatpush.bf16.msra.mxu3 %v6728_v17  ;;  %1558 = vmatpush.bf16.msra.mxu2 %v6629_v3  ;;  %v5224_v4 = vpop.eup %5223  ;;  %v1411_v3 = vunpack.c.h.bf16 %v6723_v50  ;;  %v1492_v48 = vadd.f32 %v1491_v47, %v1409_v32  ;;  %v1413_v2 = vunpack.c.l.bf16 %v1363_v35  ;;  %v1434_v12 = vunpack.c.h.bf16 %v6640_v39  ;;  %v9436_v32 = vld [vmem:[#allocation13_spill] sm:$0xff]  ;;  %v9437_v10 = vld [vmem:[#allocation7_spill] sm:$0xff] }
 0x3cc   : > { %v5226_v1 = vpop.eup %5225  ;;  %v1466_v26 = vadd.f32 %v1465_v62, %v1430_v40  ;;  %v1371_v37 = vpack.c.bf16 %v5224_v4, %v5222_v49  ;;  %v1634_v29 = vpack.c.bf16 %v9432_v41, %v9431_v27  ;;  %v1415_v0 = vunpack.c.h.bf16 %v1363_v35 }
 0x3cd   : > { %v5228_v42 = vpop.eup %5227  ;;  %v1493_v5 = vadd.f32 %v1492_v48, %v1411_v3  ;;  %v1436_v22 = vunpack.c.l.bf16 %v6515_v20  ;;  %v1417_v57 = vunpack.c.l.bf16 %v1365_v30  ;;  %v1438_v6 = vunpack.c.h.bf16 %v6515_v20 }
 0x3ce   : > { %v5230_v51 = vpop.eup %5229  ;;  %v1467_v33 = vadd.f32 %v1466_v26, %v1432_v28  ;;  %v1367_v44 = vpack.c.bf16 %v5228_v42, %v5226_v1  ;;  %v1419_v53 = vunpack.c.h.bf16 %v1365_v30  ;;  %v731_v59 = vpack.c.bf16 %v9434_v46, %v9433_v54  ;;  %v6769_v48 = vpop.trf.xlu1 }
 0x3cf   : > { %1572 = vmatpush.bf16.msra.mxu3 %v6742_v58  ;;  %1559 = vmatpush.bf16.msra.mxu2 %v6633_v21  ;;  %v5232_v60 = vpop.eup %5231  ;;  %v1494_v63 = vadd.f32 %v1493_v5, %v1413_v2  ;;  %v1431_v14 = vunpack.c.h.bf16 %v1371_v37  ;;  %v1433_v61 = vunpack.c.l.bf16 %v6742_v58  ;;  %v1637_v47 = vpack.c.bf16 %v9436_v32, %v9435_v43 }
 0x3d0   : > { %v1468_v21 = vadd.f32 %v1467_v33, %v1434_v12  ;;  %v1369_v19 = vpack.c.bf16 %v5232_v60, %v5230_v51  ;;  %v1421_v36 = vunpack.c.l.bf16 %v1367_v44  ;;  %v1423_v15 = vunpack.c.h.bf16 %v1367_v44 }
 0x3d1   : > { %v1495_v38 = vadd.f32 %v1494_v63, %v1415_v0  ;;  %v1435_v49 = vunpack.c.h.bf16 %v6742_v58  ;;  %v1437_v62 = vunpack.c.l.bf16 %v6728_v17 }
 0x3d2   : > { %1560 = vmatmul.bf16.vlgmr.msra.gmra.mxu2 %v9425_v18  ;;  %v1469_v39 = vadd.f32 %v1468_v21, %v1436_v22  ;;  %v1425_v9 = vunpack.c.l.bf16 %v1369_v19  ;;  %v1427_v20 = vunpack.c.h.bf16 %v1369_v19  ;;  %v1429_v18 = vunpack.c.l.bf16 %v1371_v37 }
 0x3d3   : > { %1724 = vmatpush.bf16.msrb.mxu2 %v1636_v8  ;;  %1573 = vmatpush.bf16.msra.mxu3 %v1371_v37  ;;  %v1496_v16 = vadd.f32 %v1495_v38, %v1417_v57  ;;  %v1439_v8 = vunpack.c.h.bf16 %v6728_v17 }
 0x3d4   : > { %v1470_v55 = vadd.f32 %v1469_v39, %v1438_v6 }
 0x3d5   : > { %v1497_v25 = vadd.f32 %v1496_v16, %v1419_v53 }
 0x3d6   : > { %v1656_v58 = vpop.trf.xlu1  ;;  %v1471_v5 = vrot.slane %v1470_v55, 4 }
 0x3d7   : > { %1725 = vmatpush.bf16.msrb.mxu2 %v1634_v29  ;;  %1574 = vmatpush.bf16.msra.mxu3 %v1369_v19  ;;  %v1498_v23 = vadd.f32 %v1497_v25, %v1421_v36 }
 0x3d8   : > { %v1472_v33 = vadd.f32 %v1471_v5, %v1470_v55 }
 0x3d9   : > { %v1499_v45 = vadd.f32 %v1498_v23, %v1423_v15 }
 0x3da   : > { %1546 = vmatmul.bf16.gmra.mxu3 %v731_v59  ;;  %v1473_v27 = vrot.slane %v1472_v33, 2 }
 0x3db   : > { %1575 = vmatpush.bf16.msra.mxu3 %v1367_v44  ;;  %v1500_v24 = vadd.f32 %v1499_v45, %v1425_v9 }
 0x3dc   : > { %v1474_v0 = vadd.f32 %v1473_v27, %v1472_v33 }
 0x3dd   : > { %v1501_v13 = vadd.f32 %v1500_v24, %v1427_v20 }
 0x3de   : > { %v1475_v22 = vrot.slane %v1474_v0, 1 }
 0x3df   : > { %1576 = vmatpush.bf16.msra.mxu3 %v1365_v30  ;;  %v1502_v34 = vadd.f32 %v1501_v13, %v1429_v18 }
 0x3e0   : > { %v1476_v6 = vadd.f32 %v1475_v22, %v1474_v0 }
 0x3e1   : > { %v1503_v52 = vadd.f32 %v1502_v34, %v1431_v14 }
 0x3e2   : > { %1565 = vmatmul.bf16.gmra.mxu2 %v9426_v56  ;;  %5233 = vrcp.f32 %v1476_v6  ;;  %vm1595_vm3 = vweird.f32 %v1476_v6  ;;  %v1601_v34 = vand.u32 2147483648, %v1476_v6 }
 0x3e3   : > { %1577 = vmatpush.bf16.msra.mxu3 %v1363_v35  ;;  %v1504_v40 = vadd.f32 %v1503_v52, %v1433_v61  ;;  %v9438_v35 = vld [vmem:[#allocation9_spill] sm:$0xff]  ;;  %v1599_v52 = vand.u32 2147483647, %v1476_v6 }
 0x3e4   : > { %v1635_v31 = vpack.c.bf16 %v9438_v35, %v9437_v10 }
 0x3e5   : > { %v1505_v4 = vadd.f32 %v1504_v40, %v1435_v49  ;;  %v1602_v40 = vor.u32 1.1754944e-38, %v1601_v34  ;;  %vm1600_vm7 = vcmp.eq.f32.partialorder %v1599_v52, 8.507059e+37 }
 0x3e7   : > { %1578 = vmatpush.bf16.msra.mxu3 %v6723_v50  ;;  %v1506_v3 = vadd.f32 %v1505_v4, %v1437_v62  ;;  %v6772_v50 = vpop.trf.xlu1 }
 0x3e8   : > { %v5234_v55 = vpop.eup %5233 }
 0x3e9   : > { %v1507_v56 = vadd.f32 %v1506_v3, %v1439_v8  ;;  %v1591_v25 = vmul.f32 %v5234_v55, %v1476_v6  ;;  %vm1596_vm1 = vweird.f32 %v5234_v55 }
 0x3ea   : > { %1579 = vmatmul.bf16.vlgmr.msra.gmra.mxu3 %v6734_v11  ;;  %vm6803_vm4 = vmor %vm1595_vm3, %vm1596_vm1 }
 0x3eb   : > { %1813 = vmatpush.bf16.msrb.mxu3 %v1637_v47  ;;  %v1508_v51 = vrot.slane %v1507_v56, 4 }
 0x3ed   : > { %v1509_v37 = vadd.f32 %v1508_v51, %v1507_v56 }
 0x3ef   : > { %1814 = vmatpush.bf16.msrb.mxu3 %v1635_v31  ;;  %v1658_v1 = vpop.trf.xlu1  ;;  %v1510_v41 = vrot.slane %v1509_v37, 2 }
 0x3f1   : > { %v1511_v63 = vadd.f32 %v1510_v41, %v1509_v37 }
 0x3f2   : > { %4835 = vmatmul.msk.bf16.vlgmr.msrb.gmra.mxu2 %vm389_vm0, %v1654_v7 }
 0x3f3   : > { %v1512_v44 = vrot.slane %v1511_v63, 1 }
 0x3f5   : > { %v1513_v19 = vadd.f32 %v1512_v44, %v1511_v63 }
 0x3f7   : > { %v6776_v28 = vpop.trf.xlu1  ;;  %5235 = vrcp.f32 %v1513_v19  ;;  %vm1610_vm5 = vweird.f32 %v1513_v19  ;;  %v1614_v43 = vand.u32 2147483647, %v1513_v19 }
 0x3f9   : > { %vm1615_vm8 = vcmp.eq.f32.partialorder %v1614_v43, 8.507059e+37 }
 0x3fa   : > { %1584 = vmatmul.bf16.gmra.mxu3 %v731_v59  ;;  %v1592_v59 = vsub.f32 1.0, %v1591_v25 }
 0x3fc   : > { %v1593_v45 = vmul.f32 %v5234_v55, %v1592_v59 }
 0x3fd   : > { %v5236_v36 = vpop.eup %5235 }
 0x3fe   : > { %v1606_v15 = vmul.f32 %v5236_v36, %v1513_v19  ;;  %v1594_v13 = vadd.f32 %v5234_v55, %v1593_v45  ;;  %vm1611_vm2 = vweird.f32 %v5236_v36 }
 0x3ff   : > { %v1660_v17 = vpop.trf.xlu1  ;;  %vm1612_vm6 = vmor %vm1610_vm5, %vm1611_vm2 }
 0x400   : > { %v1607_v9 = vsub.f32 1.0, %v1606_v15  ;;  %v1598_v47 = vsel %vm6803_vm4, %v5234_v55, %v1594_v13 }
 0x401   : > { %v1603_v31 = vsel %vm1600_vm7, %v1602_v40, %v1598_v47 }
 0x402   : > { %4836 = vmatmul.msk.bf16.gmra.mxu2 %vm389_vm0, %v1656_v58  ;;  %v1608_v20 = vmul.f32 %v5236_v36, %v1607_v9 }
 0x404   : > { %v1609_v14 = vadd.f32 %v5236_v36, %v1608_v20 }
 0x406   : > { %v1613_v49 = vsel %vm1612_vm6, %v5236_v36, %v1609_v14 }
 0x407   : > { %v6780_v11 = vpop.trf.xlu1 }
 0x40a   : > { %4851 = vmatmul.msk.bf16.vlgmr.msrb.gmra.mxu3 %vm389_vm0, %v1654_v7  ;;  %v1616_v7 = vand.u32 2147483648, %v1513_v19 }
 0x40c   : > { %v1617_v4 = vor.u32 1.1754944e-38, %v1616_v7 }
 0x40e   : > { %v1618_v8 = vsel %vm1615_vm8, %v1617_v4, %v1613_v49 }
 0x40f   : > { %v1662_v26 = vpop.trf.xlu1 }
 0x412   : > { %4837 = vmatmul.msk.bf16.gmra.mxu2 %vm389_vm0, %v1658_v1 }
 0x417   : > { %v6784_v42 = vpop.trf.xlu1 }
 0x41a   : > { %4852 = vmatmul.msk.bf16.gmra.mxu3 %vm389_vm0, %v1656_v58 }
 0x41f   : > { %v1664_v2 = vpop.trf.xlu1 }
 0x422   : > { %4838 = vmatmul.msk.bf16.gmra.mxu2 %vm389_vm0, %v1660_v17 }
 0x427   : > { %v6790_v60 = vpop.trf.xlu1 }
 0x42a   : > { %4853 = vmatmul.msk.bf16.gmra.mxu3 %vm389_vm0, %v1658_v1 }
 0x42f   : > { %v1666_v21 = vpop.trf.xlu1 }
 0x432   : > { %4839 = vmatmul.msk.bf16.gmra.mxu2 %vm389_vm0, %v1662_v26 }
 0x435   : > { %v1523_v30 = vpop.f32.mrf.mxu2 }
 0x437   : > { %v6799_v39 = vpop.trf.xlu1 }
 0x43a   : > { %4854 = vmatmul.msk.bf16.gmra.mxu3 %vm389_vm0, %v1660_v17 }
 0x43d   : > { %v6788_v12 = vpop.f32.mrf.mxu2 }
 0x43f   : > { %v1668_v46 = vpop.trf.xlu1 }
 0x442   : > { %4840 = vmatmul.msk.bf16.gmra.mxu2 %vm389_vm0, %v1664_v2 }
 0x445   : > { %v6793_v29 = vpop.f32.mrf.mxu2 }
 0x447   : > { %v1669_v34 = vpop.trf.xlu1 }
 0x44a   : > { %4855 = vmatmul.msk.bf16.gmra.mxu3 %vm389_vm0, %v1662_v26 }
 0x44d   : > { %v1542_v57 = vpop.f32.mrf.mxu3  ;;  %v6796_v38 = vpop.f32.mrf.mxu2 }
 0x44e   : > { %v1543_v32 = vadd.f32 %v1542_v57, %v1523_v30 }
 0x450   : > { %v1604_v3 = vmul.f32 %v1603_v31, %v1543_v32 }
 0x452   : > { %4841 = vmatmul.msk.bf16.gmra.mxu2 %vm389_vm0, %v1666_v21 }
 0x455   : > { %v1544_v53 = vpop.f32.mrf.mxu3  ;;  %v1561_v16 = vpop.f32.mrf.mxu2 }
 0x456   : > { %v1545_v1 = vadd.f32 %v1544_v53, %v6788_v12 }
 0x45a   : > { %4856 = vmatmul.msk.bf16.gmra.mxu3 %vm389_vm0, %v1664_v2  ;;  %v1620_v2 = vmul.f32 %v1603_v31, %v1545_v1 }
 0x45d   : > { %v1547_v23 = vpop.f32.mrf.mxu3  ;;  %v1563_v54 = vpop.f32.mrf.mxu2 }
 0x45e   : > { %v1548_v33 = vadd.f32 %v1547_v23, %v6793_v29 }
 0x460   : > { %v1622_v0 = vmul.f32 %v1603_v31, %v1548_v33 }
 0x462   : > { %4842 = vmatmul.msk.bf16.gmra.mxu2 %vm389_vm0, %v1668_v46 }
 0x465   : > { %v1549_v24 = vpop.f32.mrf.mxu3  ;;  %v1566_v18 = vpop.f32.mrf.mxu2 }
 0x466   : > { %v1550_v22 = vadd.f32 %v1549_v24, %v6796_v38 }
 0x468   : > { %v1624_v6 = vmul.f32 %v1603_v31, %v1550_v22 }
 0x46a   : > { %4857 = vmatmul.msk.bf16.gmra.mxu3 %vm389_vm0, %v1666_v21 }
 0x46d   : > { %v1580_v62 = vpop.f32.mrf.mxu3  ;;  %v1568_v10 = vpop.f32.mrf.mxu2 }
 0x46e   : > { %v1581_v35 = vadd.f32 %v1580_v62, %v1561_v16 }
 0x470   : > { %v1619_v56 = vmul.f32 %v1618_v8, %v1581_v35 }
 0x472   : > { %v1626_v58 = vpack.c.bf16 %v1619_v56, %v1604_v3  ;;  %4843 = vmatmul.msk.bf16.gmra.mxu2 %vm389_vm0, %v6769_v48 }
 0x474   : > { %1630 = vst [vmem:[#allocation2] sm:$0xff] %v1626_v58 }
 0x475   : > { %v1582_v17 = vpop.f32.mrf.mxu3  ;;  %v6813_v26 = vpop.f32.mrf.mxu2 }
 0x476   : > { %v1583_v30 = vadd.f32 %v1582_v17, %v1563_v54 }
 0x478   : > { %v1621_v5 = vmul.f32 %v1618_v8, %v1583_v30 }
 0x47a   : > { %v1627_v51 = vpack.c.bf16 %v1621_v5, %v1620_v2  ;;  %4858 = vmatmul.msk.bf16.gmra.mxu3 %vm389_vm0, %v1668_v46 }
 0x47c   : > { %1631 = vst [vmem:[#allocation2 + $0x8] sm:$0xff] %v1627_v51 }
 0x47d   : > { %v1585_v37 = vpop.f32.mrf.mxu3  ;;  %v6817_v27 = vpop.f32.mrf.mxu2 }
 0x47e   : > { %v1586_v41 = vadd.f32 %v1585_v37, %v1566_v18 }
 0x480   : > { %v1623_v63 = vmul.f32 %v1618_v8, %v1586_v41 }
 0x482   : > { %v1628_v12 = vpack.c.bf16 %v1623_v63, %v1622_v0  ;;  %4844 = vmatmul.msk.bf16.gmra.mxu2 %vm389_vm0, %v6772_v50 }
 0x484   : > { %1632 = vst [vmem:[#allocation2 + $0x10] sm:$0xff] %v1628_v12 }
 0x485   : > { %v1587_v21 = vpop.f32.mrf.mxu3  ;;  %v6822_v44 = vpop.f32.mrf.mxu2 }
 0x486   : > { %9441 = vst [vmem:[#allocation36_spill] sm:$0xff] %v6822_v44  ;;  %v1588_v57 = vadd.f32 %v1587_v21, %v1568_v10  ;;  %v1896_v22 = vmax.f32 %v6813_v26, %v6822_v44 }
 0x488   : > { %v1625_v29 = vmul.f32 %v1618_v8, %v1588_v57 }
 0x48a   : > { %v1629_v19 = vpack.c.bf16 %v1625_v29, %v1624_v6  ;;  %4859 = vmatmul.msk.bf16.gmra.mxu3 %vm389_vm0, %v6769_v48 }
 0x48c   : > { %1633 = vst [vmem:[#allocation2 + $0x18] sm:$0xff] %v1629_v19 }
 0x48d   : > { %v6826_v53 = vpop.f32.mrf.mxu3  ;;  %v6828_v16 = vpop.f32.mrf.mxu2 }
 0x48e   : > { %9442 = vst [vmem:[#allocation80_spill] sm:$0xff] %v6828_v16  ;;  %v1897_v12 = vmax.f32 %v6817_v27, %v6828_v16 }
 0x492   : > { %4845 = vmatmul.msk.bf16.gmra.mxu2 %vm389_vm0, %v6776_v28 }
 0x495   : > { %v6832_v38 = vpop.f32.mrf.mxu3  ;;  %v6834_v55 = vpop.f32.mrf.mxu2 }
 0x496   : > { %9443 = vst [vmem:[#allocation84_spill] sm:$0xff] %v6832_v38  ;;  %v1898_v57 = vmax.f32 %v1896_v22, %v6834_v55 }
 0x497   : > { %9444 = vst [vmem:[#allocation37_spill] sm:$0xff] %v6834_v55 }
 0x49a   : > { %4860 = vmatmul.msk.bf16.gmra.mxu3 %vm389_vm0, %v6772_v50 }
 0x49d   : > { %v6838_v36 = vpop.f32.mrf.mxu3  ;;  %v6840_v25 = vpop.f32.mrf.mxu2 }
 0x49e   : > { %9445 = vst [vmem:[#allocation41_spill] sm:$0xff] %v6838_v36  ;;  %v1899_v21 = vmax.f32 %v1897_v12, %v6840_v25 }
 0x49f   : > { %9446 = vst [vmem:[#allocation46_spill] sm:$0xff] %v6840_v25 }
 0x4a2   : > { %4846 = vmatmul.msk.bf16.gmra.mxu2 %vm389_vm0, %v6780_v11 }
 0x4a5   : > { %v6844_v48 = vpop.f32.mrf.mxu3  ;;  %v6846_v15 = vpop.f32.mrf.mxu2 }
 0x4a6   : > { %9447 = vst [vmem:[#allocation81_spill] sm:$0xff] %v6844_v48 }
 0x4aa   : > { %4861 = vmatmul.msk.bf16.gmra.mxu3 %vm389_vm0, %v6776_v28 }
 0x4ad   : > { %v6850_v23 = vpop.f32.mrf.mxu3  ;;  %v6852_v54 = vpop.f32.mrf.mxu2 }
 0x4ae   : > { %9448 = vst [vmem:[#allocation83_spill] sm:$0xff] %v6852_v54  ;;  %v1901_v6 = vmax.f32 %v1899_v21, %v6852_v54 }
 0x4b2   : > { %4847 = vmatmul.msk.bf16.gmra.mxu2 %vm389_vm0, %v6784_v42 }
 0x4b5   : > { %v6856_v50 = vpop.f32.mrf.mxu3  ;;  %v6858_v46 = vpop.f32.mrf.mxu2 }
 0x4b6   : > { %9449 = vst [vmem:[#allocation86_spill] sm:$0xff] %v6856_v50 }
 0x4ba   : > { %4862 = vmatmul.msk.bf16.gmra.mxu3 %vm389_vm0, %v6780_v11 }
 0x4bd   : > { %v6862_v59 = vpop.f32.mrf.mxu3  ;;  %v6864_v9 = vpop.f32.mrf.mxu2 }
 0x4c2   : > { %4848 = vmatmul.msk.bf16.gmra.mxu2 %vm389_vm0, %v6790_v60 }
 0x4c5   : > { %v6868_v28 = vpop.f32.mrf.mxu3  ;;  %v6870_v45 = vpop.f32.mrf.mxu2 }
 0x4c6   : > { %9450 = vst [vmem:[#allocation38_spill] sm:$0xff] %v6868_v28 }
 0x4ca   : > { %4863 = vmatmul.msk.bf16.gmra.mxu3 %vm389_vm0, %v6784_v42 }
 0x4cd   : > { %v6874_v20 = vpop.f32.mrf.mxu3  ;;  %v6876_v24 = vpop.f32.mrf.mxu2 }
 0x4d2   : > { %4849 = vmatmul.msk.bf16.gmra.mxu2 %vm389_vm0, %v6799_v39 }
 0x4d5   : > { %v6880_v11 = vpop.f32.mrf.mxu3  ;;  %v6882_v18 = vpop.f32.mrf.mxu2 }
 0x4d6   : > { %9451 = vst [vmem:[#allocation51_spill] sm:$0xff] %v6880_v11 }
 0x4da   : > { %4864 = vmatmul.msk.bf16.gmra.mxu3 %vm389_vm0, %v6790_v60 }
 0x4dd   : > { %v6886_v13 = vpop.f32.mrf.mxu3  ;;  %v6888_v14 = vpop.f32.mrf.mxu2 }
 0x4e2   : > { %4850 = vmatmul.msk.bf16.gmra.mxu2 %vm389_vm0, %v1669_v34 }
 0x4e5   : > { %v6891_v42 = vpop.f32.mrf.mxu3  ;;  %v6893_v7 = vpop.f32.mrf.mxu2 }
 0x4ea   : > { %4865 = vmatmul.msk.bf16.gmra.mxu3 %vm389_vm0, %v6799_v39 }
 0x4ed   : > { %v6897_v61 = vpop.f32.mrf.mxu3  ;;  %v6899_v52 = vpop.f32.mrf.mxu2 }
 0x4f5   : > { %v6901_v43 = vpop.f32.mrf.mxu3  ;;  %v6903_v60 = vpop.f32.mrf.mxu2 }
 0x4fa   : > { %4866 = vmatmul.msk.bf16.gmra.mxu3 %vm389_vm0, %v1669_v34  ;;  %v1900_v34 = vmax.f32 %v1898_v57, %v6846_v15 }
 0x4fd   : > { %v6906_v32 = vpop.f32.mrf.mxu3  ;;  %v6908_v47 = vpop.f32.mrf.mxu2 }
 0x505   : > { %v6910_v49 = vpop.f32.mrf.mxu3  ;;  %v6912_v40 = vpop.f32.mrf.mxu2 }
 0x50d   : > { %v6914_v62 = vpop.f32.mrf.mxu3  ;;  %v6916_v39 = vpop.f32.mrf.mxu2 }
 0x515   : > { %v6918_v4 = vpop.f32.mrf.mxu3  ;;  %v6920_v10 = vpop.f32.mrf.mxu2 }
 0x516   : > { %9452 = vst [vmem:[#allocation54_spill] sm:$0xff] %v6918_v4 }
 0x51d   : > { %v6922_v35 = vpop.f32.mrf.mxu3  ;;  %v6924_v31 = vpop.f32.mrf.mxu2 }
 0x51e   : > { %9453 = vst [vmem:[#allocation57_spill] sm:$0xff] %v6924_v31 }
 0x525   : > { %v6926_v8 = vpop.f32.mrf.mxu3  ;;  %v6928_v3 = vpop.f32.mrf.mxu2 }
 0x526   : > { %9454 = vst [vmem:[#allocation61_spill] sm:$0xff] %v6926_v8 }
 0x52d   : > { %v6930_v56 = vpop.f32.mrf.mxu3  ;;  %v6932_v58 = vpop.f32.mrf.mxu2 }
 0x535   : > { %v6934_v1 = vpop.f32.mrf.mxu3  ;;  %v6936_v17 = vpop.f32.mrf.mxu2 }
 0x536   : > { %9455 = vst [vmem:[#allocation65_spill] sm:$0xff] %v6934_v1 }
 0x53d   : > { %v6938_v30 = vpop.f32.mrf.mxu3  ;;  %v6940_v2 = vpop.f32.mrf.mxu2 }
 0x545   : > { %v6942_v5 = vpop.f32.mrf.mxu3  ;;  %v6944_v51 = vpop.f32.mrf.mxu2 }
 0x54d   : > { %v6946_v33 = vpop.f32.mrf.mxu3  ;;  %v6948_v37 = vpop.f32.mrf.mxu2 }
 0x54e   : > { %9456 = vst [vmem:[#allocation67_spill] sm:$0xff] %v6946_v33  ;;  %v1902_v33 = vmax.f32 %v1900_v34, %v6858_v46 }
 0x550   : > { %v1904_v44 = vmax.f32 %v1902_v33, %v6870_v45 }
 0x552   : > { %v1906_v22 = vmax.f32 %v1904_v44, %v6882_v18  ;;  %v1934_v44 = vmax.f32 %v6832_v38, %v6844_v48 }
 0x554   : > { %v1908_v54 = vmax.f32 %v1906_v22, %v6893_v7  ;;  %v1933_v22 = vmax.f32 %v6826_v53, %v6838_v36 }
 0x555   : > { %v6950_v41 = vpop.f32.mrf.mxu3  ;;  %v6952_v0 = vpop.f32.mrf.mxu2 }
 0x55d   : > { %v6954_v63 = vpop.f32.mrf.mxu3  ;;  %v6965_v19 = vpop.f32.mrf.mxu2 }
 0x55e   : > { %9457 = vst [vmem:[#allocation74_spill] sm:$0xff] %v6954_v63  ;;  %v1903_v63 = vmax.f32 %v1901_v6, %v6864_v9  ;;  %v1910_v6 = vmax.f32 %v1908_v54, %v6903_v60 }
 0x560   : > { %v1905_v16 = vmax.f32 %v1903_v63, %v6876_v24  ;;  %v1912_v33 = vmax.f32 %v1910_v6, %v6912_v40  ;;  %v1935_v6 = vmax.f32 %v1933_v22, %v6850_v23 }
 0x562   : > { %v1907_v12 = vmax.f32 %v1905_v16, %v6888_v14  ;;  %v1914_v34 = vmax.f32 %v1912_v33, %v6920_v10  ;;  %v1937_v38 = vmax.f32 %v1935_v6, %v6862_v59 }
 0x564   : > { %v1909_v21 = vmax.f32 %v1907_v12, %v6899_v52  ;;  %v1916_v54 = vmax.f32 %v1914_v34, %v6928_v3 }
 0x565   : > { %v6963_v29 = vpop.f32.mrf.mxu3  ;;  %v6979_v57 = vpop.f32.mrf.mxu2 }
 0x566   : > { %9458 = vst [vmem:[#allocation79_spill] sm:$0xff] %v6963_v29  ;;  %v1911_v25 = vmax.f32 %v1909_v21, %v6908_v47  ;;  %v1936_v21 = vmax.f32 %v1934_v44, %v6856_v50 }
 0x568   : > { %v1913_v63 = vmax.f32 %v1911_v25, %v6916_v39 }
 0x56a   : > { %v1915_v16 = vmax.f32 %v1913_v63, %v6924_v31  ;;  %v1938_v63 = vmax.f32 %v1936_v21, %v6868_v28  ;;  %v1918_v31 = vmax.f32 %v1916_v54, %v6936_v17 }
 0x56c   : > { %v1917_v12 = vmax.f32 %v1915_v16, %v6932_v58  ;;  %v1940_v36 = vmax.f32 %v1938_v63, %v6880_v11  ;;  %v1920_v44 = vmax.f32 %v1918_v31, %v6944_v51 }
 0x56d   : > { %v6977_v55 = vpop.f32.mrf.mxu3  ;;  %v1804_v16 = vpop.f32.mrf.mxu2 }
 0x56e   : > { %9459 = vst [vmem:[#allocation82_spill] sm:$0xff] %v6977_v55  ;;  %v1919_v25 = vmax.f32 %v1917_v12, %v6940_v2  ;;  %v1939_v12 = vmax.f32 %v1937_v38, %v6874_v20  ;;  %v1942_v22 = vmax.f32 %v1940_v36, %v6891_v42  ;;  %v1922_v21 = vmax.f32 %v1920_v44, %v6952_v0 }
 0x570   : > { %v1921_v48 = vmax.f32 %v1919_v25, %v6948_v37  ;;  %v1941_v25 = vmax.f32 %v1939_v12, %v6886_v13  ;;  %v1944_v28 = vmax.f32 %v1942_v22, %v6901_v43  ;;  %v1924_v50 = vmax.f32 %v1922_v21, %v6979_v57 }
 0x572   : > { %v1923_v34 = vmax.f32 %v1921_v48, %v6965_v19  ;;  %v1943_v6 = vmax.f32 %v1941_v25, %v6897_v61  ;;  %v1946_v63 = vmax.f32 %v1944_v28, %v6910_v49 }
 0x574   : > { %v1925_v54 = vmax.f32 %v1923_v34, %v1804_v16  ;;  %v1945_v48 = vmax.f32 %v1943_v6, %v6906_v32  ;;  %v1948_v38 = vmax.f32 %v1946_v63, %v6918_v4  ;;  %v9461_v6 = vld [vmem:[#allocation67_spill] sm:$0xff] }
 0x575   : > { %v6998_v33 = vpop.f32.mrf.mxu3 }
 0x576   : > { %9460 = vst [vmem:[#allocation87_spill] sm:$0xff] %v6998_v33  ;;  %v1926_v31 = vmax.f32 %v1924_v50, %v1925_v54  ;;  %v1947_v36 = vmax.f32 %v1945_v48, %v6914_v62  ;;  %v1950_v44 = vmax.f32 %v1948_v38, %v6926_v8  ;;  %v9462_v8 = vld [vmem:[#allocation74_spill] sm:$0xff] }
 0x578   : > { %v1927_v34 = vrot.slane %v1926_v31, 4  ;;  %v1949_v12 = vmax.f32 %v1947_v36, %v6922_v35  ;;  %v1952_v22 = vmax.f32 %v1950_v44, %v6934_v1 }
 0x57a   : > { %v1951_v21 = vmax.f32 %v1949_v12, %v6930_v56  ;;  %v1954_v28 = vmax.f32 %v1952_v22, %v6942_v5  ;;  %v1928_v50 = vmax.f32 %v1926_v31, %v1927_v34 }
 0x57c   : > { %v1953_v54 = vmax.f32 %v1951_v21, %v6938_v30  ;;  %v1956_v25 = vmax.f32 %v1954_v28, %v6950_v41  ;;  %v1929_v4 = vrot.slane %v1928_v50, 2 }
 0x57d   : > { %v7014_v11 = vpop.f32.mrf.mxu3 }
 0x57e   : > { %v1955_v63 = vmax.f32 %v1953_v54, %v9461_v6  ;;  %v1958_v48 = vmax.f32 %v1956_v25, %v6963_v29  ;;  %v1930_v1 = vmax.f32 %v1928_v50, %v1929_v4 }
 0x580   : > { %v1957_v36 = vmax.f32 %v1955_v63, %v9462_v8  ;;  %v1960_v44 = vmax.f32 %v1958_v48, %v6998_v33  ;;  %v1931_v22 = vrot.slane %v1930_v1, 1  ;;  %v9463_v33 = vld [vmem:[#allocation40_spill] sm:$0xff] }
 0x582   : > { %v1959_v12 = vmax.f32 %v1957_v36, %v6977_v55  ;;  %v7033_v28 = vmax.f32 %v1930_v1, %v1931_v22  ;;  %v9464_v36 = vld [vmem:[#allocation43_spill] sm:$0xff]  ;;  %v9466_v55 = vld [vmem:[#allocation48_spill] sm:$0xff] }
 0x583   : > { %v7040_v4 = vpack.c.bf16 %v9464_v36, %v9463_v33  ;;  %v9468_v22 = vld [vmem:[#allocation80_spill] sm:$0xff] }
 0x584   : > { %v1961_v34 = vmax.f32 %v1959_v12, %v7014_v11  ;;  %v2030_v25 = vsub.f32 %v6979_v57, %v7033_v28  ;;  %v2032_v29 = vsub.f32 %v1804_v16, %v7033_v28  ;;  %v9465_v12 = vld [vmem:[#allocation45_spill] sm:$0xff]  ;;  %v1972_v57 = vsub.f32 %v6817_v27, %v7033_v28 }
 0x585   : > { %v7026_v38 = vpop.f32.mrf.mxu3  ;;  %v1976_v33 = vsub.f32 %v9468_v22, %v7033_v28  ;;  %v1986_v27 = vsub.f32 %v6858_v46, %v7033_v28  ;;  %v1998_v46 = vsub.f32 %v6893_v7, %v7033_v28  ;;  %v9472_v7 = vld [vmem:[#allocation57_spill] sm:$0xff] }
 0x586   : > { %v1962_v31 = vmax.f32 %v1960_v44, %v7026_v38  ;;  %v2064_v8 = vpack.c.bf16 %v2032_v29, %v2030_v25  ;;  %v9467_v29 = vld [vmem:[#allocation36_spill] sm:$0xff]  ;;  %v9470_v25 = vld [vmem:[#allocation46_spill] sm:$0xff] }
 0x587   : > { %v1974_v16 = vsub.f32 %v9467_v29, %v7033_v28  ;;  %v1992_v29 = vsub.f32 %v6876_v24, %v7033_v28  ;;  %v2004_v24 = vsub.f32 %v6908_v47, %v7033_v28  ;;  %v2018_v47 = vsub.f32 %v6936_v17, %v7033_v28 }
 0x588   : > { %v1963_v21 = vmax.f32 %v1961_v34, %v1962_v31  ;;  %v2126_v50 = vunpack.c.l.bf16 %v2064_v8  ;;  %v7044_v31 = vpack.c.bf16 %v9466_v55, %v9465_v12  ;;  %v2128_v1 = vunpack.c.h.bf16 %v2064_v8 }
 0x589   : > { %v1970_v34 = vsub.f32 %v6813_v26, %v7033_v28  ;;  %v1980_v55 = vsub.f32 %v9470_v25, %v7033_v28  ;;  %v1982_v8 = vsub.f32 %v6846_v15, %v7033_v28  ;;  %v9471_v26 = vld [vmem:[#allocation83_spill] sm:$0xff]  ;;  %v1990_v12 = vsub.f32 %v6870_v45, %v7033_v28 }
 0x58a   : > { %v1964_v54 = vrot.slane %v1963_v21, 4  ;;  %v2250_v36 = vmul.f32 1.442695, %v2126_v50  ;;  %v1994_v15 = vsub.f32 %v6882_v18, %v7033_v28  ;;  %v1996_v25 = vsub.f32 %v6888_v14, %v7033_v28 }
 0x58b   : > { %v2002_v45 = vsub.f32 %v6903_v60, %v7033_v28  ;;  %v2006_v50 = vsub.f32 %v6912_v40, %v7033_v28  ;;  %v2008_v18 = vsub.f32 %v6916_v39, %v7033_v28  ;;  %v2010_v14 = vsub.f32 %v6920_v10, %v7033_v28 }
 0x58c   : > { %v1965_v63 = vmax.f32 %v1963_v21, %v1964_v54  ;;  %v9469_v21 = vld [vmem:[#allocation37_spill] sm:$0xff]  ;;  %5237 = vpow2.f32 %v2250_v36  ;;  %v2016_v60 = vsub.f32 %v6932_v58, %v7033_v28  ;;  %v2020_v39 = vsub.f32 %v6940_v2, %v7033_v28 }
 0x58d   : > { %v1978_v54 = vsub.f32 %v9469_v21, %v7033_v28  ;;  %v2254_v21 = vmul.f32 1.442695, %v2128_v1  ;;  %v2012_v1 = vsub.f32 %v9472_v7, %v7033_v28  ;;  %v2022_v10 = vsub.f32 %v6944_v51, %v7033_v28 }
 0x58e   : > { %v1966_v48 = vrot.slane %v1965_v63, 2  ;;  %v2028_v58 = vsub.f32 %v6965_v19, %v7033_v28  ;;  %v7108_v36 = vpack.c.bf16 %v1972_v57, %v1970_v34  ;;  %v7110_v17 = vpack.c.bf16 %v1976_v33, %v1974_v16 }
 0x58f   : > { %5239 = vpow2.f32 %v2254_v21  ;;  %v7118_v51 = vpack.c.bf16 %v1992_v29, %v1990_v12  ;;  %v7124_v21 = vpack.c.bf16 %v1996_v25, %v1994_v15  ;;  %v7130_v34 = vpack.c.bf16 %v2008_v18, %v2006_v50  ;;  %v9473_v25 = vld [vmem:[#allocation84_spill] sm:$0xff] }
 0x590   : > { %v1967_v44 = vmax.f32 %v1965_v63, %v1966_v48  ;;  %v1984_v63 = vsub.f32 %v9471_v26, %v7033_v28  ;;  %v1988_v48 = vsub.f32 %v6864_v9, %v7033_v28  ;;  %v2000_v9 = vsub.f32 %v6899_v52, %v7033_v28 }
 0x591   : > { %v2014_v52 = vsub.f32 %v6928_v3, %v7033_v28  ;;  %v2024_v26 = vsub.f32 %v6948_v37, %v7033_v28  ;;  %v2026_v3 = vsub.f32 %v6952_v0, %v7033_v28  ;;  %v7128_v28 = vpack.c.bf16 %v2004_v24, %v2002_v45 }
 0x592   : > { %v1968_v22 = vrot.slane %v1967_v44, 1  ;;  %v7116_v2 = vpack.c.bf16 %v1988_v48, %v1986_v27  ;;  %v7126_v19 = vpack.c.bf16 %v2000_v9, %v1998_v46  ;;  %v7132_v57 = vpack.c.bf16 %v2012_v1, %v2010_v14  ;;  %v7136_v33 = vpop.eup %5237  ;;  %v9474_v14 = vld [vmem:[#allocation41_spill] sm:$0xff] }
 0x593   : > { %v7134_v16 = vpack.c.bf16 %v2016_v60, %v2014_v52  ;;  %v2070_v27 = vunpack.c.l.bf16 %v7110_v17  ;;  %v2072_v48 = vunpack.c.h.bf16 %v7110_v17  ;;  %v9475_v1 = vld [vmem:[#allocation81_spill] sm:$0xff]  ;;  %v2088_v60 = vunpack.c.h.bf16 %v7118_v51 }
 0x594   : > { %v7096_v40 = vmax.f32 %v1967_v44, %v1968_v22  ;;  %v7112_v44 = vpack.c.bf16 %v1980_v55, %v1978_v54  ;;  %v7114_v22 = vpack.c.bf16 %v1984_v63, %v1982_v8  ;;  %v7138_v54 = vpack.c.bf16 %v2020_v39, %v2018_v47 }
 0x595   : > { %v7142_v55 = vpack.c.bf16 %v2028_v58, %v2026_v3  ;;  %v7145_v8 = vpop.eup %5239  ;;  %v2068_v63 = vunpack.c.h.bf16 %v7108_v36  ;;  %v2090_v47 = vunpack.c.l.bf16 %v7124_v21  ;;  %v2092_v39 = vunpack.c.h.bf16 %v7124_v21 }
 0x596   : > { %v2031_v37 = vsub.f32 %v7014_v11, %v7096_v40  ;;  %v2033_v0 = vsub.f32 %v7026_v38, %v7096_v40  ;;  %v7140_v11 = vpack.c.bf16 %v2024_v26, %v2022_v10  ;;  %v2066_v38 = vunpack.c.l.bf16 %v7108_v36 }
 0x597   : > { %v2074_v12 = vunpack.c.l.bf16 %v7112_v44  ;;  %v1971_v15 = vsub.f32 %v6826_v53, %v7096_v40  ;;  %v1973_v46 = vsub.f32 %v9473_v25, %v7096_v40  ;;  %v2076_v9 = vunpack.c.h.bf16 %v7112_v44 }
 0x598   : > { %v2065_v29 = vpack.c.bf16 %v2033_v0, %v2031_v37  ;;  %v2078_v45 = vunpack.c.l.bf16 %v7114_v22  ;;  %v2080_v24 = vunpack.c.h.bf16 %v7114_v22  ;;  %v1975_v7 = vsub.f32 %v9474_v14, %v7096_v40 }
 0x599   : > { %v1977_v52 = vsub.f32 %v9475_v1, %v7096_v40  ;;  %v2086_v53 = vunpack.c.l.bf16 %v7118_v51  ;;  %v2094_v10 = vunpack.c.l.bf16 %v7126_v19  ;;  %v2096_v26 = vunpack.c.h.bf16 %v7126_v19 }
 0x59a   : > { %v2127_v3 = vunpack.c.l.bf16 %v2065_v29  ;;  %v2035_v58 = vpack.c.bf16 %v1973_v46, %v1971_v15  ;;  %v2129_v44 = vunpack.c.h.bf16 %v2065_v29  ;;  %v2130_v17 = vmul.f32 1.442695, %v2066_v38  ;;  %v9483_v29 = vld [vmem:[#allocation79_spill] sm:$0xff] }
 0x59b   : > { %v7175_v25 = vpack.c.bf16 %v1977_v52, %v1975_v7  ;;  %v2134_v1 = vmul.f32 1.442695, %v2068_v63  ;;  %v2138_v18 = vmul.f32 1.442695, %v2070_v27  ;;  %v2142_v15 = vmul.f32 1.442695, %v2072_v48 }
 0x59c   : > { %v2252_v22 = vmul.f32 1.442695, %v2127_v3  ;;  %v2067_v36 = vunpack.c.l.bf16 %v2035_v58  ;;  %v2256_v52 = vmul.f32 1.442695, %v2129_v44  ;;  %v2069_v0 = vunpack.c.h.bf16 %v2035_v58  ;;  %v9476_v44 = vld [vmem:[#allocation86_spill] sm:$0xff] }
 0x59d   : > { %v2071_v19 = vunpack.c.l.bf16 %v7175_v25  ;;  %v7187_v50 = vmul.f32 1.442695, %v2074_v12  ;;  %5241 = vpow2.f32 %v2130_v17  ;;  %v7189_v46 = vmul.f32 1.442695, %v2076_v9  ;;  %v9477_v48 = vld [vmem:[#allocation38_spill] sm:$0xff] }
 0x59e   : > { %v7191_v38 = vmul.f32 1.442695, %v2078_v45  ;;  %v7193_v3 = vmul.f32 1.442695, %v2080_v24  ;;  %5243 = vpow2.f32 %v2252_v22  ;;  %v1979_v58 = vsub.f32 %v6850_v23, %v7096_v40  ;;  %v9478_v24 = vld [vmem:[#allocation51_spill] sm:$0xff]  ;;  %v9482_v7 = vld [vmem:[#allocation74_spill] sm:$0xff] }
 0x59f   : > { %v1981_v63 = vsub.f32 %v9476_v44, %v7096_v40  ;;  %v2132_v37 = vmul.f32 1.442695, %v2067_v36  ;;  %5245 = vpow2.f32 %v2256_v52  ;;  %v1983_v27 = vsub.f32 %v6862_v59, %v7096_v40 }
 0x5a0   : > { %v1985_v12 = vsub.f32 %v9477_v48, %v7096_v40  ;;  %v2136_v9 = vmul.f32 1.442695, %v2069_v0  ;;  %v1987_v45 = vsub.f32 %v6874_v20, %v7096_v40  ;;  %v1989_v17 = vsub.f32 %v9478_v24, %v7096_v40  ;;  %v9481_v24 = vld [vmem:[#allocation65_spill] sm:$0xff] }
 0x5a1   : > { %5247 = vpow2.f32 %v2134_v1  ;;  %v2140_v23 = vmul.f32 1.442695, %v2071_v19  ;;  %v1991_v22 = vsub.f32 %v6886_v13, %v7096_v40  ;;  %v1993_v36 = vsub.f32 %v6891_v42, %v7096_v40 }
 0x5a2   : > { %5249 = vpow2.f32 %v2138_v18  ;;  %v2186_v59 = vmul.f32 1.442695, %v2094_v10  ;;  %v1995_v52 = vsub.f32 %v6897_v61, %v7096_v40  ;;  %v1997_v0 = vsub.f32 %v6901_v43, %v7096_v40  ;;  %v9479_v61 = vld [vmem:[#allocation54_spill] sm:$0xff] }
 0x5a3   : > { %v1999_v20 = vsub.f32 %v6906_v32, %v7096_v40  ;;  %5251 = vpow2.f32 %v2132_v37  ;;  %v7217_v1 = vpop.eup %5241  ;;  %v2001_v13 = vsub.f32 %v6910_v49, %v7096_v40  ;;  %v2003_v42 = vsub.f32 %v6914_v62, %v7096_v40 }
 0x5a4   : > { %5253 = vpow2.f32 %v2136_v9  ;;  %v2190_v18 = vmul.f32 1.442695, %v2096_v26  ;;  %v7223_v10 = vpop.eup %5243  ;;  %v2178_v43 = vmul.f32 1.442695, %v2090_v47  ;;  %v7231_v32 = vpack.c.bf16 %v7145_v8, %v7136_v33  ;;  %v9480_v26 = vld [vmem:[#allocation61_spill] sm:$0xff] }
 0x5a5   : > { %5255 = vpow2.f32 %v2140_v23  ;;  %v7233_v37 = vpop.eup %5245  ;;  %v2182_v48 = vmul.f32 1.442695, %v2092_v39  ;;  %v2039_v39 = vpack.c.bf16 %v1981_v63, %v1979_v58  ;;  %v2041_v21 = vpack.c.bf16 %v1985_v12, %v1983_v27 }
 0x5a6   : > { %5257 = vpow2.f32 %v2186_v59  ;;  %2447 = vmatpush.bf16.msra.mxu1 %v7231_v32  ;;  %v2174_v58 = vmul.f32 1.442695, %v2088_v60  ;;  %v2043_v8 = vpack.c.bf16 %v1989_v17, %v1987_v45  ;;  %v2073_v44 = vunpack.c.h.bf16 %v7175_v25 }
 0x5a7   : > { %v5248_v9 = vpop.eup %5247  ;;  %5259 = vpow2.f32 %v2142_v15  ;;  %v2170_v15 = vmul.f32 1.442695, %v2086_v53  ;;  %v7272_v49 = vpack.c.bf16 %v1997_v0, %v1995_v52  ;;  %v2075_v47 = vunpack.c.l.bf16 %v2039_v39 }
 0x5a8   : > { %v5250_v23 = vpop.eup %5249  ;;  %5261 = vpow2.f32 %v2190_v18  ;;  %v9484_v18 = vld [vmem:[#allocation82_spill] sm:$0xff]  ;;  %v7275_v60 = vpack.c.bf16 %v2001_v13, %v1999_v20  ;;  %v2077_v27 = vunpack.c.h.bf16 %v2039_v39  ;;  %v9485_v12 = vunpack.c.l.bf16 %v7116_v2 }
 0x5a9   : > { %v7252_v59 = vpop.eup %5251  ;;  %5263 = vpow2.f32 %v2178_v43  ;;  %v2045_v43 = vpack.c.bf16 %v1993_v36, %v1991_v22  ;;  %v2079_v17 = vunpack.c.l.bf16 %v2041_v21  ;;  %v2081_v25 = vunpack.c.h.bf16 %v2041_v21 }
 0x5aa   : > { %v7260_v33 = vpop.eup %5253  ;;  %5265 = vpow2.f32 %v2182_v48  ;;  %v2162_v48 = vmul.f32 1.442695, %v9485_v12  ;;  %v2083_v36 = vunpack.c.l.bf16 %v2043_v8  ;;  %v2144_v52 = vmul.f32 1.442695, %v2073_v44 }
 0x5ab   : > { %v7266_v63 = vpop.eup %5255  ;;  %5267 = vpow2.f32 %v7187_v50  ;;  %v9486_v50 = vunpack.c.h.bf16 %v7116_v2  ;;  %v2085_v20 = vunpack.c.h.bf16 %v2043_v8  ;;  %v2087_v13 = vunpack.c.l.bf16 %v2045_v43 }
 0x5ac   : > { %v5258_v53 = vpop.eup %5257  ;;  %5269 = vpow2.f32 %v7189_v46  ;;  %v2148_v39 = vmul.f32 1.442695, %v2075_v47  ;;  %v2089_v12 = vunpack.c.h.bf16 %v2045_v43  ;;  %v2091_v21 = vunpack.c.l.bf16 %v7272_v49 }
 0x5ad   : > { %v5260_v51 = vpop.eup %5259  ;;  %5271 = vpow2.f32 %v2170_v15  ;;  %v2166_v14 = vmul.f32 1.442695, %v9486_v50  ;;  %v2152_v2 = vmul.f32 1.442695, %v2077_v27  ;;  %v2156_v44 = vmul.f32 1.442695, %v2079_v17 }
 0x5ae   : > { %v5262_v45 = vpop.eup %5261  ;;  %5273 = vpow2.f32 %v2174_v58  ;;  %v2093_v47 = vunpack.c.h.bf16 %v7272_v49  ;;  %v2164_v27 = vmul.f32 1.442695, %v2083_v36  ;;  %v2097_v36 = vunpack.c.h.bf16 %v7275_v60 }
 0x5af   : > { %v5264_v22 = vpop.eup %5263  ;;  %5275 = vpow2.f32 %v7191_v38  ;;  %v7282_v46 = vpack.c.bf16 %v5262_v45, %v5258_v53  ;;  %v7287_v38 = vpack.c.bf16 %v5260_v51, %v5250_v23  ;;  %v7290_v53 = vpack.c.bf16 %v5248_v9, %v7217_v1 }
 0x5b0   : > { %v5266_v0 = vpop.eup %5265  ;;  %5277 = vpow2.f32 %v7193_v3  ;;  %v2160_v3 = vmul.f32 1.442695, %v2081_v25  ;;  %v2095_v23 = vunpack.c.l.bf16 %v7275_v60  ;;  %v2168_v1 = vmul.f32 1.442695, %v2085_v20 }
 0x5b1   : > { %v5268_v15 = vpop.eup %5267  ;;  %5279 = vpow2.f32 %v2162_v48  ;;  %2428 = vmatpush.bf16.msra.mxu0 %v7282_v46  ;;  %v7293_v43 = vpack.c.bf16 %v5266_v0, %v5264_v22  ;;  %v2290_v48 = vunpack.c.l.bf16 %v7290_v53  ;;  %v2292_v17 = vunpack.c.h.bf16 %v7290_v53 }
 0x5b2   : > { %v5270_v58 = vpop.eup %5269  ;;  %5281 = vpow2.f32 %v2166_v14  ;;  %v2172_v9 = vmul.f32 1.442695, %v2087_v13  ;;  %v2294_v25 = vunpack.c.l.bf16 %v7287_v38  ;;  %v2180_v20 = vmul.f32 1.442695, %v2091_v21 }
 0x5b3   : > { %v5272_v8 = vpop.eup %5271  ;;  %5283 = vpow2.f32 %v2144_v52  ;;  %v7299_v51 = vpack.c.bf16 %v5270_v58, %v5268_v15  ;;  %v2354_v50 = vadd.f32 %v2292_v17, %v2290_v48  ;;  %v2176_v52 = vmul.f32 1.442695, %v2089_v12  ;;  %v9487_v15 = vld [vmem:[#allocation87_spill] sm:$0xff] }
 0x5b4   : > { %v5274_v45 = vpop.eup %5273  ;;  %5285 = vpow2.f32 %v2148_v39  ;;  %v2296_v13 = vunpack.c.h.bf16 %v7287_v38  ;;  %v2029_v58 = vsub.f32 %v9487_v15, %v7096_v40  ;;  %v2188_v48 = vmul.f32 1.442695, %v2095_v23 }
 0x5b5   : > { %v5276_v14 = vpop.eup %5275  ;;  %5287 = vpow2.f32 %v2152_v2  ;;  %2429 = vmatpush.bf16.msra.mxu0 %v7293_v43  ;;  %v7303_v0 = vpack.c.bf16 %v5274_v45, %v5272_v8  ;;  %v2355_v2 = vadd.f32 %v2354_v50, %v2294_v25  ;;  %v2298_v8 = vunpack.c.l.bf16 %v7299_v51 }
 0x5b6   : > { %v5278_v49 = vpop.eup %5277  ;;  %5289 = vpow2.f32 %v2156_v44  ;;  %v2184_v44 = vmul.f32 1.442695, %v2093_v47  ;;  %v9488_v45 = vsub.f32 %v9479_v61, %v7096_v40  ;;  %v2192_v47 = vmul.f32 1.442695, %v2097_v36 }
 0x5b7   : > { %v5280_v22 = vpop.eup %5279  ;;  %5291 = vpow2.f32 %v2160_v3  ;;  %v2264_v12 = vpack.c.bf16 %v5278_v49, %v5276_v14  ;;  %v2356_v21 = vadd.f32 %v2355_v2, %v2296_v13  ;;  %v9489_v14 = vunpack.c.l.bf16 %v7128_v28 }
 0x5b8   : > { %v5282_v39 = vpop.eup %5281  ;;  %5293 = vpow2.f32 %v2164_v27  ;;  %v7322_v27 = vpack.c.bf16 %v9488_v45, %v2003_v42  ;;  %v9490_v62 = vsub.f32 %v6922_v35, %v7096_v40  ;;  %v9491_v42 = vsub.f32 %v9480_v26, %v7096_v40 }
 0x5b9   : > { %v7306_v19 = vpop.eup %5283  ;;  %5295 = vpow2.f32 %v2168_v1  ;;  %2430 = vmatpush.bf16.msra.mxu0 %v7303_v0  ;;  %v2266_v17 = vpack.c.bf16 %v5282_v39, %v5280_v22  ;;  %v2194_v1 = vmul.f32 1.442695, %v9489_v14  ;;  %v2357_v49 = vadd.f32 %v2356_v21, %v2298_v8 }
 0x5ba   : > { %v7311_v60 = vpop.eup %5285  ;;  %5297 = vpow2.f32 %v2172_v9  ;;  %v2300_v9 = vunpack.c.h.bf16 %v7299_v51  ;;  %v7337_v61 = vpack.c.bf16 %v9491_v42, %v9490_v62  ;;  %v9492_v50 = vsub.f32 %v6930_v56, %v7096_v40 }
 0x5bb   : > { %v7314_v3 = vpop.eup %5287  ;;  %5299 = vpow2.f32 %v2176_v52  ;;  %v9493_v22 = vsub.f32 %v9481_v24, %v7096_v40  ;;  %v9494_v52 = vunpack.c.h.bf16 %v7128_v28  ;;  %v9495_v35 = vunpack.c.l.bf16 %v7142_v55 }
 0x5bc   : > { %v7324_v23 = vpop.eup %5289  ;;  %5301 = vpow2.f32 %v2180_v20  ;;  %v2302_v13 = vunpack.c.l.bf16 %v2264_v12  ;;  %v2358_v2 = vadd.f32 %v2357_v49, %v2300_v9  ;;  %v9496_v56 = vsub.f32 %v6938_v30, %v7096_v40 }
 0x5bd   : > { %v7329_v25 = vpop.eup %5291  ;;  %v7345_v36 = vpack.c.bf16 %v9493_v22, %v9492_v50  ;;  %5303 = vpow2.f32 %v2184_v44  ;;  %v2198_v39 = vmul.f32 1.442695, %v9494_v52  ;;  %2431 = vmatpush.bf16.msra.mxu0 %v2266_v17  ;;  %v2242_v26 = vmul.f32 1.442695, %v9495_v35 }
 0x5be   : > { %v7349_v20 = vpop.eup %5293  ;;  %5305 = vpow2.f32 %v2188_v48  ;;  %v9497_v24 = vsub.f32 %v6942_v5, %v7096_v40  ;;  %v9498_v28 = vsub.f32 %v9461_v6, %v7096_v40  ;;  %v9499_v48 = vsub.f32 %v6950_v41, %v7096_v40 }
 0x5bf   : > { %v7353_v15 = vpop.eup %5295  ;;  %5307 = vpow2.f32 %v2192_v47  ;;  %v9500_v21 = vunpack.c.l.bf16 %v7130_v34  ;;  %v9501_v30 = vunpack.c.h.bf16 %v7142_v55  ;;  %v2304_v9 = vunpack.c.h.bf16 %v2264_v12 }
 0x5c0   : > { %v7361_v44 = vpack.c.bf16 %v9497_v24, %v9496_v56  ;;  %v7369_v8 = vpack.c.bf16 %v9499_v48, %v9498_v28  ;;  %v7373_v14 = vpop.eup %5297  ;;  %5309 = vpow2.f32 %v2194_v1  ;;  %v2359_v49 = vadd.f32 %v2358_v2, %v2302_v13 }
 0x5c1   : > { %v2202_v45 = vmul.f32 1.442695, %v9500_v21  ;;  %v2246_v5 = vmul.f32 1.442695, %v9501_v30  ;;  %v7377_v62 = vpop.eup %5299  ;;  %v9502_v6 = vsub.f32 %v9482_v7, %v7096_v40  ;;  %v9503_v41 = vsub.f32 %v9483_v29, %v7096_v40  ;;  %2432 = vmatpush.bf16.msra.mxu0 %v2264_v12 }
 0x5c2   : > { %v9504_v42 = vsub.f32 %v9484_v18, %v7096_v40  ;;  %5311 = vpow2.f32 %v2198_v39  ;;  %v9505_v55 = vunpack.c.l.bf16 %v7140_v11  ;;  %v7394_v22 = vpop.eup %5301  ;;  %v9506_v52 = vunpack.c.h.bf16 %v7140_v11 }
 0x5c3   : > { %v7385_v47 = vpack.c.bf16 %v9503_v41, %v9502_v6  ;;  %5313 = vpow2.f32 %v2242_v26  ;;  %v2306_v35 = vunpack.c.l.bf16 %v2266_v17  ;;  %v2360_v29 = vadd.f32 %v2359_v49, %v2304_v9  ;;  %v7398_v13 = vpop.eup %5303 }
 0x5c4   : > { %v7390_v50 = vpack.c.bf16 %v2029_v58, %v9504_v42  ;;  %v2234_v1 = vmul.f32 1.442695, %v9505_v55  ;;  %v2238_v7 = vmul.f32 1.442695, %v9506_v52  ;;  %v2099_v2 = vunpack.c.l.bf16 %v7322_v27  ;;  %v5306_v39 = vpop.eup %5305 }
 0x5c5   : > { %v2101_v40 = vunpack.c.h.bf16 %v7322_v27  ;;  %5315 = vpow2.f32 %v2202_v45  ;;  %v9507_v18 = vunpack.c.h.bf16 %v7130_v34  ;;  %v9508_v12 = vunpack.c.l.bf16 %v7132_v57  ;;  %v5308_v26 = vpop.eup %5307  ;;  %2433 = vmatpush.bf16.msra.mxu0 %v7299_v51 }
 0x5c6   : > { %5317 = vpow2.f32 %v2246_v5  ;;  %v2308_v11 = vunpack.c.h.bf16 %v2266_v17  ;;  %v2361_v24 = vadd.f32 %v2360_v29, %v2306_v35  ;;  %v2103_v28 = vunpack.c.l.bf16 %v7337_v61  ;;  %v5310_v34 = vpop.eup %5309 }
 0x5c7   : > { %v2206_v58 = vmul.f32 1.442695, %v9507_v18  ;;  %v2210_v56 = vmul.f32 1.442695, %v9508_v12  ;;  %v2105_v48 = vunpack.c.h.bf16 %v7337_v61  ;;  %v9509_v21 = vunpack.c.l.bf16 %v7138_v54 }
 0x5c8   : > { %5319 = vpow2.f32 %v2234_v1  ;;  %v9510_v45 = vunpack.c.h.bf16 %v7138_v54  ;;  %v2310_v5 = vunpack.c.l.bf16 %v7303_v0  ;;  %v2362_v17 = vadd.f32 %v2361_v24, %v2308_v11  ;;  %v5312_v49 = vpop.eup %5311 }
 0x5c9   : > { %v2226_v30 = vmul.f32 1.442695, %v9509_v21  ;;  %5321 = vpow2.f32 %v2238_v7  ;;  %v2107_v6 = vunpack.c.l.bf16 %v7345_v36  ;;  %v7417_v41 = vpack.c.bf16 %v7306_v19, %v7266_v63  ;;  %v5314_v51 = vpop.eup %5313  ;;  %2434 = vmatpush.bf16.msra.mxu0 %v7287_v38 }
 0x5ca   : > { %v2230_v9 = vmul.f32 1.442695, %v9510_v45  ;;  %5323 = vpow2.f32 %v2206_v58  ;;  %v7421_v42 = vpack.c.bf16 %v7260_v33, %v7252_v59  ;;  %v9511_v54 = vunpack.c.h.bf16 %v7132_v57 }
 0x5cb   : > { %5325 = vpow2.f32 %v2210_v56  ;;  %v2312_v1 = vunpack.c.h.bf16 %v7303_v0  ;;  %v2363_v52 = vadd.f32 %v2362_v17, %v2310_v5  ;;  %v5316_v7 = vpop.eup %5315  ;;  %v9512_v35 = vunpack.c.l.bf16 %v7134_v16 }
 0x5cc   : > { %v2214_v55 = vmul.f32 1.442695, %v9511_v54  ;;  %5327 = vpow2.f32 %v2226_v30  ;;  %v2291_v19 = vunpack.c.l.bf16 %v7421_v42  ;;  %v2293_v33 = vunpack.c.h.bf16 %v7421_v42  ;;  %v5318_v59 = vpop.eup %5317 }
 0x5cd   : > { %v2218_v29 = vmul.f32 1.442695, %v9512_v35  ;;  %v9513_v63 = vunpack.c.h.bf16 %v7134_v16  ;;  %5329 = vpow2.f32 %v2230_v9  ;;  %v2314_v57 = vunpack.c.l.bf16 %v7293_v43  ;;  %2435 = vmatpush.bf16.msra.mxu0 %v7290_v53 }
 0x5ce   : > { %v2364_v0 = vadd.f32 %v2363_v52, %v2312_v1  ;;  %v5320_v58 = vpop.eup %5319  ;;  %v7434_v12 = vpack.c.bf16 %v5318_v59, %v5314_v51  ;;  %v7438_v56 = vpack.c.bf16 %v7314_v3, %v7311_v60  ;;  %v2295_v38 = vunpack.c.l.bf16 %v7417_v41 }
 0x5cf   : > { %v2222_v18 = vmul.f32 1.442695, %v9513_v63  ;;  %v2391_v11 = vadd.f32 %v2293_v33, %v2291_v19  ;;  %v5322_v24 = vpop.eup %5321  ;;  %5331 = vpow2.f32 %v2214_v55  ;;  %v2316_v21 = vunpack.c.h.bf16 %v7293_v43 }
 0x5d0   : > { %v2365_v16 = vadd.f32 %v2364_v0, %v2314_v57  ;;  %v7442_v30 = vpack.c.bf16 %v5308_v26, %v5306_v39  ;;  %v5324_v45 = vpop.eup %5323  ;;  %v2109_v9 = vunpack.c.h.bf16 %v7345_v36  ;;  %5333 = vpow2.f32 %v2218_v29  ;;  %2448 = vmatpush.bf16.msra.mxu1 %v7434_v12  ;;  %2436 = vmatmul.bf16.vlgmr.msra.gmra.mxu0 %v7040_v4 }
 0x5d1   : > { %v2297_v60 = vunpack.c.h.bf16 %v7417_v41  ;;  %v2392_v3 = vadd.f32 %v2391_v11, %v2295_v38  ;;  %v5326_v5 = vpop.eup %5325  ;;  %5335 = vpow2.f32 %v2222_v18  ;;  %v2318_v17 = vunpack.c.l.bf16 %v7282_v46 }
 0x5d2   : > { %v7449_v51 = vpack.c.bf16 %v5312_v49, %v5310_v34  ;;  %v2366_v43 = vadd.f32 %v2365_v16, %v2316_v21  ;;  %2466 = vmatpush.bf16.msrb.mxu0 %v7442_v30  ;;  %v5328_v39 = vpop.eup %5327  ;;  %v7452_v26 = vpack.c.bf16 %v5322_v24, %v5320_v58  ;;  %v7456_v54 = vpack.c.bf16 %v7329_v25, %v7324_v23 }
 0x5d3   : > { %v2299_v53 = vunpack.c.l.bf16 %v7438_v56  ;;  %v2393_v55 = vadd.f32 %v2392_v3, %v2297_v60  ;;  %v5330_v1 = vpop.eup %5329  ;;  %v2111_v52 = vunpack.c.l.bf16 %v7361_v44  ;;  %v2320_v35 = vunpack.c.h.bf16 %v7282_v46 }
 0x5d4   : > { %v2367_v34 = vadd.f32 %v2366_v43, %v2318_v17  ;;  %v7464_v49 = vpack.c.bf16 %v7398_v13, %v7394_v22  ;;  %v2113_v29 = vunpack.c.h.bf16 %v7361_v44  ;;  %v2115_v23 = vunpack.c.l.bf16 %v7369_v8  ;;  %2449 = vmatpush.bf16.msra.mxu1 %v7452_v26 }
 0x5d5   : > { %v2301_v25 = vunpack.c.h.bf16 %v7438_v56  ;;  %v2394_v19 = vadd.f32 %v2393_v55, %v2299_v53  ;;  %v5332_v33 = vpop.eup %5331  ;;  %v2117_v59 = vunpack.c.h.bf16 %v7369_v8  ;;  %v7471_v46 = vpack.c.bf16 %v5324_v45, %v5316_v7 }
 0x5d6   : > { %v2322_v63 = vunpack.c.l.bf16 %v7449_v51  ;;  %v2368_v18 = vadd.f32 %v2367_v34, %v2320_v35  ;;  %2467 = vmatpush.bf16.msrb.mxu0 %v7464_v49  ;;  %v5334_v22 = vpop.eup %5333  ;;  %v7475_v13 = vpack.c.bf16 %v5330_v1, %v5328_v39  ;;  %v2267_v57 = vpack.c.bf16 %v7353_v15, %v7349_v20 }
 0x5d7   : > { %v2303_v0 = vunpack.c.l.bf16 %v7456_v54  ;;  %v2395_v58 = vadd.f32 %v2394_v19, %v2301_v25  ;;  %v5336_v38 = vpop.eup %5335  ;;  %v2119_v11 = vunpack.c.l.bf16 %v7385_v47  ;;  %v2324_v7 = vunpack.c.h.bf16 %v7449_v51 }
 0x5d8   : > { %v2369_v24 = vadd.f32 %v2368_v18, %v2322_v63  ;;  %v2269_v21 = vpack.c.bf16 %v7377_v62, %v7373_v14  ;;  %v2123_v16 = vunpack.c.l.bf16 %v7390_v50  ;;  %v2196_v45 = vmul.f32 1.442695, %v2099_v2  ;;  %2450 = vmatpush.bf16.msra.mxu1 %v7475_v13 }
 0x5d9   : > { %v2305_v20 = vunpack.c.h.bf16 %v7456_v54  ;;  %v2396_v15 = vadd.f32 %v2395_v58, %v2303_v0  ;;  %v2200_v60 = vmul.f32 1.442695, %v2101_v40  ;;  %v2278_v3 = vpack.c.bf16 %v5332_v33, %v5326_v5 }
 0x5da   : > { %v2326_v17 = vunpack.c.l.bf16 %v7471_v46  ;;  %v2370_v43 = vadd.f32 %v2369_v24, %v2324_v7  ;;  %2468 = vmatpush.bf16.msrb.mxu0 %v2269_v21  ;;  %v2125_v14 = vunpack.c.h.bf16 %v7390_v50  ;;  %v2280_v62 = vpack.c.bf16 %v5336_v38, %v5334_v22 }
 0x5db   : > { %v2307_v39 = vunpack.c.l.bf16 %v2267_v57  ;;  %v2397_v53 = vadd.f32 %v2396_v15, %v2305_v20  ;;  %v2121_v2 = vunpack.c.h.bf16 %v7385_v47  ;;  %v2204_v55 = vmul.f32 1.442695, %v2103_v28 }
 0x5dc   : > { %v2328_v1 = vunpack.c.h.bf16 %v7471_v46  ;;  %v2371_v35 = vadd.f32 %v2370_v43, %v2326_v17  ;;  %5337 = vpow2.f32 %v2196_v45  ;;  %v2208_v27 = vmul.f32 1.442695, %v2105_v48  ;;  %2451 = vmatpush.bf16.msra.mxu1 %v2280_v62 }
 0x5dd   : > { %v2309_v40 = vunpack.c.h.bf16 %v2267_v57  ;;  %v2398_v5 = vadd.f32 %v2397_v53, %v2307_v39  ;;  %5339 = vpow2.f32 %v2200_v60  ;;  %v2244_v50 = vmul.f32 1.442695, %v2123_v16  ;;  %v9514_v39 = vld [vmem:[#allocation42_spill] sm:$0xff]  ;;  %v9515_v53 = vld [vmem:[#allocation44_spill] sm:$0xff] }
 0x5de   : > { %v2330_v34 = vunpack.c.l.bf16 %v2278_v3  ;;  %v2372_v25 = vadd.f32 %v2371_v35, %v2328_v1  ;;  %2469 = vmatpush.bf16.msrb.mxu0 %v2267_v57  ;;  %v2212_v47 = vmul.f32 1.442695, %v2107_v6  ;;  %v2248_v19 = vmul.f32 1.442695, %v2125_v14 }
 0x5df   : > { %v2311_v28 = vunpack.c.l.bf16 %v2269_v21  ;;  %v2399_v33 = vadd.f32 %v2398_v5, %v2309_v40  ;;  %5341 = vpow2.f32 %v2204_v55  ;;  %v2216_v63 = vmul.f32 1.442695, %v2109_v9 }
 0x5e0   : > { %v2332_v61 = vunpack.c.h.bf16 %v2278_v3  ;;  %v2373_v48 = vadd.f32 %v2372_v25, %v2330_v34  ;;  %5343 = vpow2.f32 %v2208_v27  ;;  %v2220_v18 = vmul.f32 1.442695, %v2111_v52  ;;  %2452 = vmatpush.bf16.msra.mxu1 %v2278_v3  ;;  %2441 = vmatmul.bf16.gmra.mxu0 %v7044_v31  ;;  %v9517_v34 = vld [vmem:[#allocation20_spill] sm:$0xff] }
 0x5e1   : > { %v2313_v22 = vunpack.c.h.bf16 %v2269_v21  ;;  %v2400_v0 = vadd.f32 %v2399_v33, %v2311_v28  ;;  %v2236_v58 = vmul.f32 1.442695, %v2119_v11  ;;  %5345 = vpow2.f32 %v2244_v50  ;;  %v9516_v50 = vld [vmem:[#allocation18_spill] sm:$0xff] }
 0x5e2   : > { %v2334_v57 = vunpack.c.l.bf16 %v2280_v62  ;;  %v2374_v38 = vadd.f32 %v2373_v48, %v2332_v61  ;;  %2470 = vmatpush.bf16.msrb.mxu0 %v7456_v54  ;;  %v5338_v6 = vpop.eup %5337  ;;  %v2240_v7 = vmul.f32 1.442695, %v2121_v2  ;;  %5347 = vpow2.f32 %v2248_v19 }
 0x5e3   : > { %v2315_v24 = vunpack.c.l.bf16 %v7464_v49  ;;  %v2401_v36 = vadd.f32 %v2400_v0, %v2313_v22  ;;  %v5340_v9 = vpop.eup %5339  ;;  %5349 = vpow2.f32 %v2212_v47  ;;  %v2224_v52 = vmul.f32 1.442695, %v2113_v29 }
 0x5e4   : > { %v2336_v16 = vunpack.c.h.bf16 %v2280_v62  ;;  %v2375_v21 = vadd.f32 %v2374_v38, %v2334_v57  ;;  %5351 = vpow2.f32 %v2216_v63  ;;  %v2228_v11 = vmul.f32 1.442695, %v2115_v23  ;;  %2453 = vmatpush.bf16.msra.mxu1 %v7471_v46  ;;  %v9518_v38 = vld [vmem:[#allocation14_spill] sm:$0xff] }
 0x5e5   : > { %v2317_v54 = vunpack.c.h.bf16 %v7464_v49  ;;  %v2402_v45 = vadd.f32 %v2401_v36, %v2315_v24  ;;  %v5342_v20 = vpop.eup %5341  ;;  %v2232_v15 = vmul.f32 1.442695, %v2117_v59  ;;  %5353 = vpow2.f32 %v2236_v58 }
 0x5e6   : > { %v2338_v44 = vunpack.c.l.bf16 %v7475_v13  ;;  %v2376_v29 = vadd.f32 %v2375_v21, %v2336_v16  ;;  %2471 = vmatpush.bf16.msrb.mxu0 %v7438_v56  ;;  %v5344_v60 = vpop.eup %5343  ;;  %5355 = vpow2.f32 %v2240_v7  ;;  %v2319_v3 = vunpack.c.l.bf16 %v7442_v30 }
 0x5e7   : > { %v7517_v23 = vpack.c.bf16 %v5340_v9, %v5338_v6  ;;  %v2403_v46 = vadd.f32 %v2402_v45, %v2317_v54  ;;  %v5346_v17 = vpop.eup %5345  ;;  %5357 = vpow2.f32 %v2220_v18  ;;  %v2340_v49 = vunpack.c.h.bf16 %v7475_v13  ;;  %v9519_v6 = vld [vmem:[#allocation16_spill] sm:$0xff] }
 0x5e8   : > { %v2377_v43 = vadd.f32 %v2376_v29, %v2338_v44  ;;  %v7522_v8 = vpack.c.bf16 %v7233_v37, %v7223_v10  ;;  %v5348_v59 = vpop.eup %5347  ;;  %5359 = vpow2.f32 %v2224_v52  ;;  %2454 = vmatpush.bf16.msra.mxu1 %v7449_v51  ;;  %v2321_v56 = vunpack.c.h.bf16 %v7442_v30 }
 0x5e9   : > { %v2404_v14 = vadd.f32 %v2403_v46, %v2319_v3  ;;  %v5350_v62 = vpop.eup %5349  ;;  %v7528_v2 = vpack.c.bf16 %v9515_v53, %v9514_v39  ;;  %5361 = vpow2.f32 %v2228_v11  ;;  %v2342_v13 = vunpack.c.l.bf16 %v7452_v26  ;;  %v9520_v46 = vld [vmem:[#allocation47_spill] sm:$0xff]  ;;  %v2568_v53 = vpop.trf.xlu2 }
 0x5ea   : > { %v2378_v55 = vadd.f32 %v2377_v43, %v2340_v49  ;;  %2472 = vmatpush.bf16.msrb.mxu0 %v7417_v41  ;;  %v5352_v10 = vpop.eup %5351  ;;  %5363 = vpow2.f32 %v2232_v15  ;;  %v2277_v37 = vpack.c.bf16 %v5344_v60, %v5342_v20  ;;  %v2323_v51 = vunpack.c.l.bf16 %v7517_v23 }
 0x5eb   : > { %v2405_v30 = vadd.f32 %v2404_v14, %v2321_v56  ;;  %v5354_v1 = vpop.eup %5353  ;;  %v2344_v35 = vunpack.c.h.bf16 %v7452_v26  ;;  %2455 = vmatmul.bf16.vlgmr.msra.gmra.mxu1 %v7528_v2  ;;  %v7536_v40 = vpack.c.bf16 %v5348_v59, %v5346_v17  ;;  %v2550_v25 = vpack.c.bf16 %v9517_v34, %v9516_v50  ;;  %v9521_v17 = vld [vmem:[#allocation49_spill] sm:$0xff]  ;;  %v9524_v50 = vld [vmem:[#allocation15_spill] sm:$0xff] }
 0x5ec   : > { %2485 = vmatpush.bf16.msrb.mxu1 %v7522_v8  ;;  %v2379_v27 = vadd.f32 %v2378_v55, %v2342_v13  ;;  %v5356_v5 = vpop.eup %5355  ;;  %v2325_v41 = vunpack.c.h.bf16 %v7517_v23  ;;  %v2346_v28 = vunpack.c.l.bf16 %v7434_v12  ;;  %v2279_v63 = vpack.c.bf16 %v5352_v10, %v5350_v62  ;;  %v9522_v10 = vld [vmem:[#allocation19_spill] sm:$0xff] }
 0x5ed   : > { %v2406_v47 = vadd.f32 %v2405_v30, %v2323_v51  ;;  %v5358_v19 = vpop.eup %5357  ;;  %v2327_v61 = vunpack.c.l.bf16 %v2277_v37  ;;  %v2348_v22 = vunpack.c.h.bf16 %v7434_v12  ;;  %v2285_v58 = vpack.c.bf16 %v5356_v5, %v5354_v1  ;;  %v9523_v51 = vld [vmem:[#allocation21_spill] sm:$0xff] }
 0x5ee   : > { %v2380_v33 = vadd.f32 %v2379_v27, %v2344_v35  ;;  %2473 = vmatpush.bf16.msrb.mxu0 %v7421_v42  ;;  %v5360_v26 = vpop.eup %5359  ;;  %v2548_v7 = vpack.c.bf16 %v9519_v6, %v9518_v38  ;;  %v2329_v24 = vunpack.c.h.bf16 %v2277_v37  ;;  %v2350_v9 = vunpack.c.l.bf16 %v7231_v32 }
 0x5ef   : > { %v2407_v48 = vadd.f32 %v2406_v47, %v2325_v41  ;;  %v5362_v18 = vpop.eup %5361  ;;  %v2281_v52 = vpack.c.bf16 %v5360_v26, %v5358_v19  ;;  %v2331_v16 = vunpack.c.l.bf16 %v2279_v63  ;;  %v2352_v11 = vunpack.c.h.bf16 %v7231_v32 }
 0x5f0   : > { %2486 = vmatpush.bf16.msrb.mxu1 %v7536_v40  ;;  %v2381_v0 = vadd.f32 %v2380_v33, %v2346_v28  ;;  %v5364_v57 = vpop.eup %5363  ;;  %v2333_v45 = vunpack.c.h.bf16 %v2279_v63  ;;  %v1645_v49 = vpack.c.bf16 %v9521_v17, %v9520_v46  ;;  %v2345_v62 = vunpack.c.h.bf16 %v2285_v58 }
 0x5f1   : > { %v2408_v36 = vadd.f32 %v2407_v48, %v2327_v61  ;;  %v2283_v54 = vpack.c.bf16 %v5364_v57, %v5362_v18  ;;  %2474 = vmatmul.bf16.vlgmr.msrb.gmra.mxu0 %v7040_v4  ;;  %v2335_v44 = vunpack.c.l.bf16 %v2281_v52  ;;  %v2337_v60 = vunpack.c.h.bf16 %v2281_v52  ;;  %v7563_v47 = vpop.trf.xlu2 }
 0x5f2   : > { %2638 = vmatpush.bf16.msra.mxu0 %v2550_v25  ;;  %v2382_v42 = vadd.f32 %v2381_v0, %v2348_v22  ;;  %v2343_v4 = vunpack.c.l.bf16 %v2285_v58  ;;  %v2347_v13 = vunpack.c.l.bf16 %v7536_v40  ;;  %v2551_v30 = vpack.c.bf16 %v9523_v51, %v9522_v10 }
 0x5f3   : > { %v2409_v21 = vadd.f32 %v2408_v36, %v2329_v24  ;;  %v2339_v43 = vunpack.c.l.bf16 %v2283_v54  ;;  %v2341_v32 = vunpack.c.h.bf16 %v2283_v54  ;;  %v2349_v1 = vunpack.c.h.bf16 %v7536_v40 }
 0x5f4   : > { %2487 = vmatpush.bf16.msrb.mxu1 %v2285_v58  ;;  %v2383_v12 = vadd.f32 %v2382_v42, %v2350_v9  ;;  %v2351_v27 = vunpack.c.l.bf16 %v7522_v8  ;;  %v2353_v25 = vunpack.c.h.bf16 %v7522_v8 }
 0x5f5   : > { %v2410_v20 = vadd.f32 %v2409_v21, %v2331_v16 }
 0x5f6   : > { %2639 = vmatpush.bf16.msra.mxu0 %v2548_v7  ;;  %v2384_v15 = vadd.f32 %v2383_v12, %v2352_v11 }
 0x5f7   : > { %v2411_v29 = vadd.f32 %v2410_v20, %v2333_v45 }
 0x5f8   : > { %2488 = vmatpush.bf16.msrb.mxu1 %v2283_v54  ;;  %v2385_v61 = vrot.slane %v2384_v15, 4 }
 0x5f9   : > { %v2412_v3 = vadd.f32 %v2411_v29, %v2335_v44  ;;  %v2570_v40 = vpop.trf.xlu2 }
 0x5fa   : > { %v2386_v22 = vadd.f32 %v2385_v61, %v2384_v15 }
 0x5fb   : > { %v2413_v59 = vadd.f32 %v2412_v3, %v2337_v60  ;;  %2460 = vmatmul.bf16.gmra.mxu1 %v1645_v49 }
 0x5fc   : > { %2489 = vmatpush.bf16.msrb.mxu1 %v2281_v52  ;;  %v2387_v57 = vrot.slane %v2386_v22, 2 }
 0x5fd   : > { %v2414_v56 = vadd.f32 %v2413_v59, %v2339_v43 }
 0x5fe   : > { %v2388_v7 = vadd.f32 %v2387_v57, %v2386_v22 }
 0x5ff   : > { %v2415_v14 = vadd.f32 %v2414_v56, %v2341_v32 }
 0x600   : > { %2490 = vmatpush.bf16.msrb.mxu1 %v2279_v63  ;;  %v2389_v36 = vrot.slane %v2388_v7, 1 }
 0x601   : > { %v2416_v39 = vadd.f32 %v2415_v14, %v2343_v4  ;;  %2479 = vmatmul.bf16.gmra.mxu0 %v7044_v31 }
 0x602   : > { %v2390_v21 = vadd.f32 %v2389_v36, %v2388_v7 }
 0x603   : > { %v2417_v55 = vadd.f32 %v2416_v39, %v2345_v62 }
 0x604   : > { %2491 = vmatpush.bf16.msrb.mxu1 %v2277_v37  ;;  %v9525_v37 = vld [vmem:[#allocation17_spill] sm:$0xff]  ;;  %5365 = vrcp.f32 %v2390_v21  ;;  %vm2509_vm11 = vweird.f32 %v2390_v21  ;;  %v2515_v39 = vand.u32 2147483648, %v2390_v21 }
 0x605   : > { %v2418_v35 = vadd.f32 %v2417_v55, %v2347_v13  ;;  %v2549_v34 = vpack.c.bf16 %v9525_v37, %v9524_v50  ;;  %v2513_v55 = vand.u32 2147483647, %v2390_v21 }
 0x607   : > { %v2419_v5 = vadd.f32 %v2418_v35, %v2349_v1  ;;  %v2516_v35 = vor.u32 1.1754944e-38, %v2515_v39  ;;  %vm2514_vm15 = vcmp.eq.f32.partialorder %v2513_v55, 8.507059e+37 }
 0x608   : > { %2492 = vmatpush.bf16.msrb.mxu1 %v7517_v23  ;;  %v7566_v23 = vpop.trf.xlu2 }
 0x609   : > { %v2420_v41 = vadd.f32 %v2419_v5, %v2351_v27 }
 0x60a   : > { %v5366_v20 = vpop.eup %5365 }
 0x60b   : > { %v2421_v31 = vadd.f32 %v2420_v41, %v2353_v25  ;;  %2493 = vmatmul.bf16.vlgmr.msrb.gmra.mxu1 %v7528_v2  ;;  %v2505_v44 = vmul.f32 %v5366_v20, %v2390_v21  ;;  %vm2510_vm9 = vweird.f32 %v5366_v20 }
 0x60c   : > { %2727 = vmatpush.bf16.msra.mxu1 %v2551_v30  ;;  %vm7597_vm12 = vmor %vm2509_vm11, %vm2510_vm9 }
 0x60d   : > { %v2422_v48 = vrot.slane %v2421_v31, 4  ;;  %v2506_v17 = vsub.f32 1.0, %v2505_v44 }
 0x60f   : > { %v2423_v0 = vadd.f32 %v2422_v48, %v2421_v31  ;;  %v2507_v43 = vmul.f32 %v5366_v20, %v2506_v17 }
 0x610   : > { %2728 = vmatpush.bf16.msra.mxu1 %v2549_v34  ;;  %v2572_v19 = vpop.trf.xlu2 }
 0x611   : > { %4867 = vmatmul.msk.bf16.vlgmr.msra.gmra.mxu0 %vm389_vm0, %v2568_v53  ;;  %v2424_v38 = vrot.slane %v2423_v0, 2  ;;  %v2508_v14 = vadd.f32 %v5366_v20, %v2507_v43 }
 0x613   : > { %v2425_v24 = vadd.f32 %v2424_v38, %v2423_v0  ;;  %v2512_v30 = vsel %vm7597_vm12, %v5366_v20, %v2508_v14 }
 0x614   : > { %v2517_v34 = vsel %vm2514_vm15, %v2516_v35, %v2512_v30 }
 0x615   : > { %v2426_v42 = vrot.slane %v2425_v24, 1 }
 0x617   : > { %v2427_v11 = vadd.f32 %v2426_v42, %v2425_v24 }
 0x618   : > { %v7570_v28 = vpop.trf.xlu2 }
 0x619   : > { %5367 = vrcp.f32 %v2427_v11  ;;  %vm2524_vm13 = vweird.f32 %v2427_v11  ;;  %v2528_v10 = vand.u32 2147483647, %v2427_v11 }
 0x61b   : > { %2498 = vmatmul.bf16.gmra.mxu1 %v1645_v49  ;;  %vm2529_vm1 = vcmp.eq.f32.partialorder %v2528_v10, 8.507059e+37 }
 0x61f   : > { %v5368_v15 = vpop.eup %5367 }
 0x620   : > { %v2574_v8 = vpop.trf.xlu2  ;;  %v2520_v29 = vmul.f32 %v5368_v15, %v2427_v11  ;;  %vm2525_vm10 = vweird.f32 %v5368_v15 }
 0x621   : > { %4868 = vmatmul.msk.bf16.gmra.mxu0 %vm389_vm0, %v2570_v40  ;;  %vm2526_vm14 = vmor %vm2524_vm13, %vm2525_vm10 }
 0x622   : > { %v2521_v49 = vsub.f32 1.0, %v2520_v29 }
 0x624   : > { %v2522_v59 = vmul.f32 %v5368_v15, %v2521_v49 }
 0x626   : > { %v2523_v62 = vadd.f32 %v5368_v15, %v2522_v59 }
 0x628   : > { %v7574_v2 = vpop.trf.xlu2  ;;  %v2527_v1 = vsel %vm2526_vm14, %v5368_v15, %v2523_v62 }
 0x62b   : > { %4883 = vmatmul.msk.bf16.vlgmr.msra.gmra.mxu1 %vm389_vm0, %v2568_v53  ;;  %v2530_v53 = vand.u32 2147483648, %v2427_v11 }
 0x62d   : > { %v2531_v5 = vor.u32 1.1754944e-38, %v2530_v53 }
 0x62f   : > { %v2532_v25 = vsel %vm2529_vm1, %v2531_v5, %v2527_v1 }
 0x630   : > { %v2576_v33 = vpop.trf.xlu2 }
 0x631   : > { %4869 = vmatmul.msk.bf16.gmra.mxu0 %vm389_vm0, %v2572_v19 }
 0x638   : > { %v7579_v63 = vpop.trf.xlu2 }
 0x63b   : > { %4884 = vmatmul.msk.bf16.gmra.mxu1 %vm389_vm0, %v2570_v40 }
 0x640   : > { %v2578_v58 = vpop.trf.xlu2 }
 0x641   : > { %4870 = vmatmul.msk.bf16.gmra.mxu0 %vm389_vm0, %v2574_v8 }
 0x648   : > { %v7587_v9 = vpop.trf.xlu2 }
 0x64b   : > { %4885 = vmatmul.msk.bf16.gmra.mxu1 %vm389_vm0, %v2572_v19 }
 0x64d   : > { %v2437_v26 = vpop.f32.mrf.mxu0 }
 0x650   : > { %v2580_v54 = vpop.trf.xlu2 }
 0x651   : > { %4871 = vmatmul.msk.bf16.gmra.mxu0 %vm389_vm0, %v2576_v33 }
 0x655   : > { %v7581_v18 = vpop.f32.mrf.mxu0 }
 0x658   : > { %v7593_v60 = vpop.trf.xlu2 }
 0x65b   : > { %4886 = vmatmul.msk.bf16.gmra.mxu1 %vm389_vm0, %v2574_v8 }
 0x65d   : > { %v7584_v6 = vpop.f32.mrf.mxu0 }
 0x660   : > { %v2582_v32 = vpop.trf.xlu2 }
 0x661   : > { %4872 = vmatmul.msk.bf16.gmra.mxu0 %vm389_vm0, %v2578_v58 }
 0x665   : > { %v7589_v16 = vpop.f32.mrf.mxu0 }
 0x668   : > { %v2456_v52 = vpop.f32.mrf.mxu1  ;;  %v2583_v39 = vpop.trf.xlu2 }
 0x669   : > { %v2457_v51 = vadd.f32 %v2456_v52, %v2437_v26 }
 0x66b   : > { %4887 = vmatmul.msk.bf16.gmra.mxu1 %vm389_vm0, %v2576_v33  ;;  %v2518_v41 = vmul.f32 %v2517_v34, %v2457_v51 }
 0x66e   : > { %v2475_v45 = vpop.f32.mrf.mxu0 }
 0x670   : > { %v2458_v12 = vpop.f32.mrf.mxu1 }
 0x671   : > { %4873 = vmatmul.msk.bf16.gmra.mxu0 %vm389_vm0, %v2580_v54  ;;  %v2459_v19 = vadd.f32 %v2458_v12, %v7581_v18 }
 0x673   : > { %v2534_v61 = vmul.f32 %v2517_v34, %v2459_v19 }
 0x676   : > { %v2477_v46 = vpop.f32.mrf.mxu0 }
 0x678   : > { %v2461_v3 = vpop.f32.mrf.mxu1 }
 0x679   : > { %v2462_v0 = vadd.f32 %v2461_v3, %v7584_v6 }
 0x67b   : > { %4888 = vmatmul.msk.bf16.gmra.mxu1 %vm389_vm0, %v2578_v58  ;;  %v2536_v7 = vmul.f32 %v2517_v34, %v2462_v0 }
 0x67e   : > { %v2480_v4 = vpop.f32.mrf.mxu0 }
 0x680   : > { %v2463_v56 = vpop.f32.mrf.mxu1 }
 0x681   : > { %4874 = vmatmul.msk.bf16.gmra.mxu0 %vm389_vm0, %v2582_v32  ;;  %v2464_v36 = vadd.f32 %v2463_v56, %v7589_v16 }
 0x683   : > { %v2538_v11 = vmul.f32 %v2517_v34, %v2464_v36 }
 0x686   : > { %v2482_v50 = vpop.f32.mrf.mxu0 }
 0x688   : > { %v2494_v27 = vpop.f32.mrf.mxu1 }
 0x689   : > { %v2495_v37 = vadd.f32 %v2494_v27, %v2475_v45 }
 0x68b   : > { %v2533_v31 = vmul.f32 %v2532_v25, %v2495_v37  ;;  %4889 = vmatmul.msk.bf16.gmra.mxu1 %vm389_vm0, %v2580_v54 }
 0x68d   : > { %v2540_v40 = vpack.c.bf16 %v2533_v31, %v2518_v41 }
 0x68e   : > { %v7605_v33 = vpop.f32.mrf.mxu0 }
 0x68f   : > { %2544 = vst [vmem:[#allocation2 + $0x20] sm:$0xff] %v2540_v40 }
 0x690   : > { %v2496_v8 = vpop.f32.mrf.mxu1 }
 0x691   : > { %v2497_v26 = vadd.f32 %v2496_v8, %v2477_v46  ;;  %4875 = vmatmul.msk.bf16.gmra.mxu0 %vm389_vm0, %v7563_v47 }
 0x693   : > { %v2535_v48 = vmul.f32 %v2532_v25, %v2497_v26 }
 0x695   : > { %v2541_v22 = vpack.c.bf16 %v2535_v48, %v2534_v61 }
 0x696   : > { %v7610_v57 = vpop.f32.mrf.mxu0 }
 0x697   : > { %2545 = vst [vmem:[#allocation2 + $0x28] sm:$0xff] %v2541_v22 }
 0x698   : > { %v2499_v58 = vpop.f32.mrf.mxu1 }
 0x699   : > { %v2500_v38 = vadd.f32 %v2499_v58, %v2480_v4 }
 0x69b   : > { %v2537_v18 = vmul.f32 %v2532_v25, %v2500_v38  ;;  %4890 = vmatmul.msk.bf16.gmra.mxu1 %vm389_vm0, %v2582_v32 }
 0x69d   : > { %v2542_v24 = vpack.c.bf16 %v2537_v18, %v2536_v7 }
 0x69e   : > { %v7614_v52 = vpop.f32.mrf.mxu0 }
 0x69f   : > { %2546 = vst [vmem:[#allocation2 + $0x30] sm:$0xff] %v2542_v24  ;;  %v2810_v38 = vmax.f32 %v7605_v33, %v7614_v52 }
 0x6a0   : > { %v2501_v42 = vpop.f32.mrf.mxu1  ;;  %9528 = vst [vmem:[#allocation88_spill] sm:$0xff] %v7614_v52 }
 0x6a1   : > { %v2502_v21 = vadd.f32 %v2501_v42, %v2482_v50  ;;  %4876 = vmatmul.msk.bf16.gmra.mxu0 %vm389_vm0, %v7566_v23 }
 0x6a3   : > { %v2539_v54 = vmul.f32 %v2532_v25, %v2502_v21 }
 0x6a5   : > { %v2543_v6 = vpack.c.bf16 %v2539_v54, %v2538_v11 }
 0x6a6   : > { %v7620_v45 = vpop.f32.mrf.mxu0 }
 0x6a7   : > { %2547 = vst [vmem:[#allocation2 + $0x38] sm:$0xff] %v2543_v6  ;;  %v2811_v7 = vmax.f32 %v7610_v57, %v7620_v45 }
 0x6a8   : > { %v7618_v12 = vpop.f32.mrf.mxu1  ;;  %9529 = vst [vmem:[#allocation60_spill] sm:$0xff] %v7620_v45 }
 0x6ab   : > { %4891 = vmatmul.msk.bf16.gmra.mxu1 %vm389_vm0, %v7563_v47 }
 0x6ae   : > { %v7626_v20 = vpop.f32.mrf.mxu0 }
 0x6af   : > { %9530 = vst [vmem:[#allocation64_spill] sm:$0xff] %v7626_v20  ;;  %v2812_v18 = vmax.f32 %v2810_v38, %v7626_v20 }
 0x6b0   : > { %v7624_v16 = vpop.f32.mrf.mxu1 }
 0x6b1   : > { %4877 = vmatmul.msk.bf16.gmra.mxu0 %vm389_vm0, %v7570_v28 }
 0x6b6   : > { %v7632_v44 = vpop.f32.mrf.mxu0 }
 0x6b7   : > { %9531 = vst [vmem:[#allocation66_spill] sm:$0xff] %v7632_v44  ;;  %v2813_v24 = vmax.f32 %v2811_v7, %v7632_v44 }
 0x6b8   : > { %v7630_v15 = vpop.f32.mrf.mxu1 }
 0x6bb   : > { %4892 = vmatmul.msk.bf16.gmra.mxu1 %vm389_vm0, %v7566_v23 }
 0x6be   : > { %v7638_v3 = vpop.f32.mrf.mxu0 }
 0x6bf   : > { %v2814_v21 = vmax.f32 %v2812_v18, %v7638_v3 }
 0x6c0   : > { %v7636_v29 = vpop.f32.mrf.mxu1 }
 0x6c1   : > { %9532 = vst [vmem:[#allocation70_spill] sm:$0xff] %v7636_v29  ;;  %4878 = vmatmul.msk.bf16.gmra.mxu0 %vm389_vm0, %v7574_v2 }
 0x6c6   : > { %v7644_v46 = vpop.f32.mrf.mxu0 }
 0x6c7   : > { %v2815_v11 = vmax.f32 %v2813_v24, %v7644_v46 }
 0x6c8   : > { %v7642_v47 = vpop.f32.mrf.mxu1 }
 0x6cb   : > { %4893 = vmatmul.msk.bf16.gmra.mxu1 %vm389_vm0, %v7570_v28 }
 0x6ce   : > { %v7650_v49 = vpop.f32.mrf.mxu0 }
 0x6cf   : > { %v2816_v54 = vmax.f32 %v2814_v21, %v7650_v49 }
 0x6d0   : > { %v7648_v17 = vpop.f32.mrf.mxu1 }
 0x6d1   : > { %9533 = vst [vmem:[#allocation73_spill] sm:$0xff] %v7648_v17  ;;  %4879 = vmatmul.msk.bf16.gmra.mxu0 %vm389_vm0, %v7579_v63 }
 0x6d6   : > { %v7656_v43 = vpop.f32.mrf.mxu0 }
 0x6d7   : > { %v2817_v6 = vmax.f32 %v2815_v11, %v7656_v43 }
 0x6d8   : > { %v7654_v23 = vpop.f32.mrf.mxu1 }
 0x6d9   : > { %9534 = vst [vmem:[#allocation77_spill] sm:$0xff] %v7654_v23 }
 0x6db   : > { %4894 = vmatmul.msk.bf16.gmra.mxu1 %vm389_vm0, %v7574_v2 }
 0x6de   : > { %v7662_v32 = vpop.f32.mrf.mxu0 }
 0x6e0   : > { %v7660_v59 = vpop.f32.mrf.mxu1 }
 0x6e1   : > { %9535 = vst [vmem:[#allocation32_spill] sm:$0xff] %v7660_v59  ;;  %4880 = vmatmul.msk.bf16.gmra.mxu0 %vm389_vm0, %v7587_v9 }
 0x6e6   : > { %v7668_v56 = vpop.f32.mrf.mxu0 }
 0x6e7   : > { %v2819_v45 = vmax.f32 %v2817_v6, %v7668_v56 }
 0x6e8   : > { %v7666_v28 = vpop.f32.mrf.mxu1 }
 0x6eb   : > { %4895 = vmatmul.msk.bf16.gmra.mxu1 %vm389_vm0, %v7579_v63 }
 0x6ee   : > { %v7674_v14 = vpop.f32.mrf.mxu0 }
 0x6f0   : > { %v7672_v4 = vpop.f32.mrf.mxu1 }
 0x6f1   : > { %4881 = vmatmul.msk.bf16.gmra.mxu0 %vm389_vm0, %v7593_v60 }
 0x6f6   : > { %v7680_v62 = vpop.f32.mrf.mxu0 }
 0x6f7   : > { %9536 = vst [vmem:[#allocation34_spill] sm:$0xff] %v7680_v62  ;;  %v2821_v7 = vmax.f32 %v2819_v45, %v7680_v62 }
 0x6f8   : > { %v7678_v2 = vpop.f32.mrf.mxu1 }
 0x6fb   : > { %4896 = vmatmul.msk.bf16.gmra.mxu1 %vm389_vm0, %v7587_v9 }
 0x6fe   : > { %v7686_v13 = vpop.f32.mrf.mxu0 }
 0x6ff   : > { %9537 = vst [vmem:[#allocation85_spill] sm:$0xff] %v7686_v13 }
 0x700   : > { %v7684_v53 = vpop.f32.mrf.mxu1 }
 0x701   : > { %4882 = vmatmul.msk.bf16.gmra.mxu0 %vm389_vm0, %v2583_v39 }
 0x706   : > { %v7691_v55 = vpop.f32.mrf.mxu0 }
 0x707   : > { %v2823_v18 = vmax.f32 %v2821_v7, %v7691_v55 }
 0x708   : > { %v7689_v63 = vpop.f32.mrf.mxu1 }
 0x70b   : > { %4897 = vmatmul.msk.bf16.gmra.mxu1 %vm389_vm0, %v7593_v60 }
 0x70e   : > { %v7697_v51 = vpop.f32.mrf.mxu0 }
 0x710   : > { %v7695_v10 = vpop.f32.mrf.mxu1 }
 0x716   : > { %v7701_v9 = vpop.f32.mrf.mxu0 }
 0x717   : > { %v2825_v21 = vmax.f32 %v2823_v18, %v7701_v9 }
 0x718   : > { %v7699_v30 = vpop.f32.mrf.mxu1 }
 0x71b   : > { %4898 = vmatmul.msk.bf16.gmra.mxu1 %vm389_vm0, %v2583_v39  ;;  %v2818_v39 = vmax.f32 %v2816_v54, %v7662_v32 }
 0x71d   : > { %v2820_v38 = vmax.f32 %v2818_v39, %v7674_v14 }
 0x71e   : > { %v7706_v35 = vpop.f32.mrf.mxu0 }
 0x71f   : > { %v2822_v52 = vmax.f32 %v2820_v38, %v7686_v13 }
 0x720   : > { %v7704_v1 = vpop.f32.mrf.mxu1 }
 0x721   : > { %v2824_v24 = vmax.f32 %v2822_v52, %v7697_v51 }
 0x723   : > { %v2826_v11 = vmax.f32 %v2824_v24, %v7706_v35 }
 0x726   : > { %v7710_v5 = vpop.f32.mrf.mxu0 }
 0x727   : > { %v2827_v54 = vmax.f32 %v2825_v21, %v7710_v5 }
 0x728   : > { %v7708_v27 = vpop.f32.mrf.mxu1 }
 0x72e   : > { %v7714_v60 = vpop.f32.mrf.mxu0 }
 0x72f   : > { %9538 = vst [vmem:[#allocation30_spill] sm:$0xff] %v7714_v60  ;;  %v2828_v6 = vmax.f32 %v2826_v11, %v7714_v60 }
 0x730   : > { %v7712_v50 = vpop.f32.mrf.mxu1 }
 0x736   : > { %v7718_v34 = vpop.f32.mrf.mxu0 }
 0x737   : > { %9539 = vst [vmem:[#allocation31_spill] sm:$0xff] %v7718_v34  ;;  %v2829_v39 = vmax.f32 %v2827_v54, %v7718_v34 }
 0x738   : > { %v7716_v37 = vpop.f32.mrf.mxu1 }
 0x73e   : > { %v7722_v41 = vpop.f32.mrf.mxu0 }
 0x73f   : > { %9540 = vst [vmem:[#allocation33_spill] sm:$0xff] %v7722_v41  ;;  %v2830_v62 = vmax.f32 %v2828_v6, %v7722_v41 }
 0x740   : > { %v7720_v25 = vpop.f32.mrf.mxu1 }
 0x746   : > { %v7726_v40 = vpop.f32.mrf.mxu0 }
 0x747   : > { %9541 = vst [vmem:[#allocation10_spill] sm:$0xff] %v7726_v40  ;;  %v2831_v38 = vmax.f32 %v2829_v39, %v7726_v40 }
 0x748   : > { %v7724_v31 = vpop.f32.mrf.mxu1 }
 0x74e   : > { %v7730_v8 = vpop.f32.mrf.mxu0 }
 0x74f   : > { %v2832_v52 = vmax.f32 %v2830_v62, %v7730_v8  ;;  %v2848_v62 = vmax.f32 %v7624_v16, %v7636_v29 }
 0x750   : > { %v7728_v19 = vpop.f32.mrf.mxu1 }
 0x756   : > { %v7734_v61 = vpop.f32.mrf.mxu0 }
 0x757   : > { %v2833_v7 = vmax.f32 %v2831_v38, %v7734_v61  ;;  %v2847_v38 = vmax.f32 %v7618_v12, %v7630_v15 }
 0x758   : > { %v7732_v26 = vpop.f32.mrf.mxu1 }
 0x75e   : > { %v7738_v22 = vpop.f32.mrf.mxu0 }
 0x75f   : > { %v2834_v18 = vmax.f32 %v2832_v52, %v7738_v22  ;;  %v2850_v52 = vmax.f32 %v2848_v62, %v7648_v17 }
 0x760   : > { %v7736_v48 = vpop.f32.mrf.mxu1 }
 0x766   : > { %v7742_v58 = vpop.f32.mrf.mxu0 }
 0x767   : > { %v2835_v24 = vmax.f32 %v2833_v7, %v7742_v58 }
 0x768   : > { %v7740_v0 = vpop.f32.mrf.mxu1 }
 0x76e   : > { %v7752_v42 = vpop.f32.mrf.mxu0 }
 0x76f   : > { %v2836_v21 = vmax.f32 %v2834_v18, %v7752_v42  ;;  %v2849_v18 = vmax.f32 %v2847_v38, %v7642_v47 }
 0x770   : > { %v7750_v36 = vpop.f32.mrf.mxu1 }
 0x771   : > { %9542 = vst [vmem:[#allocation12_spill] sm:$0xff] %v7750_v36 }
 0x776   : > { %v2713_v20 = vpop.f32.mrf.mxu0 }
 0x777   : > { %v2837_v11 = vmax.f32 %v2835_v24, %v2713_v20  ;;  %v2852_v24 = vmax.f32 %v2850_v52, %v7660_v59 }
 0x778   : > { %v7762_v44 = vpop.f32.mrf.mxu1 }
 0x779   : > { %9543 = vst [vmem:[#allocation6_spill] sm:$0xff] %v7762_v44 }
 0x77e   : > { %v7772_v45 = vpop.f32.mrf.mxu0 }
 0x77f   : > { %v2838_v34 = vmax.f32 %v2836_v21, %v7772_v45 }
 0x780   : > { %v7776_v13 = vpop.f32.mrf.mxu1 }
 0x781   : > { %9544 = vst [vmem:[#allocation8_spill] sm:$0xff] %v7776_v13 }
 0x786   : > { %v2718_v54 = vpop.f32.mrf.mxu0 }
 0x787   : > { %v2839_v60 = vmax.f32 %v2837_v11, %v2718_v54  ;;  %v2851_v11 = vmax.f32 %v2849_v18, %v7654_v23 }
 0x788   : > { %v7784_v6 = vpop.f32.mrf.mxu1 }
 0x789   : > { %9545 = vst [vmem:[#allocation35_spill] sm:$0xff] %v7784_v6  ;;  %v2840_v39 = vmax.f32 %v2838_v34, %v2839_v60  ;;  %v2854_v60 = vmax.f32 %v2852_v24, %v7672_v4 }
 0x78b   : > { %v2841_v40 = vrot.slane %v2840_v39, 4 }
 0x78d   : > { %v2842_v41 = vmax.f32 %v2840_v39, %v2841_v40  ;;  %v2853_v40 = vmax.f32 %v2851_v11, %v7666_v28  ;;  %v2856_v39 = vmax.f32 %v2854_v60, %v7684_v53 }
 0x78f   : > { %v2843_v7 = vrot.slane %v2842_v41, 2  ;;  %v2855_v29 = vmax.f32 %v2853_v40, %v7678_v2  ;;  %v2858_v62 = vmax.f32 %v2856_v39, %v7695_v10 }
 0x790   : > { %v7793_v21 = vpop.f32.mrf.mxu1 }
 0x791   : > { %9546 = vst [vmem:[#allocation39_spill] sm:$0xff] %v7793_v21  ;;  %v2844_v34 = vmax.f32 %v2842_v41, %v2843_v7  ;;  %v2857_v38 = vmax.f32 %v2855_v29, %v7689_v63  ;;  %v2860_v52 = vmax.f32 %v2858_v62, %v7704_v1 }
 0x793   : > { %v2845_v17 = vrot.slane %v2844_v34, 1  ;;  %v2859_v59 = vmax.f32 %v2857_v38, %v7699_v30  ;;  %v2862_v18 = vmax.f32 %v2860_v52, %v7712_v50 }
 0x795   : > { %v7805_v23 = vmax.f32 %v2844_v34, %v2845_v17  ;;  %v2861_v7 = vmax.f32 %v2859_v59, %v7708_v27  ;;  %v2864_v24 = vmax.f32 %v2862_v18, %v7720_v25 }
 0x797   : > { %v2863_v11 = vmax.f32 %v2861_v7, %v7716_v37  ;;  %v2866_v60 = vmax.f32 %v2864_v24, %v7728_v19  ;;  %v2936_v29 = vsub.f32 %v7738_v22, %v7805_v23  ;;  %v2938_v40 = vsub.f32 %v7742_v58, %v7805_v23 }
 0x798   : > { %v7807_v41 = vpop.f32.mrf.mxu1  ;;  %v2940_v17 = vsub.f32 %v7752_v42, %v7805_v23  ;;  %v2942_v34 = vsub.f32 %v2713_v20, %v7805_v23 }
 0x799   : > { %v2865_v39 = vmax.f32 %v2863_v11, %v7724_v31  ;;  %v2868_v59 = vmax.f32 %v2866_v60, %v7736_v48  ;;  %v7824_v52 = vpack.c.bf16 %v2938_v40, %v2936_v29 }
 0x79a   : > { %v7826_v18 = vpack.c.bf16 %v2942_v34, %v2940_v17  ;;  %v2944_v34 = vsub.f32 %v7772_v45, %v7805_v23  ;;  %v2886_v45 = vsub.f32 %v7610_v57, %v7805_v23  ;;  %v2900_v57 = vsub.f32 %v7650_v49, %v7805_v23 }
 0x79b   : > { %v2867_v62 = vmax.f32 %v2865_v39, %v7732_v26  ;;  %v2870_v38 = vmax.f32 %v2868_v59, %v7750_v36  ;;  %v2946_v39 = vsub.f32 %v2718_v54, %v7805_v23  ;;  %v9553_v54 = vld [vmem:[#allocation88_spill] sm:$0xff] }
 0x79d   : > { %v2869_v22 = vmax.f32 %v2867_v62, %v7740_v0  ;;  %v2872_v58 = vmax.f32 %v2870_v38, %v7776_v13  ;;  %v2978_v62 = vpack.c.bf16 %v2946_v39, %v2944_v34  ;;  %v9548_v13 = vld [vmem:[#allocation53_spill] sm:$0xff] }
 0x79f   : > { %v2871_v20 = vmax.f32 %v2869_v22, %v7762_v44  ;;  %v2874_v42 = vmax.f32 %v2872_v58, %v7793_v21  ;;  %v9547_v22 = vld [vmem:[#allocation50_spill] sm:$0xff]  ;;  %v9551_v21 = vld [vmem:[#allocation59_spill] sm:$0xff] }
 0x7a0   : > { %v7830_v7 = vpop.f32.mrf.mxu1  ;;  %v7842_v58 = vpack.c.bf16 %v9548_v13, %v9547_v22  ;;  %v9555_v13 = vld [vmem:[#allocation64_spill] sm:$0xff]  ;;  %v2902_v22 = vsub.f32 %v7656_v43, %v7805_v23  ;;  %v2914_v43 = vsub.f32 %v7691_v55, %v7805_v23  ;;  %v9562_v44 = vld [vmem:[#allocation10_spill] sm:$0xff] }
 0x7a1   : > { %v2873_v24 = vmax.f32 %v2871_v20, %v7784_v6  ;;  %v2876_v11 = vmax.f32 %v2874_v42, %v7830_v7  ;;  %v9550_v20 = vld [vmem:[#allocation56_spill] sm:$0xff]  ;;  %v2892_v34 = vsub.f32 %v9555_v13, %v7805_v23  ;;  %v9557_v13 = vld [vmem:[#allocation34_spill] sm:$0xff]  ;;  %v9561_v6 = vld [vmem:[#allocation33_spill] sm:$0xff] }
 0x7a2   : > { %9549 = vst [vmem:[#allocation11_spill] sm:$0xff] %v7842_v58  ;;  %v7846_v42 = vpack.c.bf16 %v9551_v21, %v9550_v20  ;;  %v9556_v21 = vld [vmem:[#allocation66_spill] sm:$0xff]  ;;  %v2904_v20 = vsub.f32 %v7662_v32, %v7805_v23  ;;  %v2916_v32 = vsub.f32 %v7697_v51, %v7805_v23  ;;  %v9560_v58 = vld [vmem:[#allocation31_spill] sm:$0xff]  ;;  %v2928_v51 = vsub.f32 %v9561_v6, %v7805_v23 }
 0x7a3   : > { %v2875_v60 = vmax.f32 %v2873_v24, %v7807_v41  ;;  %v3040_v24 = vunpack.c.l.bf16 %v2978_v62  ;;  %v2894_v39 = vsub.f32 %v9556_v21, %v7805_v23  ;;  %v2910_v21 = vsub.f32 %v9557_v13, %v7805_v23 }
 0x7a4   : > { %9552 = vst [vmem:[#allocation13_spill] sm:$0xff] %v7846_v42  ;;  %v9558_v42 = vld [vmem:[#allocation85_spill] sm:$0xff]  ;;  %v2926_v55 = vsub.f32 %v9560_v58, %v7805_v23 }
 0x7a5   : > { %v2877_v29 = vmax.f32 %v2875_v60, %v2876_v11  ;;  %v2884_v11 = vsub.f32 %v7605_v33, %v7805_v23  ;;  %v3042_v60 = vunpack.c.h.bf16 %v2978_v62  ;;  %v2898_v62 = vsub.f32 %v7644_v46, %v7805_v23 }
 0x7a6   : > { %v2912_v49 = vsub.f32 %v9558_v42, %v7805_v23 }
 0x7a7   : > { %v2878_v40 = vrot.slane %v2877_v29, 4  ;;  %v3168_v46 = vmul.f32 1.442695, %v3042_v60  ;;  %v9559_v60 = vld [vmem:[#allocation30_spill] sm:$0xff] }
 0x7a8   : > { %v2924_v42 = vsub.f32 %v9559_v60, %v7805_v23  ;;  %v7904_v60 = vpack.c.bf16 %v2894_v39, %v2892_v34 }
 0x7a9   : > { %v2879_v17 = vmax.f32 %v2877_v29, %v2878_v40  ;;  %v2888_v29 = vsub.f32 %v9553_v54, %v7805_v23  ;;  %v9554_v40 = vld [vmem:[#allocation60_spill] sm:$0xff]  ;;  %v3164_v54 = vmul.f32 1.442695, %v3040_v24  ;;  %v2918_v24 = vsub.f32 %v7701_v9, %v7805_v23 }
 0x7aa   : > { %v2930_v9 = vsub.f32 %v9562_v44, %v7805_v23 }
 0x7ab   : > { %v2880_v59 = vrot.slane %v2879_v17, 2  ;;  %5369 = vpow2.f32 %v3164_v54  ;;  %v7912_v54 = vpack.c.bf16 %v2902_v22, %v2900_v57 }
 0x7ac   : > { %5371 = vpow2.f32 %v3168_v46 }
 0x7ad   : > { %v2881_v38 = vmax.f32 %v2879_v17, %v2880_v59  ;;  %v2890_v17 = vsub.f32 %v9554_v40, %v7805_v23  ;;  %v2896_v59 = vsub.f32 %v7638_v3, %v7805_v23  ;;  %v2906_v40 = vsub.f32 %v7668_v56, %v7805_v23 }
 0x7ae   : > { %v2908_v3 = vsub.f32 %v7674_v14, %v7805_v23  ;;  %v2920_v56 = vsub.f32 %v7706_v35, %v7805_v23  ;;  %v2922_v14 = vsub.f32 %v7710_v5, %v7805_v23  ;;  %v2932_v35 = vsub.f32 %v7730_v8, %v7805_v23 }
 0x7af   : > { %v2882_v33 = vrot.slane %v2881_v38, 1  ;;  %v2934_v5 = vsub.f32 %v7734_v61, %v7805_v23  ;;  %v7906_v58 = vpack.c.bf16 %v2898_v62, %v2896_v59  ;;  %v7914_v8 = vpack.c.bf16 %v2906_v40, %v2904_v20 }
 0x7b0   : > { %v7916_v36 = vpack.c.bf16 %v2910_v21, %v2908_v3  ;;  %v7918_v23 = vpack.c.bf16 %v2914_v43, %v2912_v49  ;;  %v7920_v61 = vpack.c.bf16 %v2918_v24, %v2916_v32  ;;  %v2988_v59 = vunpack.c.l.bf16 %v7904_v60 }
 0x7b1   : > { %v7888_v13 = vmax.f32 %v2881_v38, %v2882_v33  ;;  %v2948_v38 = vpack.c.bf16 %v2886_v45, %v2884_v11  ;;  %v7902_v33 = vpack.c.bf16 %v2890_v17, %v2888_v29  ;;  %v7922_v11 = vpack.c.bf16 %v2922_v14, %v2920_v56  ;;  %v7933_v62 = vpop.eup %5369 }
 0x7b2   : > { %v7924_v45 = vpack.c.bf16 %v2926_v55, %v2924_v42  ;;  %v7926_v29 = vpack.c.bf16 %v2930_v9, %v2928_v51  ;;  %v2990_v40 = vunpack.c.h.bf16 %v7904_v60  ;;  %v7940_v3 = vpop.eup %5371  ;;  %v2992_v21 = vunpack.c.l.bf16 %v7906_v58 }
 0x7b3   : > { %v2945_v6 = vsub.f32 %v7807_v41, %v7888_v13  ;;  %v2947_v44 = vsub.f32 %v7830_v7, %v7888_v13  ;;  %v7928_v41 = vpack.c.bf16 %v2934_v5, %v2932_v35  ;;  %v2980_v17 = vunpack.c.l.bf16 %v2948_v38 }
 0x7b4   : > { %v2982_v7 = vunpack.c.h.bf16 %v2948_v38  ;;  %v2984_v34 = vunpack.c.l.bf16 %v7902_v33  ;;  %v2986_v39 = vunpack.c.h.bf16 %v7902_v33  ;;  %v2885_v22 = vsub.f32 %v7618_v12, %v7888_v13  ;;  %v9563_v12 = vld [vmem:[#allocation70_spill] sm:$0xff] }
 0x7b5   : > { %v2979_v57 = vpack.c.bf16 %v2947_v44, %v2945_v6  ;;  %v2887_v20 = vsub.f32 %v7624_v16, %v7888_v13  ;;  %v2994_v46 = vunpack.c.h.bf16 %v7906_v58  ;;  %v2889_v32 = vsub.f32 %v7630_v15, %v7888_v13 }
 0x7b6   : > { %v2891_v24 = vsub.f32 %v9563_v12, %v7888_v13  ;;  %v3000_v16 = vunpack.c.l.bf16 %v7914_v8  ;;  %v3002_v56 = vunpack.c.h.bf16 %v7914_v8  ;;  %v3004_v14 = vunpack.c.l.bf16 %v7916_v36 }
 0x7b7   : > { %v3006_v42 = vunpack.c.h.bf16 %v7916_v36  ;;  %v3008_v55 = vunpack.c.l.bf16 %v7918_v23  ;;  %v3010_v51 = vunpack.c.h.bf16 %v7918_v23  ;;  %v3041_v9 = vunpack.c.l.bf16 %v2979_v57 }
 0x7b8   : > { %v2949_v35 = vpack.c.bf16 %v2887_v20, %v2885_v22  ;;  %v3043_v38 = vunpack.c.h.bf16 %v2979_v57  ;;  %v7961_v6 = vpack.c.bf16 %v2891_v24, %v2889_v32  ;;  %v3044_v15 = vmul.f32 1.442695, %v2980_v17  ;;  %v9568_v57 = vld [vmem:[#allocation6_spill] sm:$0xff] }
 0x7b9   : > { %v3166_v33 = vmul.f32 1.442695, %v3041_v9  ;;  %v3048_v12 = vmul.f32 1.442695, %v2982_v7  ;;  %v3052_v43 = vmul.f32 1.442695, %v2984_v34 }
 0x7ba   : > { %v2981_v5 = vunpack.c.l.bf16 %v2949_v35  ;;  %v3170_v24 = vmul.f32 1.442695, %v3043_v38  ;;  %v2983_v58 = vunpack.c.h.bf16 %v2949_v35  ;;  %v2985_v23 = vunpack.c.l.bf16 %v7961_v6  ;;  %v9564_v38 = vld [vmem:[#allocation73_spill] sm:$0xff] }
 0x7bb   : > { %v3056_v22 = vmul.f32 1.442695, %v2986_v39  ;;  %v7973_v49 = vmul.f32 1.442695, %v2988_v59  ;;  %5373 = vpow2.f32 %v3044_v15  ;;  %v7975_v20 = vmul.f32 1.442695, %v2990_v40 }
 0x7bc   : > { %v7977_v17 = vmul.f32 1.442695, %v2992_v21  ;;  %v7979_v9 = vmul.f32 1.442695, %v2994_v46  ;;  %5375 = vpow2.f32 %v3166_v33  ;;  %v2893_v35 = vsub.f32 %v7642_v47, %v7888_v13  ;;  %v9565_v34 = vld [vmem:[#allocation77_spill] sm:$0xff]  ;;  %v9566_v59 = vld [vmem:[#allocation32_spill] sm:$0xff] }
 0x7bd   : > { %v2895_v7 = vsub.f32 %v9564_v38, %v7888_v13  ;;  %v3046_v60 = vmul.f32 1.442695, %v2981_v5  ;;  %5377 = vpow2.f32 %v3170_v24  ;;  %v2897_v39 = vsub.f32 %v9565_v34, %v7888_v13 }
 0x7be   : > { %v2899_v40 = vsub.f32 %v9566_v59, %v7888_v13  ;;  %v3050_v15 = vmul.f32 1.442695, %v2983_v58  ;;  %v2901_v21 = vsub.f32 %v7666_v28, %v7888_v13  ;;  %v2903_v46 = vsub.f32 %v7672_v4, %v7888_v13  ;;  %v9569_v59 = vld [vmem:[#allocation8_spill] sm:$0xff] }
 0x7bf   : > { %5379 = vpow2.f32 %v3048_v12  ;;  %v3054_v47 = vmul.f32 1.442695, %v2985_v23  ;;  %v2905_v33 = vsub.f32 %v7678_v2, %v7888_v13  ;;  %v2907_v5 = vsub.f32 %v7684_v53, %v7888_v13 }
 0x7c0   : > { %5381 = vpow2.f32 %v3052_v43  ;;  %v3100_v24 = vmul.f32 1.442695, %v3008_v55  ;;  %v2909_v38 = vsub.f32 %v7689_v63, %v7888_v13  ;;  %v2911_v58 = vsub.f32 %v7695_v10, %v7888_v13 }
 0x7c1   : > { %v2913_v28 = vsub.f32 %v7699_v30, %v7888_v13  ;;  %5383 = vpow2.f32 %v3046_v60  ;;  %v8003_v4 = vpop.eup %5373  ;;  %v2915_v2 = vsub.f32 %v7704_v1, %v7888_v13  ;;  %v2917_v53 = vsub.f32 %v7708_v27, %v7888_v13 }
 0x7c2   : > { %5385 = vpow2.f32 %v3050_v15  ;;  %v3104_v43 = vmul.f32 1.442695, %v3010_v51  ;;  %v8009_v55 = vpop.eup %5375  ;;  %v2919_v63 = vsub.f32 %v7712_v50, %v7888_v13  ;;  %v3092_v10 = vmul.f32 1.442695, %v3004_v14 }
 0x7c3   : > { %5387 = vpow2.f32 %v3054_v47  ;;  %v8017_v30 = vpack.c.bf16 %v7940_v3, %v7933_v62  ;;  %v8019_v60 = vpop.eup %5377  ;;  %v2921_v1 = vsub.f32 %v7716_v37, %v7888_v13  ;;  %v3096_v12 = vmul.f32 1.442695, %v3006_v42  ;;  %v9567_v47 = vld [vmem:[#allocation12_spill] sm:$0xff] }
 0x7c4   : > { %5389 = vpow2.f32 %v3100_v24  ;;  %v2953_v42 = vpack.c.bf16 %v2895_v7, %v2893_v35  ;;  %v2955_v36 = vpack.c.bf16 %v2899_v40, %v2897_v39  ;;  %v3088_v35 = vmul.f32 1.442695, %v3002_v56 }
 0x7c5   : > { %v5380_v23 = vpop.eup %5379  ;;  %5391 = vpow2.f32 %v3056_v22  ;;  %3361 = vmatpush.bf16.msra.mxu3 %v8017_v30  ;;  %v3084_v22 = vmul.f32 1.442695, %v3000_v16  ;;  %v2957_v44 = vpack.c.bf16 %v2903_v46, %v2901_v21  ;;  %v2987_v62 = vunpack.c.h.bf16 %v7961_v6 }
 0x7c6   : > { %v5382_v34 = vpop.eup %5381  ;;  %5393 = vpow2.f32 %v3104_v43  ;;  %v9570_v43 = vld [vmem:[#allocation35_spill] sm:$0xff]  ;;  %v8058_v14 = vpack.c.bf16 %v2911_v58, %v2909_v38  ;;  %v2989_v32 = vunpack.c.l.bf16 %v2953_v42  ;;  %v8061_v56 = vpack.c.bf16 %v2915_v2, %v2913_v28 }
 0x7c7   : > { %v8038_v15 = vpop.eup %5383  ;;  %5395 = vpow2.f32 %v3092_v10  ;;  %v2959_v10 = vpack.c.bf16 %v2907_v5, %v2905_v33  ;;  %v2991_v39 = vunpack.c.h.bf16 %v2953_v42  ;;  %v9571_v40 = vunpack.c.l.bf16 %v7912_v54 }
 0x7c8   : > { %v8046_v3 = vpop.eup %5385  ;;  %5397 = vpow2.f32 %v3096_v12  ;;  %v2993_v46 = vunpack.c.l.bf16 %v2955_v36  ;;  %v2995_v6 = vunpack.c.h.bf16 %v2955_v36  ;;  %v2997_v5 = vunpack.c.l.bf16 %v2957_v44 }
 0x7c9   : > { %v8052_v7 = vpop.eup %5387  ;;  %5399 = vpow2.f32 %v7973_v49  ;;  %v3076_v12 = vmul.f32 1.442695, %v9571_v40  ;;  %v9572_v49 = vunpack.c.h.bf16 %v7912_v54  ;;  %v3058_v38 = vmul.f32 1.442695, %v2987_v62 }
 0x7ca   : > { %v5390_v16 = vpop.eup %5389  ;;  %5401 = vpow2.f32 %v7975_v20  ;;  %v2999_v28 = vunpack.c.h.bf16 %v2957_v44  ;;  %v3001_v2 = vunpack.c.l.bf16 %v2959_v10  ;;  %v3062_v42 = vmul.f32 1.442695, %v2989_v32 }
 0x7cb   : > { %v5392_v8 = vpop.eup %5391  ;;  %5403 = vpow2.f32 %v3084_v22  ;;  %v3080_v24 = vmul.f32 1.442695, %v9572_v49  ;;  %v3003_v40 = vunpack.c.h.bf16 %v2959_v10  ;;  %v3005_v36 = vunpack.c.l.bf16 %v8058_v14 }
 0x7cc   : > { %v5394_v21 = vpop.eup %5393  ;;  %5405 = vpow2.f32 %v3088_v35  ;;  %v3066_v54 = vmul.f32 1.442695, %v2991_v39  ;;  %v3070_v62 = vmul.f32 1.442695, %v2993_v46  ;;  %v3007_v32 = vunpack.c.h.bf16 %v8058_v14 }
 0x7cd   : > { %v5396_v33 = vpop.eup %5395  ;;  %5407 = vpow2.f32 %v7977_v17  ;;  %v8068_v20 = vpack.c.bf16 %v5394_v21, %v5390_v16  ;;  %v8073_v17 = vpack.c.bf16 %v5392_v8, %v5382_v34  ;;  %v8076_v16 = vpack.c.bf16 %v5380_v23, %v8003_v4 }
 0x7ce   : > { %v5398_v58 = vpop.eup %5397  ;;  %5409 = vpow2.f32 %v7979_v9  ;;  %v3074_v9 = vmul.f32 1.442695, %v2995_v6  ;;  %v3078_v39 = vmul.f32 1.442695, %v2997_v5  ;;  %v3009_v34 = vunpack.c.l.bf16 %v8061_v56 }
 0x7cf   : > { %v5400_v22 = vpop.eup %5399  ;;  %5411 = vpow2.f32 %v3076_v12  ;;  %3342 = vmatpush.bf16.msra.mxu2 %v8068_v20  ;;  %v8079_v10 = vpack.c.bf16 %v5398_v58, %v5396_v33  ;;  %v3204_v12 = vunpack.c.l.bf16 %v8076_v16  ;;  %v3206_v46 = vunpack.c.h.bf16 %v8076_v16 }
 0x7d0   : > { %v5402_v35 = vpop.eup %5401  ;;  %5413 = vpow2.f32 %v3080_v24  ;;  %v3082_v4 = vmul.f32 1.442695, %v2999_v28  ;;  %v3086_v23 = vmul.f32 1.442695, %v3001_v2  ;;  %v3208_v6 = vunpack.c.l.bf16 %v8073_v17 }
 0x7d1   : > { %v5404_v44 = vpop.eup %5403  ;;  %5415 = vpow2.f32 %v3058_v38  ;;  %v8085_v8 = vpack.c.bf16 %v5402_v35, %v5400_v22  ;;  %v3268_v49 = vadd.f32 %v3206_v46, %v3204_v12  ;;  %v3011_v5 = vunpack.c.h.bf16 %v8061_v56  ;;  %v9573_v22 = vld [vmem:[#allocation39_spill] sm:$0xff] }
 0x7d2   : > { %v5406_v21 = vpop.eup %5405  ;;  %5417 = vpow2.f32 %v3062_v42  ;;  %v3090_v38 = vmul.f32 1.442695, %v3003_v40  ;;  %v3094_v28 = vmul.f32 1.442695, %v3005_v36  ;;  %v3210_v2 = vunpack.c.h.bf16 %v8073_v17 }
 0x7d3   : > { %v5408_v24 = vpop.eup %5407  ;;  %5419 = vpow2.f32 %v3066_v54  ;;  %3343 = vmatpush.bf16.msra.mxu2 %v8079_v10  ;;  %v8089_v58 = vpack.c.bf16 %v5406_v21, %v5404_v44  ;;  %v3269_v54 = vadd.f32 %v3268_v49, %v3208_v6  ;;  %v2943_v35 = vsub.f32 %v9573_v22, %v7888_v13 }
 0x7d4   : > { %v5410_v14 = vpop.eup %5409  ;;  %5421 = vpow2.f32 %v3070_v62  ;;  %v3098_v62 = vmul.f32 1.442695, %v3007_v32  ;;  %v3102_v12 = vmul.f32 1.442695, %v3009_v34  ;;  %v3212_v44 = vunpack.c.l.bf16 %v8085_v8 }
 0x7d5   : > { %v5412_v33 = vpop.eup %5411  ;;  %5423 = vpow2.f32 %v3074_v9  ;;  %v3178_v40 = vpack.c.bf16 %v5410_v14, %v5408_v24  ;;  %v3270_v36 = vadd.f32 %v3269_v54, %v3210_v2  ;;  %v8108_v21 = vpack.c.bf16 %v2919_v63, %v2917_v53 }
 0x7d6   : > { %v5414_v42 = vpop.eup %5413  ;;  %5425 = vpow2.f32 %v3078_v39  ;;  %v3106_v32 = vmul.f32 1.442695, %v3011_v5  ;;  %v9574_v24 = vunpack.c.l.bf16 %v7920_v61  ;;  %v9575_v27 = vsub.f32 %v7720_v25, %v7888_v13 }
 0x7d7   : > { %v8092_v51 = vpop.eup %5415  ;;  %5427 = vpow2.f32 %v3082_v4  ;;  %3344 = vmatpush.bf16.msra.mxu2 %v8089_v58  ;;  %v3180_v39 = vpack.c.bf16 %v5414_v42, %v5412_v33  ;;  %v3214_v4 = vunpack.c.h.bf16 %v8085_v8  ;;  %v9576_v53 = vsub.f32 %v7724_v31, %v7888_v13 }
 0x7d8   : > { %v8097_v56 = vpop.eup %5417  ;;  %5429 = vpow2.f32 %v3086_v23  ;;  %v3108_v34 = vmul.f32 1.442695, %v9574_v24  ;;  %v3271_v23 = vadd.f32 %v3270_v36, %v3212_v44  ;;  %v8123_v50 = vpack.c.bf16 %v9575_v27, %v2921_v1 }
 0x7d9   : > { %v8100_v9 = vpop.eup %5419  ;;  %5431 = vpow2.f32 %v3090_v38  ;;  %v9577_v63 = vsub.f32 %v7728_v19, %v7888_v13  ;;  %v9578_v49 = vunpack.c.h.bf16 %v7920_v61  ;;  %v9579_v37 = vunpack.c.l.bf16 %v7826_v18 }
 0x7da   : > { %v8110_v46 = vpop.eup %5421  ;;  %5433 = vpow2.f32 %v3094_v28  ;;  %v3216_v1 = vunpack.c.l.bf16 %v3178_v40  ;;  %v3272_v38 = vadd.f32 %v3271_v23, %v3214_v4  ;;  %v9580_v31 = vsub.f32 %v7732_v26, %v7888_v13 }
 0x7db   : > { %v8115_v14 = vpop.eup %5423  ;;  %v8131_v6 = vpack.c.bf16 %v9577_v63, %v9576_v53  ;;  %5435 = vpow2.f32 %v3098_v62  ;;  %v3112_v33 = vmul.f32 1.442695, %v9578_v49  ;;  %3345 = vmatpush.bf16.msra.mxu2 %v3180_v39  ;;  %v3156_v25 = vmul.f32 1.442695, %v9579_v37 }
 0x7dc   : > { %v8135_v5 = vpop.eup %5425  ;;  %5437 = vpow2.f32 %v3102_v12  ;;  %v9581_v19 = vsub.f32 %v7736_v48, %v7888_v13  ;;  %v9582_v61 = vsub.f32 %v7740_v0, %v7888_v13  ;;  %v9583_v2 = vsub.f32 %v9567_v47, %v7888_v13 }
 0x7dd   : > { %v8139_v42 = vpop.eup %5427  ;;  %5439 = vpow2.f32 %v3106_v32  ;;  %v9584_v22 = vunpack.c.l.bf16 %v7922_v11  ;;  %v9585_v26 = vunpack.c.h.bf16 %v7826_v18  ;;  %v3218_v44 = vunpack.c.h.bf16 %v3178_v40 }
 0x7de   : > { %v8147_v28 = vpack.c.bf16 %v9581_v19, %v9580_v31  ;;  %v8155_v54 = vpack.c.bf16 %v9583_v2, %v9582_v61  ;;  %v8159_v12 = vpop.eup %5429  ;;  %5441 = vpow2.f32 %v3108_v34  ;;  %v3273_v36 = vadd.f32 %v3272_v38, %v3216_v1 }
 0x7df   : > { %v3116_v62 = vmul.f32 1.442695, %v9584_v22  ;;  %v3160_v48 = vmul.f32 1.442695, %v9585_v26  ;;  %v8163_v24 = vpop.eup %5431  ;;  %v9586_v0 = vsub.f32 %v9568_v57, %v7888_v13  ;;  %v9587_v47 = vsub.f32 %v9569_v59, %v7888_v13  ;;  %3346 = vmatpush.bf16.msra.mxu2 %v3178_v40 }
 0x7e0   : > { %v9588_v4 = vsub.f32 %v9570_v43, %v7888_v13  ;;  %5443 = vpow2.f32 %v3112_v33  ;;  %v9589_v18 = vunpack.c.l.bf16 %v7824_v52  ;;  %v8180_v27 = vpop.eup %5433  ;;  %v9590_v53 = vunpack.c.h.bf16 %v7824_v52 }
 0x7e1   : > { %v8171_v32 = vpack.c.bf16 %v9587_v47, %v9586_v0  ;;  %5445 = vpow2.f32 %v3156_v25  ;;  %v3220_v63 = vunpack.c.l.bf16 %v3180_v39  ;;  %v3274_v59 = vadd.f32 %v3273_v36, %v3218_v44  ;;  %v8184_v49 = vpop.eup %5435 }
 0x7e2   : > { %v8176_v23 = vpack.c.bf16 %v2943_v35, %v9588_v4  ;;  %v3148_v34 = vmul.f32 1.442695, %v9589_v18  ;;  %v3152_v57 = vmul.f32 1.442695, %v9590_v53  ;;  %v3013_v37 = vunpack.c.l.bf16 %v8108_v21  ;;  %v5438_v33 = vpop.eup %5437 }
 0x7e3   : > { %v3015_v13 = vunpack.c.h.bf16 %v8108_v21  ;;  %5447 = vpow2.f32 %v3116_v62  ;;  %v9591_v43 = vunpack.c.h.bf16 %v7922_v11  ;;  %v9592_v40 = vunpack.c.l.bf16 %v7924_v45  ;;  %v5440_v25 = vpop.eup %5439  ;;  %3347 = vmatpush.bf16.msra.mxu2 %v8085_v8 }
 0x7e4   : > { %5449 = vpow2.f32 %v3160_v48  ;;  %v3222_v52 = vunpack.c.h.bf16 %v3180_v39  ;;  %v3275_v38 = vadd.f32 %v3274_v59, %v3220_v63  ;;  %v3017_v31 = vunpack.c.l.bf16 %v8123_v50  ;;  %v5442_v11 = vpop.eup %5441 }
 0x7e5   : > { %v3120_v35 = vmul.f32 1.442695, %v9591_v43  ;;  %v3124_v1 = vmul.f32 1.442695, %v9592_v40  ;;  %v3019_v19 = vunpack.c.h.bf16 %v8123_v50  ;;  %v9593_v61 = vunpack.c.l.bf16 %v7928_v41 }
 0x7e6   : > { %5451 = vpow2.f32 %v3148_v34  ;;  %v9594_v22 = vunpack.c.h.bf16 %v7928_v41  ;;  %v3224_v26 = vunpack.c.l.bf16 %v8089_v58  ;;  %v3276_v39 = vadd.f32 %v3275_v38, %v3222_v52  ;;  %v5444_v48 = vpop.eup %5443 }
 0x7e7   : > { %v3140_v2 = vmul.f32 1.442695, %v9593_v61  ;;  %5453 = vpow2.f32 %v3152_v57  ;;  %v3021_v44 = vunpack.c.l.bf16 %v8131_v6  ;;  %v8203_v36 = vpack.c.bf16 %v8092_v51, %v8052_v7  ;;  %v5446_v8 = vpop.eup %5445  ;;  %3348 = vmatpush.bf16.msra.mxu2 %v8073_v17 }
 0x7e8   : > { %v3144_v62 = vmul.f32 1.442695, %v9594_v22  ;;  %5455 = vpow2.f32 %v3120_v35  ;;  %v8207_v0 = vpack.c.bf16 %v8046_v3, %v8038_v15  ;;  %v9595_v41 = vunpack.c.h.bf16 %v7924_v45 }
 0x7e9   : > { %5457 = vpow2.f32 %v3124_v1  ;;  %v3226_v4 = vunpack.c.h.bf16 %v8089_v58  ;;  %v3277_v18 = vadd.f32 %v3276_v39, %v3224_v26  ;;  %v5448_v34 = vpop.eup %5447  ;;  %v9596_v53 = vunpack.c.l.bf16 %v7926_v29 }
 0x7ea   : > { %v3128_v47 = vmul.f32 1.442695, %v9595_v41  ;;  %5459 = vpow2.f32 %v3140_v2  ;;  %v3205_v51 = vunpack.c.l.bf16 %v8207_v0  ;;  %v3207_v3 = vunpack.c.h.bf16 %v8207_v0  ;;  %v5450_v15 = vpop.eup %5449 }
 0x7eb   : > { %v3132_v57 = vmul.f32 1.442695, %v9596_v53  ;;  %v9597_v7 = vunpack.c.h.bf16 %v7926_v29  ;;  %5461 = vpow2.f32 %v3144_v62  ;;  %v3228_v45 = vunpack.c.l.bf16 %v8079_v10  ;;  %3349 = vmatpush.bf16.msra.mxu2 %v8076_v16 }
 0x7ec   : > { %v3278_v58 = vadd.f32 %v3277_v18, %v3226_v4  ;;  %v5452_v59 = vpop.eup %5451  ;;  %v8220_v43 = vpack.c.bf16 %v5450_v15, %v5446_v8  ;;  %v8224_v35 = vpack.c.bf16 %v8100_v9, %v8097_v56  ;;  %v3209_v17 = vunpack.c.l.bf16 %v8203_v36 }
 0x7ed   : > { %v3136_v63 = vmul.f32 1.442695, %v9597_v7  ;;  %v3305_v40 = vadd.f32 %v3207_v3, %v3205_v51  ;;  %v5454_v1 = vpop.eup %5453  ;;  %5463 = vpow2.f32 %v3128_v47  ;;  %v3230_v52 = vunpack.c.h.bf16 %v8079_v10 }
 0x7ee   : > { %v3279_v29 = vadd.f32 %v3278_v58, %v3228_v45  ;;  %v8228_v38 = vpack.c.bf16 %v5440_v25, %v5438_v33  ;;  %v5456_v61 = vpop.eup %5455  ;;  %v3023_v2 = vunpack.c.h.bf16 %v8131_v6  ;;  %5465 = vpow2.f32 %v3132_v57  ;;  %3362 = vmatpush.bf16.msra.mxu3 %v8220_v43 }
 0x7ef   : > { %v3211_v56 = vunpack.c.h.bf16 %v8203_v36  ;;  %v3306_v9 = vadd.f32 %v3305_v40, %v3209_v17  ;;  %v5458_v22 = vpop.eup %5457  ;;  %5467 = vpow2.f32 %v3136_v63  ;;  %v3232_v62 = vunpack.c.l.bf16 %v8068_v20 }
 0x7f0   : > { %v8235_v26 = vpack.c.bf16 %v5444_v48, %v5442_v11  ;;  %v3280_v10 = vadd.f32 %v3279_v29, %v3230_v52  ;;  %3380 = vmatpush.bf16.msrb.mxu2 %v8228_v38  ;;  %v5460_v33 = vpop.eup %5459  ;;  %v8238_v25 = vpack.c.bf16 %v5454_v1, %v5452_v59  ;;  %v8242_v39 = vpack.c.bf16 %v8115_v14, %v8110_v46  ;;  %v9598_v48 = vld [vmem:[#allocation11_spill] sm:$0xff] }
 0x7f1   : > { %v3213_v16 = vunpack.c.l.bf16 %v8224_v35  ;;  %v3307_v8 = vadd.f32 %v3306_v9, %v3211_v56  ;;  %v5462_v41 = vpop.eup %5461  ;;  %v3025_v47 = vunpack.c.l.bf16 %v8147_v28  ;;  %v3234_v4 = vunpack.c.h.bf16 %v8068_v20  ;;  %3350 = vmatmul.bf16.vlgmr.msra.gmra.mxu2 %v9598_v48 }
 0x7f2   : > { %v3281_v11 = vadd.f32 %v3280_v10, %v3232_v62  ;;  %v8250_v18 = vpack.c.bf16 %v8184_v49, %v8180_v27  ;;  %v3027_v53 = vunpack.c.h.bf16 %v8147_v28  ;;  %v3029_v46 = vunpack.c.l.bf16 %v8155_v54  ;;  %3363 = vmatpush.bf16.msra.mxu3 %v8238_v25 }
 0x7f3   : > { %v3215_v14 = vunpack.c.h.bf16 %v8224_v35  ;;  %v3308_v57 = vadd.f32 %v3307_v8, %v3213_v16  ;;  %v5464_v51 = vpop.eup %5463  ;;  %v3031_v3 = vunpack.c.h.bf16 %v8155_v54  ;;  %v8257_v20 = vpack.c.bf16 %v5456_v61, %v5448_v34 }
 0x7f4   : > { %v3236_v15 = vunpack.c.l.bf16 %v8235_v26  ;;  %v3282_v7 = vadd.f32 %v3281_v11, %v3234_v4  ;;  %3381 = vmatpush.bf16.msrb.mxu2 %v8250_v18  ;;  %v5466_v27 = vpop.eup %5465  ;;  %v8261_v49 = vpack.c.bf16 %v5462_v41, %v5460_v33  ;;  %v3181_v63 = vpack.c.bf16 %v8139_v42, %v8135_v5 }
 0x7f5   : > { %v3217_v45 = vunpack.c.l.bf16 %v8242_v39  ;;  %v3309_v58 = vadd.f32 %v3308_v57, %v3215_v14  ;;  %v5468_v59 = vpop.eup %5467  ;;  %v3033_v17 = vunpack.c.l.bf16 %v8171_v32  ;;  %v3238_v34 = vunpack.c.h.bf16 %v8235_v26 }
 0x7f6   : > { %v3283_v40 = vadd.f32 %v3282_v7, %v3236_v15  ;;  %v3183_v1 = vpack.c.bf16 %v8163_v24, %v8159_v12  ;;  %v3037_v52 = vunpack.c.l.bf16 %v8176_v23  ;;  %v3110_v29 = vmul.f32 1.442695, %v3013_v37  ;;  %3364 = vmatpush.bf16.msra.mxu3 %v8261_v49 }
 0x7f7   : > { %v3219_v5 = vunpack.c.h.bf16 %v8242_v39  ;;  %v3310_v42 = vadd.f32 %v3309_v58, %v3217_v45  ;;  %v3114_v61 = vmul.f32 1.442695, %v3015_v13  ;;  %v3192_v56 = vpack.c.bf16 %v5464_v51, %v5458_v22 }
 0x7f8   : > { %v3240_v9 = vunpack.c.l.bf16 %v8257_v20  ;;  %v3284_v62 = vadd.f32 %v3283_v40, %v3238_v34  ;;  %3382 = vmatpush.bf16.msrb.mxu2 %v3183_v1  ;;  %v3039_v12 = vunpack.c.h.bf16 %v8176_v23  ;;  %v3194_v24 = vpack.c.bf16 %v5468_v59, %v5466_v27 }
 0x7f9   : > { %v3221_v10 = vunpack.c.l.bf16 %v3181_v63  ;;  %v3311_v33 = vadd.f32 %v3310_v42, %v3219_v5  ;;  %v3035_v37 = vunpack.c.h.bf16 %v8171_v32  ;;  %v3118_v16 = vmul.f32 1.442695, %v3017_v31 }
 0x7fa   : > { %v3242_v8 = vunpack.c.h.bf16 %v8257_v20  ;;  %v3285_v41 = vadd.f32 %v3284_v62, %v3240_v9  ;;  %5469 = vpow2.f32 %v3110_v29  ;;  %v3122_v21 = vmul.f32 1.442695, %v3019_v19  ;;  %3365 = vmatpush.bf16.msra.mxu3 %v3194_v24 }
 0x7fb   : > { %v3223_v13 = vunpack.c.h.bf16 %v3181_v63  ;;  %v3312_v22 = vadd.f32 %v3311_v33, %v3221_v10  ;;  %5471 = vpow2.f32 %v3114_v61  ;;  %v3158_v23 = vmul.f32 1.442695, %v3037_v52  ;;  %v9599_v52 = vld [vmem:[#allocation13_spill] sm:$0xff]  ;;  %v9600_v10 = vld [vmem:[#allocation52_spill] sm:$0xff]  ;;  %v9601_v33 = vld [vmem:[#allocation55_spill] sm:$0xff] }
 0x7fc   : > { %v3244_v4 = vunpack.c.l.bf16 %v3192_v56  ;;  %v3286_v11 = vadd.f32 %v3285_v41, %v3242_v8  ;;  %3383 = vmatpush.bf16.msrb.mxu2 %v3181_v63  ;;  %v3126_v32 = vmul.f32 1.442695, %v3021_v44  ;;  %v3162_v14 = vmul.f32 1.442695, %v3039_v12 }
 0x7fd   : > { %v3225_v31 = vunpack.c.l.bf16 %v3183_v1  ;;  %v3313_v57 = vadd.f32 %v3312_v22, %v3223_v13  ;;  %5473 = vpow2.f32 %v3118_v16  ;;  %v3130_v51 = vmul.f32 1.442695, %v3023_v2 }
 0x7fe   : > { %v3246_v50 = vunpack.c.h.bf16 %v3192_v56  ;;  %v3287_v19 = vadd.f32 %v3286_v11, %v3244_v4  ;;  %5475 = vpow2.f32 %v3122_v21  ;;  %v3134_v15 = vmul.f32 1.442695, %v3025_v47  ;;  %3366 = vmatpush.bf16.msra.mxu3 %v3192_v56  ;;  %v9603_v4 = vld [vmem:[#allocation28_spill] sm:$0xff] }
 0x7ff   : > { %v3227_v7 = vunpack.c.h.bf16 %v3183_v1  ;;  %v3314_v27 = vadd.f32 %v3313_v57, %v3225_v31  ;;  %v3150_v45 = vmul.f32 1.442695, %v3033_v17  ;;  %5477 = vpow2.f32 %v3158_v23  ;;  %v9602_v23 = vld [vmem:[#allocation26_spill] sm:$0xff] }
 0x800   : > { %v3248_v63 = vunpack.c.l.bf16 %v3194_v24  ;;  %v3288_v58 = vadd.f32 %v3287_v19, %v3246_v50  ;;  %3384 = vmatpush.bf16.msrb.mxu2 %v8242_v39  ;;  %v5470_v44 = vpop.eup %5469  ;;  %v3154_v59 = vmul.f32 1.442695, %v3035_v37  ;;  %5479 = vpow2.f32 %v3162_v14 }
 0x801   : > { %v3229_v34 = vunpack.c.l.bf16 %v8250_v18  ;;  %v3315_v6 = vadd.f32 %v3314_v27, %v3227_v7  ;;  %v5472_v2 = vpop.eup %5471  ;;  %5481 = vpow2.f32 %v3126_v32  ;;  %v3138_v47 = vmul.f32 1.442695, %v3027_v53  ;;  %3355 = vmatmul.bf16.gmra.mxu2 %v9599_v52 }
 0x802   : > { %v3250_v40 = vunpack.c.h.bf16 %v3194_v24  ;;  %v3289_v1 = vadd.f32 %v3288_v58, %v3248_v63  ;;  %5483 = vpow2.f32 %v3130_v51  ;;  %v3142_v17 = vmul.f32 1.442695, %v3029_v46  ;;  %3367 = vmatpush.bf16.msra.mxu3 %v8257_v20  ;;  %v9604_v58 = vld [vmem:[#allocation22_spill] sm:$0xff] }
 0x803   : > { %v3231_v39 = vunpack.c.h.bf16 %v8250_v18  ;;  %v3316_v29 = vadd.f32 %v3315_v6, %v3229_v34  ;;  %v5474_v5 = vpop.eup %5473  ;;  %v3146_v42 = vmul.f32 1.442695, %v3031_v3  ;;  %5485 = vpow2.f32 %v3150_v45 }
 0x804   : > { %v3252_v28 = vunpack.c.l.bf16 %v8261_v49  ;;  %v3290_v53 = vadd.f32 %v3289_v1, %v3250_v40  ;;  %3385 = vmatpush.bf16.msrb.mxu2 %v8224_v35  ;;  %v5476_v61 = vpop.eup %5475  ;;  %5487 = vpow2.f32 %v3154_v59  ;;  %v3233_v56 = vunpack.c.l.bf16 %v8228_v38 }
 0x805   : > { %v8303_v46 = vpack.c.bf16 %v5472_v2, %v5470_v44  ;;  %v3317_v20 = vadd.f32 %v3316_v29, %v3231_v39  ;;  %v5478_v9 = vpop.eup %5477  ;;  %5489 = vpow2.f32 %v3134_v15  ;;  %v3254_v18 = vunpack.c.h.bf16 %v8261_v49  ;;  %v9605_v44 = vld [vmem:[#allocation24_spill] sm:$0xff] }
 0x806   : > { %v3291_v62 = vadd.f32 %v3290_v53, %v3252_v28  ;;  %v8308_v54 = vpack.c.bf16 %v8019_v60, %v8009_v55  ;;  %v5480_v3 = vpop.eup %5479  ;;  %5491 = vpow2.f32 %v3138_v47  ;;  %3368 = vmatpush.bf16.msra.mxu3 %v8235_v26  ;;  %v3235_v35 = vunpack.c.h.bf16 %v8228_v38 }
 0x807   : > { %v3318_v12 = vadd.f32 %v3317_v20, %v3233_v56  ;;  %v5482_v24 = vpop.eup %5481  ;;  %v8314_v37 = vpack.c.bf16 %v9601_v33, %v9600_v10  ;;  %5493 = vpow2.f32 %v3142_v17  ;;  %v3256_v49 = vunpack.c.l.bf16 %v8238_v25  ;;  %v9606_v20 = vld [vmem:[#allocation58_spill] sm:$0xff]  ;;  %v3482_v33 = vpop.trf.xlu0 }
 0x808   : > { %v3292_v16 = vadd.f32 %v3291_v62, %v3254_v18  ;;  %3386 = vmatpush.bf16.msrb.mxu2 %v8203_v36  ;;  %v5484_v55 = vpop.eup %5483  ;;  %5495 = vpow2.f32 %v3146_v42  ;;  %v3191_v60 = vpack.c.bf16 %v5476_v61, %v5474_v5  ;;  %v3237_v26 = vunpack.c.l.bf16 %v8303_v46 }
 0x809   : > { %v3319_v38 = vadd.f32 %v3318_v12, %v3235_v35  ;;  %v5486_v8 = vpop.eup %5485  ;;  %v3258_v41 = vunpack.c.h.bf16 %v8238_v25  ;;  %3369 = vmatmul.bf16.vlgmr.msra.gmra.mxu3 %v8314_v37  ;;  %v8322_v13 = vpack.c.bf16 %v5480_v3, %v5478_v9  ;;  %v3464_v11 = vpack.c.bf16 %v9603_v4, %v9602_v23  ;;  %v9607_v9 = vld [vmem:[#allocation62_spill] sm:$0xff]  ;;  %v9610_v23 = vld [vmem:[#allocation23_spill] sm:$0xff] }
 0x80a   : > { %3399 = vmatpush.bf16.msrb.mxu3 %v8308_v54  ;;  %v3293_v21 = vadd.f32 %v3292_v16, %v3256_v49  ;;  %v5488_v22 = vpop.eup %5487  ;;  %v3239_v36 = vunpack.c.h.bf16 %v8303_v46  ;;  %v3260_v31 = vunpack.c.l.bf16 %v8220_v43  ;;  %v3193_v51 = vpack.c.bf16 %v5484_v55, %v5482_v24  ;;  %v9608_v55 = vld [vmem:[#allocation27_spill] sm:$0xff] }
 0x80b   : > { %v3320_v32 = vadd.f32 %v3319_v38, %v3237_v26  ;;  %v5490_v14 = vpop.eup %5489  ;;  %v3241_v50 = vunpack.c.l.bf16 %v3191_v60  ;;  %v3262_v7 = vunpack.c.h.bf16 %v8220_v43  ;;  %v3199_v45 = vpack.c.bf16 %v5488_v22, %v5486_v8  ;;  %v9609_v26 = vld [vmem:[#allocation29_spill] sm:$0xff] }
 0x80c   : > { %v3294_v57 = vadd.f32 %v3293_v21, %v3258_v41  ;;  %3387 = vmatpush.bf16.msrb.mxu2 %v8207_v0  ;;  %v5492_v25 = vpop.eup %5491  ;;  %v3462_v59 = vpack.c.bf16 %v9605_v44, %v9604_v58  ;;  %v3243_v34 = vunpack.c.h.bf16 %v3191_v60  ;;  %v3264_v2 = vunpack.c.l.bf16 %v8017_v30 }
 0x80d   : > { %v3321_v19 = vadd.f32 %v3320_v32, %v3239_v36  ;;  %v5494_v15 = vpop.eup %5493  ;;  %v3195_v47 = vpack.c.bf16 %v5492_v25, %v5490_v14  ;;  %v3245_v40 = vunpack.c.l.bf16 %v3193_v51  ;;  %v3266_v17 = vunpack.c.h.bf16 %v8017_v30 }
 0x80e   : > { %3400 = vmatpush.bf16.msrb.mxu3 %v8322_v13  ;;  %v3295_v27 = vadd.f32 %v3294_v57, %v3260_v31  ;;  %v5496_v63 = vpop.eup %5495  ;;  %v3247_v29 = vunpack.c.h.bf16 %v3193_v51  ;;  %v2559_v18 = vpack.c.bf16 %v9607_v9, %v9606_v20  ;;  %v3259_v24 = vunpack.c.h.bf16 %v3199_v45 }
 0x80f   : > { %v3322_v6 = vadd.f32 %v3321_v19, %v3241_v50  ;;  %v3197_v39 = vpack.c.bf16 %v5496_v63, %v5494_v15  ;;  %v3249_v28 = vunpack.c.l.bf16 %v3195_v47  ;;  %v3251_v61 = vunpack.c.h.bf16 %v3195_v47  ;;  %v8349_v32 = vpop.trf.xlu0 }
 0x810   : > { %3552 = vmatpush.bf16.msra.mxu2 %v3464_v11  ;;  %v3296_v0 = vadd.f32 %v3295_v27, %v3262_v7  ;;  %v3261_v49 = vunpack.c.l.bf16 %v8322_v13  ;;  %v3465_v38 = vpack.c.bf16 %v9609_v26, %v9608_v55  ;;  %v3263_v8 = vunpack.c.h.bf16 %v8322_v13 }
 0x811   : > { %v3323_v1 = vadd.f32 %v3322_v6, %v3243_v34  ;;  %3388 = vmatmul.bf16.vlgmr.msrb.gmra.mxu2 %v9598_v48  ;;  %v3253_v62 = vunpack.c.l.bf16 %v3197_v39  ;;  %v3255_v30 = vunpack.c.h.bf16 %v3197_v39  ;;  %v3257_v48 = vunpack.c.l.bf16 %v3199_v45 }
 0x812   : > { %3401 = vmatpush.bf16.msrb.mxu3 %v3199_v45  ;;  %v3297_v43 = vadd.f32 %v3296_v0, %v3264_v2  ;;  %v3265_v21 = vunpack.c.l.bf16 %v8308_v54  ;;  %v3267_v11 = vunpack.c.h.bf16 %v8308_v54 }
 0x813   : > { %v3324_v5 = vadd.f32 %v3323_v1, %v3245_v40 }
 0x814   : > { %3553 = vmatpush.bf16.msra.mxu2 %v3462_v59  ;;  %v3298_v42 = vadd.f32 %v3297_v43, %v3266_v17 }
 0x815   : > { %v3325_v53 = vadd.f32 %v3324_v5, %v3247_v29 }
 0x816   : > { %3402 = vmatpush.bf16.msrb.mxu3 %v3197_v39  ;;  %v3299_v19 = vrot.slane %v3298_v42, 4 }
 0x817   : > { %v3326_v56 = vadd.f32 %v3325_v53, %v3249_v28  ;;  %v3484_v13 = vpop.trf.xlu0 }
 0x818   : > { %v3300_v27 = vadd.f32 %v3299_v19, %v3298_v42 }
 0x819   : > { %v3327_v3 = vadd.f32 %v3326_v56, %v3251_v61  ;;  %3374 = vmatmul.bf16.gmra.mxu3 %v2559_v18 }
 0x81a   : > { %3403 = vmatpush.bf16.msrb.mxu3 %v3195_v47  ;;  %v3301_v58 = vrot.slane %v3300_v27, 2 }
 0x81b   : > { %v3328_v35 = vadd.f32 %v3327_v3, %v3253_v62 }
 0x81c   : > { %v3302_v34 = vadd.f32 %v3301_v58, %v3300_v27 }
 0x81d   : > { %v3329_v12 = vadd.f32 %v3328_v35, %v3255_v30 }
 0x81e   : > { %3404 = vmatpush.bf16.msrb.mxu3 %v3193_v51  ;;  %v3303_v2 = vrot.slane %v3302_v34, 1 }
 0x81f   : > { %v3330_v10 = vadd.f32 %v3329_v12, %v3257_v48 }
 0x820   : > { %v3304_v17 = vadd.f32 %v3303_v2, %v3302_v34 }
 0x821   : > { %v3331_v16 = vadd.f32 %v3330_v10, %v3259_v24  ;;  %3393 = vmatmul.bf16.gmra.mxu2 %v9599_v52 }
 0x822   : > { %3405 = vmatpush.bf16.msrb.mxu3 %v3191_v60  ;;  %v9611_v60 = vld [vmem:[#allocation25_spill] sm:$0xff]  ;;  %5497 = vrcp.f32 %v3304_v17  ;;  %vm3423_vm4 = vweird.f32 %v3304_v17  ;;  %v3429_v10 = vand.u32 2147483648, %v3304_v17 }
 0x823   : > { %v3332_v41 = vadd.f32 %v3331_v16, %v3261_v49  ;;  %v3463_v4 = vpack.c.bf16 %v9611_v60, %v9610_v23  ;;  %v3427_v16 = vand.u32 2147483647, %v3304_v17 }
 0x825   : > { %v3333_v22 = vadd.f32 %v3332_v41, %v3263_v8  ;;  %v3430_v41 = vor.u32 1.1754944e-38, %v3429_v10  ;;  %vm3428_vm8 = vcmp.eq.f32.partialorder %v3427_v16, 8.507059e+37 }
 0x826   : > { %3406 = vmatpush.bf16.msrb.mxu3 %v8303_v46  ;;  %v8352_v46 = vpop.trf.xlu0 }
 0x827   : > { %v3334_v36 = vadd.f32 %v3333_v22, %v3265_v21 }
 0x828   : > { %v5498_v42 = vpop.eup %5497 }
 0x829   : > { %v3335_v52 = vadd.f32 %v3334_v36, %v3267_v11  ;;  %3407 = vmatmul.bf16.vlgmr.msrb.gmra.mxu3 %v8314_v37  ;;  %v3419_v53 = vmul.f32 %v5498_v42, %v3304_v17  ;;  %vm3424_vm2 = vweird.f32 %v5498_v42 }
 0x82a   : > { %3641 = vmatpush.bf16.msra.mxu3 %v3465_v38  ;;  %vm8383_vm5 = vmor %vm3423_vm4, %vm3424_vm2 }
 0x82b   : > { %v3336_v15 = vrot.slane %v3335_v52, 4 }
 0x82d   : > { %v3337_v45 = vadd.f32 %v3336_v15, %v3335_v52 }
 0x82e   : > { %3642 = vmatpush.bf16.msra.mxu3 %v3463_v4  ;;  %v3486_v14 = vpop.trf.xlu0 }
 0x82f   : > { %v3338_v44 = vrot.slane %v3337_v45, 2 }
 0x831   : > { %4899 = vmatmul.msk.bf16.vlgmr.msra.gmra.mxu2 %vm389_vm0, %v3482_v33  ;;  %v3339_v6 = vadd.f32 %v3338_v44, %v3337_v45 }
 0x833   : > { %v3340_v47 = vrot.slane %v3339_v6, 1 }
 0x835   : > { %v3341_v39 = vadd.f32 %v3340_v47, %v3339_v6 }
 0x836   : > { %v8356_v31 = vpop.trf.xlu0 }
 0x837   : > { %5499 = vrcp.f32 %v3341_v39  ;;  %vm3438_vm6 = vweird.f32 %v3341_v39  ;;  %v3442_v55 = vand.u32 2147483647, %v3341_v39 }
 0x839   : > { %3412 = vmatmul.bf16.gmra.mxu3 %v2559_v18  ;;  %v3420_v18 = vsub.f32 1.0, %v3419_v53  ;;  %vm3443_vm9 = vcmp.eq.f32.partialorder %v3442_v55, 8.507059e+37 }
 0x83b   : > { %v3421_v3 = vmul.f32 %v5498_v42, %v3420_v18 }
 0x83d   : > { %v5500_v28 = vpop.eup %5499  ;;  %v3422_v12 = vadd.f32 %v5498_v42, %v3421_v3 }
 0x83e   : > { %v3488_v54 = vpop.trf.xlu0  ;;  %v3434_v61 = vmul.f32 %v5500_v28, %v3341_v39  ;;  %vm3439_vm3 = vweird.f32 %v5500_v28 }
 0x83f   : > { %vm3440_vm7 = vmor %vm3438_vm6, %vm3439_vm3  ;;  %v3426_v38 = vsel %vm8383_vm5, %v5498_v42, %v3422_v12 }
 0x840   : > { %v3435_v62 = vsub.f32 1.0, %v3434_v61  ;;  %v3431_v4 = vsel %vm3428_vm8, %v3430_v41, %v3426_v38 }
 0x841   : > { %4900 = vmatmul.msk.bf16.gmra.mxu2 %vm389_vm0, %v3484_v13 }
 0x842   : > { %v3436_v30 = vmul.f32 %v5500_v28, %v3435_v62 }
 0x844   : > { %v3437_v24 = vadd.f32 %v5500_v28, %v3436_v30 }
 0x846   : > { %v8360_v37 = vpop.trf.xlu0  ;;  %v3441_v8 = vsel %vm3440_vm7, %v5500_v28, %v3437_v24 }
 0x849   : > { %4915 = vmatmul.msk.bf16.vlgmr.msra.gmra.mxu3 %vm389_vm0, %v3482_v33  ;;  %v3444_v33 = vand.u32 2147483648, %v3341_v39 }
 0x84b   : > { %v3445_v22 = vor.u32 1.1754944e-38, %v3444_v33 }
 0x84d   : > { %v3446_v11 = vsel %vm3443_vm9, %v3445_v22, %v3441_v8 }
 0x84e   : > { %v3490_v57 = vpop.trf.xlu0 }
 0x851   : > { %4901 = vmatmul.msk.bf16.gmra.mxu2 %vm389_vm0, %v3486_v14 }
 0x856   : > { %v8364_v25 = vpop.trf.xlu0 }
 0x859   : > { %4916 = vmatmul.msk.bf16.gmra.mxu3 %vm389_vm0, %v3484_v13 }
 0x85e   : > { %v3492_v50 = vpop.trf.xlu0 }
 0x861   : > { %4902 = vmatmul.msk.bf16.gmra.mxu2 %vm389_vm0, %v3488_v54 }
 0x866   : > { %v8370_v63 = vpop.trf.xlu0 }
 0x869   : > { %4917 = vmatmul.msk.bf16.gmra.mxu3 %vm389_vm0, %v3486_v14 }
 0x86e   : > { %v3494_v0 = vpop.trf.xlu0 }
 0x871   : > { %4903 = vmatmul.msk.bf16.gmra.mxu2 %vm389_vm0, %v3490_v57 }
 0x874   : > { %v3351_v51 = vpop.f32.mrf.mxu2 }
 0x876   : > { %v8379_v43 = vpop.trf.xlu0 }
 0x879   : > { %4918 = vmatmul.msk.bf16.gmra.mxu3 %vm389_vm0, %v3488_v54 }
 0x87c   : > { %v8368_v7 = vpop.f32.mrf.mxu2 }
 0x87e   : > { %v3496_v9 = vpop.trf.xlu0 }
 0x881   : > { %4904 = vmatmul.msk.bf16.gmra.mxu2 %vm389_vm0, %v3492_v50 }
 0x884   : > { %v8373_v59 = vpop.f32.mrf.mxu2 }
 0x886   : > { %v3497_v10 = vpop.trf.xlu0 }
 0x889   : > { %4919 = vmatmul.msk.bf16.gmra.mxu3 %vm389_vm0, %v3490_v57 }
 0x88c   : > { %v3370_v40 = vpop.f32.mrf.mxu3  ;;  %v8376_v1 = vpop.f32.mrf.mxu2 }
 0x88d   : > { %v3371_v26 = vadd.f32 %v3370_v40, %v3351_v51 }
 0x88f   : > { %v3432_v36 = vmul.f32 %v3431_v4, %v3371_v26 }
 0x891   : > { %4905 = vmatmul.msk.bf16.gmra.mxu2 %vm389_vm0, %v3494_v0 }
 0x894   : > { %v3372_v29 = vpop.f32.mrf.mxu3  ;;  %v3389_v5 = vpop.f32.mrf.mxu2 }
 0x895   : > { %v3373_v14 = vadd.f32 %v3372_v29, %v8368_v7 }
 0x899   : > { %4920 = vmatmul.msk.bf16.gmra.mxu3 %vm389_vm0, %v3492_v50  ;;  %v3448_v50 = vmul.f32 %v3431_v4, %v3373_v14 }
 0x89c   : > { %v3375_v56 = vpop.f32.mrf.mxu3  ;;  %v3391_v20 = vpop.f32.mrf.mxu2 }
 0x89d   : > { %v3376_v27 = vadd.f32 %v3375_v56, %v8373_v59 }
 0x89f   : > { %v3450_v34 = vmul.f32 %v3431_v4, %v3376_v27 }
 0x8a1   : > { %4906 = vmatmul.msk.bf16.gmra.mxu2 %vm389_vm0, %v3496_v9 }
 0x8a4   : > { %v3377_v35 = vpop.f32.mrf.mxu3  ;;  %v3394_v48 = vpop.f32.mrf.mxu2 }
 0x8a5   : > { %v3378_v2 = vadd.f32 %v3377_v35, %v8376_v1 }
 0x8a7   : > { %v3452_v17 = vmul.f32 %v3431_v4, %v3378_v2 }
 0x8a9   : > { %4921 = vmatmul.msk.bf16.gmra.mxu3 %vm389_vm0, %v3494_v0 }
 0x8ac   : > { %v3408_v21 = vpop.f32.mrf.mxu3  ;;  %v3396_v23 = vpop.f32.mrf.mxu2 }
 0x8ad   : > { %v3409_v60 = vadd.f32 %v3408_v21, %v3389_v5 }
 0x8af   : > { %v3447_v52 = vmul.f32 %v3446_v11, %v3409_v60 }
 0x8b1   : > { %v3454_v13 = vpack.c.bf16 %v3447_v52, %v3432_v36  ;;  %4907 = vmatmul.msk.bf16.gmra.mxu2 %vm389_vm0, %v8349_v32 }
 0x8b3   : > { %3458 = vst [vmem:[#allocation2 + $0x40] sm:$0xff] %v3454_v13 }
 0x8b4   : > { %v3410_v54 = vpop.f32.mrf.mxu3  ;;  %v8393_v57 = vpop.f32.mrf.mxu2 }
 0x8b5   : > { %v3411_v51 = vadd.f32 %v3410_v54, %v3391_v20 }
 0x8b7   : > { %v3449_v19 = vmul.f32 %v3446_v11, %v3411_v51 }
 0x8b9   : > { %v3455_v15 = vpack.c.bf16 %v3449_v19, %v3448_v50  ;;  %4922 = vmatmul.msk.bf16.gmra.mxu3 %vm389_vm0, %v3496_v9 }
 0x8bb   : > { %3459 = vst [vmem:[#allocation2 + $0x48] sm:$0xff] %v3455_v15 }
 0x8bc   : > { %v3413_v45 = vpop.f32.mrf.mxu3  ;;  %v8397_v58 = vpop.f32.mrf.mxu2 }
 0x8bd   : > { %v3414_v44 = vadd.f32 %v3413_v45, %v3394_v48 }
 0x8bf   : > { %v3451_v6 = vmul.f32 %v3446_v11, %v3414_v44 }
 0x8c1   : > { %v3456_v7 = vpack.c.bf16 %v3451_v6, %v3450_v34  ;;  %4908 = vmatmul.msk.bf16.gmra.mxu2 %vm389_vm0, %v8352_v46 }
 0x8c3   : > { %3460 = vst [vmem:[#allocation2 + $0x50] sm:$0xff] %v3456_v7 }
 0x8c4   : > { %v3415_v0 = vpop.f32.mrf.mxu3  ;;  %v8402_v47 = vpop.f32.mrf.mxu2 }
 0x8c5   : > { %v3416_v40 = vadd.f32 %v3415_v0, %v3396_v23  ;;  %v3724_v44 = vmax.f32 %v8393_v57, %v8402_v47 }
 0x8c7   : > { %v3453_v59 = vmul.f32 %v3446_v11, %v3416_v40 }
 0x8c9   : > { %v3457_v39 = vpack.c.bf16 %v3453_v59, %v3452_v17  ;;  %4923 = vmatmul.msk.bf16.gmra.mxu3 %vm389_vm0, %v8349_v32 }
 0x8cb   : > { %3461 = vst [vmem:[#allocation2 + $0x58] sm:$0xff] %v3457_v39 }
 0x8cc   : > { %v8406_v29 = vpop.f32.mrf.mxu3  ;;  %v8408_v5 = vpop.f32.mrf.mxu2 }
 0x8cd   : > { %9614 = vst [vmem:[#allocation7_spill] sm:$0xff] %v8408_v5  ;;  %v3725_v34 = vmax.f32 %v8397_v58, %v8408_v5 }
 0x8d1   : > { %4909 = vmatmul.msk.bf16.gmra.mxu2 %vm389_vm0, %v8356_v31 }
 0x8d4   : > { %v8412_v1 = vpop.f32.mrf.mxu3  ;;  %v8414_v42 = vpop.f32.mrf.mxu2 }
 0x8d5   : > { %9615 = vst [vmem:[#allocation9_spill] sm:$0xff] %v8414_v42  ;;  %v3726_v6 = vmax.f32 %v3724_v44, %v8414_v42 }
 0x8d9   : > { %4924 = vmatmul.msk.bf16.gmra.mxu3 %vm389_vm0, %v8352_v46 }
 0x8dc   : > { %v8418_v28 = vpop.f32.mrf.mxu3  ;;  %v8420_v53 = vpop.f32.mrf.mxu2 }
 0x8dd   : > { %9616 = vst [vmem:[#allocation67_spill] sm:$0xff] %v8420_v53  ;;  %v3727_v7 = vmax.f32 %v3725_v34, %v8420_v53 }
 0x8e1   : > { %4910 = vmatmul.msk.bf16.gmra.mxu2 %vm389_vm0, %v8360_v37 }
 0x8e4   : > { %v8424_v32 = vpop.f32.mrf.mxu3  ;;  %v8426_v61 = vpop.f32.mrf.mxu2 }
 0x8e5   : > { %9617 = vst [vmem:[#allocation40_spill] sm:$0xff] %v8424_v32  ;;  %v3728_v40 = vmax.f32 %v3726_v6, %v8426_v61 }
 0x8e9   : > { %4925 = vmatmul.msk.bf16.gmra.mxu3 %vm389_vm0, %v8356_v31 }
 0x8ec   : > { %v8430_v56 = vpop.f32.mrf.mxu3  ;;  %v8432_v20 = vpop.f32.mrf.mxu2 }
 0x8ed   : > { %v3729_v17 = vmax.f32 %v3727_v7, %v8432_v20 }
 0x8f1   : > { %4911 = vmatmul.msk.bf16.gmra.mxu2 %vm389_vm0, %v8364_v25 }
 0x8f4   : > { %v8436_v46 = vpop.f32.mrf.mxu3  ;;  %v8438_v9 = vpop.f32.mrf.mxu2 }
 0x8f5   : > { %9618 = vst [vmem:[#allocation43_spill] sm:$0xff] %v8436_v46  ;;  %v3730_v59 = vmax.f32 %v3728_v40, %v8438_v9 }
 0x8f9   : > { %4926 = vmatmul.msk.bf16.gmra.mxu3 %vm389_vm0, %v8360_v37 }
 0x8fc   : > { %v8442_v18 = vpop.f32.mrf.mxu3  ;;  %v8444_v62 = vpop.f32.mrf.mxu2 }
 0x8fd   : > { %9619 = vst [vmem:[#allocation45_spill] sm:$0xff] %v8442_v18  ;;  %v3731_v39 = vmax.f32 %v3729_v17, %v8444_v62 }
 0x901   : > { %4912 = vmatmul.msk.bf16.gmra.mxu2 %vm389_vm0, %v8370_v63 }
 0x904   : > { %v8448_v31 = vpop.f32.mrf.mxu3  ;;  %v8450_v3 = vpop.f32.mrf.mxu2 }
 0x905   : > { %9620 = vst [vmem:[#allocation48_spill] sm:$0xff] %v8448_v31 }
 0x909   : > { %4927 = vmatmul.msk.bf16.gmra.mxu3 %vm389_vm0, %v8364_v25 }
 0x90c   : > { %v8454_v30 = vpop.f32.mrf.mxu3  ;;  %v8456_v35 = vpop.f32.mrf.mxu2 }
 0x90d   : > { %v3733_v5 = vmax.f32 %v3731_v39, %v8456_v35 }
 0x911   : > { %4913 = vmatmul.msk.bf16.gmra.mxu2 %vm389_vm0, %v8379_v43 }
 0x914   : > { %v8460_v37 = vpop.f32.mrf.mxu3  ;;  %v8462_v48 = vpop.f32.mrf.mxu2 }
 0x915   : > { %9621 = vst [vmem:[#allocation36_spill] sm:$0xff] %v8462_v48 }
 0x919   : > { %4928 = vmatmul.msk.bf16.gmra.mxu3 %vm389_vm0, %v8370_v63 }
 0x91c   : > { %v8466_v12 = vpop.f32.mrf.mxu3  ;;  %v8468_v24 = vpop.f32.mrf.mxu2 }
 0x91d   : > { %9622 = vst [vmem:[#allocation80_spill] sm:$0xff] %v8468_v24  ;;  %v3735_v34 = vmax.f32 %v3733_v5, %v8468_v24 }
 0x921   : > { %4914 = vmatmul.msk.bf16.gmra.mxu2 %vm389_vm0, %v3497_v10 }
 0x924   : > { %v8471_v25 = vpop.f32.mrf.mxu3  ;;  %v8473_v33 = vpop.f32.mrf.mxu2 }
 0x929   : > { %4929 = vmatmul.msk.bf16.gmra.mxu3 %vm389_vm0, %v8379_v43 }
 0x92c   : > { %v8477_v49 = vpop.f32.mrf.mxu3  ;;  %v8479_v16 = vpop.f32.mrf.mxu2 }
 0x92d   : > { %v3737_v7 = vmax.f32 %v3735_v34, %v8479_v16 }
 0x934   : > { %v8481_v55 = vpop.f32.mrf.mxu3  ;;  %v8483_v63 = vpop.f32.mrf.mxu2 }
 0x939   : > { %4930 = vmatmul.msk.bf16.gmra.mxu3 %vm389_vm0, %v3497_v10  ;;  %v3732_v10 = vmax.f32 %v3730_v59, %v8450_v3 }
 0x93b   : > { %v3734_v44 = vmax.f32 %v3732_v10, %v8462_v48 }
 0x93c   : > { %v8486_v26 = vpop.f32.mrf.mxu3  ;;  %v8488_v38 = vpop.f32.mrf.mxu2 }
 0x93d   : > { %v3736_v6 = vmax.f32 %v3734_v44, %v8473_v33  ;;  %v3739_v17 = vmax.f32 %v3737_v7, %v8488_v38 }
 0x93f   : > { %v3738_v40 = vmax.f32 %v3736_v6, %v8483_v63 }
 0x944   : > { %v8490_v8 = vpop.f32.mrf.mxu3  ;;  %v8492_v41 = vpop.f32.mrf.mxu2 }
 0x945   : > { %9623 = vst [vmem:[#allocation37_spill] sm:$0xff] %v8492_v41  ;;  %v3740_v59 = vmax.f32 %v3738_v40, %v8492_v41 }
 0x94c   : > { %v8494_v21 = vpop.f32.mrf.mxu3  ;;  %v8496_v43 = vpop.f32.mrf.mxu2 }
 0x94d   : > { %9624 = vst [vmem:[#allocation46_spill] sm:$0xff] %v8496_v43  ;;  %v3741_v39 = vmax.f32 %v3739_v17, %v8496_v43 }
 0x954   : > { %v8498_v22 = vpop.f32.mrf.mxu3  ;;  %v8500_v23 = vpop.f32.mrf.mxu2 }
 0x955   : > { %9625 = vst [vmem:[#allocation83_spill] sm:$0xff] %v8500_v23  ;;  %v3742_v10 = vmax.f32 %v3740_v59, %v8500_v23 }
 0x95c   : > { %v8502_v60 = vpop.f32.mrf.mxu3  ;;  %v8504_v4 = vpop.f32.mrf.mxu2 }
 0x95d   : > { %9626 = vst [vmem:[#allocation57_spill] sm:$0xff] %v8504_v4  ;;  %v3743_v5 = vmax.f32 %v3741_v39, %v8504_v4 }
 0x964   : > { %v8506_v11 = vpop.f32.mrf.mxu3  ;;  %v8508_v36 = vpop.f32.mrf.mxu2 }
 0x965   : > { %v3744_v44 = vmax.f32 %v3742_v10, %v8508_v36 }
 0x96c   : > { %v8510_v52 = vpop.f32.mrf.mxu3  ;;  %v8512_v13 = vpop.f32.mrf.mxu2 }
 0x96d   : > { %v3745_v34 = vmax.f32 %v3743_v5, %v8512_v13 }
 0x974   : > { %v8514_v14 = vpop.f32.mrf.mxu3  ;;  %v8516_v54 = vpop.f32.mrf.mxu2 }
 0x975   : > { %v3746_v6 = vmax.f32 %v3744_v44, %v8516_v54  ;;  %v3762_v44 = vmax.f32 %v8412_v1, %v8424_v32 }
 0x97c   : > { %v8518_v51 = vpop.f32.mrf.mxu3  ;;  %v8520_v50 = vpop.f32.mrf.mxu2 }
 0x97d   : > { %9627 = vst [vmem:[#allocation84_spill] sm:$0xff] %v8520_v50  ;;  %v3747_v7 = vmax.f32 %v3745_v34, %v8520_v50 }
 0x984   : > { %v8522_v19 = vpop.f32.mrf.mxu3  ;;  %v8524_v15 = vpop.f32.mrf.mxu2 }
 0x985   : > { %v3748_v40 = vmax.f32 %v3746_v6, %v8524_v15  ;;  %v3761_v6 = vmax.f32 %v8406_v29, %v8418_v28 }
 0x98c   : > { %v8526_v27 = vpop.f32.mrf.mxu3  ;;  %v8528_v45 = vpop.f32.mrf.mxu2 }
 0x98d   : > { %v3749_v17 = vmax.f32 %v3747_v7, %v8528_v45  ;;  %v3764_v7 = vmax.f32 %v3762_v44, %v8436_v46 }
 0x98f   : > { %v3766_v50 = vmax.f32 %v3764_v7, %v8448_v31 }
 0x994   : > { %v8536_v2 = vpop.f32.mrf.mxu3  ;;  %v8538_v0 = vpop.f32.mrf.mxu2 }
 0x995   : > { %v3750_v59 = vmax.f32 %v3748_v40, %v8538_v0 }
 0x99c   : > { %v8548_v53 = vpop.f32.mrf.mxu3  ;;  %v8550_v42 = vpop.f32.mrf.mxu2 }
 0x99d   : > { %9628 = vst [vmem:[#allocation41_spill] sm:$0xff] %v8548_v53  ;;  %v3751_v39 = vmax.f32 %v3749_v17, %v8550_v42  ;;  %v3763_v17 = vmax.f32 %v3761_v6, %v8430_v56 }
 0x9a4   : > { %v8560_v24 = vpop.f32.mrf.mxu3  ;;  %v8562_v48 = vpop.f32.mrf.mxu2 }
 0x9a5   : > { %9629 = vst [vmem:[#allocation81_spill] sm:$0xff] %v8560_v24  ;;  %v3752_v23 = vmax.f32 %v3750_v59, %v8562_v48 }
 0x9ac   : > { %v3632_v4 = vpop.f32.mrf.mxu2  ;;  %v8573_v41 = vpop.f32.mrf.mxu3 }
 0x9ad   : > { %v3753_v43 = vmax.f32 %v3751_v39, %v3632_v4  ;;  %9630 = vst [vmem:[#allocation86_spill] sm:$0xff] %v8573_v41  ;;  %v3765_v39 = vmax.f32 %v3763_v17, %v8442_v18 }
 0x9af   : > { %v3754_v10 = vmax.f32 %v3752_v23, %v3753_v43  ;;  %v3768_v43 = vmax.f32 %v3766_v50, %v8460_v37  ;;  %v3767_v32 = vmax.f32 %v3765_v39, %v8454_v30 }
 0x9b1   : > { %v3755_v5 = vrot.slane %v3754_v10, 4 }
 0x9b3   : > { %v3756_v34 = vmax.f32 %v3754_v10, %v3755_v5  ;;  %v3770_v10 = vmax.f32 %v3768_v43, %v8471_v25  ;;  %v3769_v5 = vmax.f32 %v3767_v32, %v8466_v12 }
 0x9b4   : > { %v8582_v59 = vpop.f32.mrf.mxu3 }
 0x9b5   : > { %v3757_v40 = vrot.slane %v3756_v34, 2  ;;  %9631 = vst [vmem:[#allocation38_spill] sm:$0xff] %v8582_v59  ;;  %v3772_v44 = vmax.f32 %v3770_v10, %v8481_v55  ;;  %v3771_v6 = vmax.f32 %v3769_v5, %v8477_v49 }
 0x9b7   : > { %v3758_v23 = vmax.f32 %v3756_v34, %v3757_v40  ;;  %v3774_v7 = vmax.f32 %v3772_v44, %v8490_v8  ;;  %v3773_v31 = vmax.f32 %v3771_v6, %v8486_v26 }
 0x9b9   : > { %v3759_v46 = vrot.slane %v3758_v23, 1  ;;  %v3776_v17 = vmax.f32 %v3774_v7, %v8498_v22  ;;  %v3775_v34 = vmax.f32 %v3773_v31, %v8494_v21 }
 0x9bb   : > { %v8596_v50 = vmax.f32 %v3758_v23, %v3759_v46  ;;  %v3778_v40 = vmax.f32 %v3776_v17, %v8506_v11  ;;  %v3777_v32 = vmax.f32 %v3775_v34, %v8502_v60 }
 0x9bc   : > { %v8594_v18 = vpop.f32.mrf.mxu3 }
 0x9bd   : > { %v3780_v39 = vmax.f32 %v3778_v40, %v8514_v14  ;;  %v3850_v43 = vsub.f32 %v8524_v15, %v8596_v50  ;;  %v3852_v10 = vsub.f32 %v8528_v45, %v8596_v50  ;;  %v3779_v5 = vmax.f32 %v3777_v32, %v8510_v52 }
 0x9be   : > { %v3854_v46 = vsub.f32 %v8538_v0, %v8596_v50  ;;  %v3856_v31 = vsub.f32 %v8550_v42, %v8596_v50 }
 0x9bf   : > { %v3782_v44 = vmax.f32 %v3780_v39, %v8522_v19  ;;  %v3781_v23 = vmax.f32 %v3779_v5, %v8518_v51  ;;  %v8614_v7 = vpack.c.bf16 %v3852_v10, %v3850_v43 }
 0x9c0   : > { %v8618_v17 = vpack.c.bf16 %v3856_v31, %v3854_v46  ;;  %v3860_v46 = vsub.f32 %v3632_v4, %v8596_v50  ;;  %v3802_v4 = vsub.f32 %v8402_v47, %v8596_v50 }
 0x9c1   : > { %v3784_v6 = vmax.f32 %v3782_v44, %v8536_v2  ;;  %v3783_v15 = vmax.f32 %v3781_v23, %v8526_v27  ;;  %v3858_v44 = vsub.f32 %v8562_v48, %v8596_v50  ;;  %v3800_v48 = vsub.f32 %v8397_v58, %v8596_v50 }
 0x9c2   : > { %v3814_v58 = vsub.f32 %v8438_v9, %v8596_v50  ;;  %v3826_v9 = vsub.f32 %v8473_v33, %v8596_v50 }
 0x9c3   : > { %v3786_v45 = vmax.f32 %v3784_v6, %v8560_v24  ;;  %v3785_v40 = vmax.f32 %v3783_v15, %v8548_v53  ;;  %v3892_v23 = vpack.c.bf16 %v3860_v46, %v3858_v44  ;;  %v9632_v15 = vld [vmem:[#allocation63_spill] sm:$0xff]  ;;  %v9633_v24 = vld [vmem:[#allocation69_spill] sm:$0xff]  ;;  %v3810_v46 = vsub.f32 %v8426_v61, %v8596_v50 }
 0x9c4   : > { %v8620_v34 = vpop.f32.mrf.mxu3 }
 0x9c5   : > { %v3788_v0 = vmax.f32 %v3786_v45, %v8582_v59  ;;  %v3787_v42 = vmax.f32 %v3785_v40, %v8573_v41  ;;  %v8632_v45 = vpack.c.bf16 %v9633_v24, %v9632_v15  ;;  %v3954_v40 = vunpack.c.l.bf16 %v3892_v23  ;;  %v9635_v59 = vld [vmem:[#allocation72_spill] sm:$0xff]  ;;  %v9639_v24 = vld [vmem:[#allocation9_spill] sm:$0xff] }
 0x9c6   : > { %v3820_v15 = vsub.f32 %v8456_v35, %v8596_v50 }
 0x9c7   : > { %v3790_v32 = vmax.f32 %v3788_v0, %v8620_v34  ;;  %v3789_v39 = vmax.f32 %v3787_v42, %v8594_v18  ;;  %9634 = vst [vmem:[#allocation51_spill] sm:$0xff] %v8632_v45  ;;  %v9636_v0 = vld [vmem:[#allocation76_spill] sm:$0xff]  ;;  %v3956_v42 = vunpack.c.h.bf16 %v3892_v23  ;;  %v4078_v47 = vmul.f32 1.442695, %v3954_v40  ;;  %v9646_v45 = vld [vmem:[#allocation57_spill] sm:$0xff] }
 0x9c8   : > { %v8636_v41 = vpack.c.bf16 %v9636_v0, %v9635_v59  ;;  %v9640_v59 = vld [vmem:[#allocation67_spill] sm:$0xff]  ;;  %v3818_v23 = vsub.f32 %v8450_v3, %v8596_v50  ;;  %v3828_v40 = vsub.f32 %v8479_v16, %v8596_v50  ;;  %v3832_v3 = vsub.f32 %v8488_v38, %v8596_v50 }
 0x9c9   : > { %v3791_v43 = vmax.f32 %v3789_v39, %v3790_v32  ;;  %v3798_v32 = vsub.f32 %v8393_v57, %v8596_v50  ;;  %v9638_v39 = vld [vmem:[#allocation7_spill] sm:$0xff]  ;;  %v3808_v44 = vsub.f32 %v9640_v59, %v8596_v50  ;;  %v3812_v57 = vsub.f32 %v8432_v20, %v8596_v50 }
 0x9ca   : > { %9637 = vst [vmem:[#allocation54_spill] sm:$0xff] %v8636_v41  ;;  %v4082_v0 = vmul.f32 1.442695, %v3956_v42  ;;  %v9643_v42 = vld [vmem:[#allocation37_spill] sm:$0xff]  ;;  %v9645_v41 = vld [vmem:[#allocation83_spill] sm:$0xff]  ;;  %v3840_v16 = vsub.f32 %v9646_v45, %v8596_v50  ;;  %5501 = vpow2.f32 %v4078_v47  ;;  %v3844_v38 = vsub.f32 %v8512_v13, %v8596_v50 }
 0x9cb   : > { %v3792_v10 = vrot.slane %v3791_v43, 4  ;;  %v3834_v59 = vsub.f32 %v9643_v42, %v8596_v50  ;;  %v3838_v33 = vsub.f32 %v9645_v41, %v8596_v50  ;;  %v8700_v47 = vpack.c.bf16 %v3812_v57, %v3810_v46 }
 0x9cc   : > { %5503 = vpow2.f32 %v4082_v0 }
 0x9cd   : > { %v3793_v5 = vmax.f32 %v3791_v43, %v3792_v10  ;;  %v3804_v43 = vsub.f32 %v9638_v39, %v8596_v50  ;;  %v3806_v10 = vsub.f32 %v9639_v24, %v8596_v50  ;;  %v9641_v39 = vld [vmem:[#allocation36_spill] sm:$0xff] }
 0x9ce   : > { %v3822_v61 = vsub.f32 %v9641_v39, %v8596_v50  ;;  %v9642_v24 = vld [vmem:[#allocation80_spill] sm:$0xff]  ;;  %v9644_v39 = vld [vmem:[#allocation46_spill] sm:$0xff] }
 0x9cf   : > { %v3794_v31 = vrot.slane %v3793_v5, 2  ;;  %v3824_v20 = vsub.f32 %v9642_v24, %v8596_v50  ;;  %v3836_v24 = vsub.f32 %v9644_v39, %v8596_v50  ;;  %v3862_v39 = vpack.c.bf16 %v3800_v48, %v3798_v32 }
 0x9d0   : > { %v8692_v53 = vpack.c.bf16 %v3804_v43, %v3802_v4  ;;  %v8721_v46 = vpop.eup %5501 }
 0x9d1   : > { %v3795_v6 = vmax.f32 %v3793_v5, %v3794_v31  ;;  %v3816_v31 = vsub.f32 %v8444_v62, %v8596_v50  ;;  %v3830_v62 = vsub.f32 %v8483_v63, %v8596_v50  ;;  %v3842_v63 = vsub.f32 %v8508_v36, %v8596_v50 }
 0x9d2   : > { %v8698_v36 = vpack.c.bf16 %v3808_v44, %v3806_v10  ;;  %v8706_v0 = vpack.c.bf16 %v3824_v20, %v3822_v61  ;;  %v8712_v48 = vpack.c.bf16 %v3836_v24, %v3834_v59  ;;  %v3894_v43 = vunpack.c.l.bf16 %v3862_v39 }
 0x9d3   : > { %v3796_v5 = vrot.slane %v3795_v6, 1  ;;  %v8702_v13 = vpack.c.bf16 %v3816_v31, %v3814_v58  ;;  %v8710_v32 = vpack.c.bf16 %v3832_v3, %v3830_v62  ;;  %v8716_v4 = vpack.c.bf16 %v3844_v38, %v3842_v63 }
 0x9d4   : > { %v3896_v10 = vunpack.c.h.bf16 %v3862_v39  ;;  %v3898_v44 = vunpack.c.l.bf16 %v8692_v53  ;;  %v3902_v61 = vunpack.c.l.bf16 %v8698_v36  ;;  %v3904_v20 = vunpack.c.h.bf16 %v8698_v36  ;;  %v9649_v36 = vld [vmem:[#allocation43_spill] sm:$0xff] }
 0x9d5   : > { %v8674_v35 = vmax.f32 %v3795_v6, %v3796_v5  ;;  %v3846_v6 = vsub.f32 %v8516_v54, %v8596_v50  ;;  %v9647_v5 = vld [vmem:[#allocation84_spill] sm:$0xff]  ;;  %v8704_v54 = vpack.c.bf16 %v3820_v15, %v3818_v23  ;;  %v3900_v23 = vunpack.c.h.bf16 %v8692_v53  ;;  %v8728_v15 = vpop.eup %5503 }
 0x9d6   : > { %v3848_v42 = vsub.f32 %v9647_v5, %v8596_v50  ;;  %v8708_v50 = vpack.c.bf16 %v3828_v40, %v3826_v9  ;;  %v3906_v9 = vunpack.c.l.bf16 %v8700_v47  ;;  %v3908_v40 = vunpack.c.h.bf16 %v8700_v47 }
 0x9d7   : > { %v3859_v41 = vsub.f32 %v8594_v18, %v8674_v35  ;;  %v3861_v45 = vsub.f32 %v8620_v34, %v8674_v35  ;;  %v8714_v18 = vpack.c.bf16 %v3840_v16, %v3838_v33  ;;  %v3799_v58 = vsub.f32 %v8406_v29, %v8674_v35  ;;  %v9648_v29 = vld [vmem:[#allocation40_spill] sm:$0xff] }
 0x9d8   : > { %v8718_v34 = vpack.c.bf16 %v3848_v42, %v3846_v6  ;;  %v3801_v31 = vsub.f32 %v8412_v1, %v8674_v35  ;;  %v3803_v62 = vsub.f32 %v8418_v28, %v8674_v35  ;;  %v3805_v3 = vsub.f32 %v9648_v29, %v8674_v35 }
 0x9d9   : > { %v3893_v57 = vpack.c.bf16 %v3861_v45, %v3859_v41  ;;  %v3914_v59 = vunpack.c.l.bf16 %v8704_v54  ;;  %v3916_v24 = vunpack.c.h.bf16 %v8704_v54  ;;  %v3918_v33 = vunpack.c.l.bf16 %v8706_v0 }
 0x9da   : > { %v3920_v16 = vunpack.c.h.bf16 %v8706_v0  ;;  %v3863_v38 = vpack.c.bf16 %v3801_v31, %v3799_v58  ;;  %v3922_v6 = vunpack.c.l.bf16 %v8708_v50  ;;  %v3924_v28 = vunpack.c.h.bf16 %v8708_v50 }
 0x9db   : > { %v3955_v63 = vunpack.c.l.bf16 %v3893_v57  ;;  %v3957_v5 = vunpack.c.h.bf16 %v3893_v57  ;;  %v8749_v45 = vpack.c.bf16 %v3805_v3, %v3803_v62  ;;  %v3958_v57 = vmul.f32 1.442695, %v3894_v43 }
 0x9dc   : > { %v3895_v53 = vunpack.c.l.bf16 %v3863_v38  ;;  %v3897_v41 = vunpack.c.h.bf16 %v3863_v38  ;;  %v3950_v47 = vunpack.c.l.bf16 %v8618_v17  ;;  %v3962_v31 = vmul.f32 1.442695, %v3896_v10 }
 0x9dd   : > { %v4080_v42 = vmul.f32 1.442695, %v3955_v63  ;;  %v4084_v3 = vmul.f32 1.442695, %v3957_v5  ;;  %v3899_v29 = vunpack.c.l.bf16 %v8749_v45  ;;  %v3966_v1 = vmul.f32 1.442695, %v3898_v44 }
 0x9de   : > { %5505 = vpow2.f32 %v3958_v57  ;;  %v3970_v43 = vmul.f32 1.442695, %v3900_v23  ;;  %v3974_v63 = vmul.f32 1.442695, %v3902_v61  ;;  %v8763_v50 = vmul.f32 1.442695, %v3904_v20 }
 0x9df   : > { %5507 = vpow2.f32 %v4080_v42  ;;  %v3960_v39 = vmul.f32 1.442695, %v3895_v53  ;;  %v8765_v62 = vmul.f32 1.442695, %v3906_v9  ;;  %v8767_v38 = vmul.f32 1.442695, %v3908_v40 }
 0x9e0   : > { %5509 = vpow2.f32 %v4084_v3  ;;  %v3807_v5 = vsub.f32 %v8430_v56, %v8674_v35  ;;  %v3809_v58 = vsub.f32 %v9649_v36, %v8674_v35  ;;  %v3964_v10 = vmul.f32 1.442695, %v3897_v41  ;;  %v9650_v44 = vld [vmem:[#allocation45_spill] sm:$0xff]  ;;  %v9651_v61 = vld [vmem:[#allocation48_spill] sm:$0xff] }
 0x9e1   : > { %v3811_v23 = vsub.f32 %v9650_v44, %v8674_v35  ;;  %v3813_v20 = vsub.f32 %v9651_v61, %v8674_v35  ;;  %5511 = vpow2.f32 %v3962_v31  ;;  %v3968_v53 = vmul.f32 1.442695, %v3899_v29 }
 0x9e2   : > { %v3815_v9 = vsub.f32 %v8454_v30, %v8674_v35  ;;  %v3817_v40 = vsub.f32 %v8460_v37, %v8674_v35  ;;  %v3819_v56 = vsub.f32 %v8466_v12, %v8674_v35  ;;  %5513 = vpow2.f32 %v3966_v1 }
 0x9e3   : > { %v3821_v42 = vsub.f32 %v8471_v25, %v8674_v35  ;;  %v3823_v41 = vsub.f32 %v8477_v49, %v8674_v35  ;;  %5515 = vpow2.f32 %v3960_v39  ;;  %v4014_v36 = vmul.f32 1.442695, %v3922_v6 }
 0x9e4   : > { %v5506_v31 = vpop.eup %5505  ;;  %v3825_v29 = vsub.f32 %v8481_v55, %v8674_v35  ;;  %v3827_v30 = vsub.f32 %v8486_v26, %v8674_v35  ;;  %v3829_v37 = vsub.f32 %v8490_v8, %v8674_v35  ;;  %5517 = vpow2.f32 %v3964_v10 }
 0x9e5   : > { %v8793_v12 = vpop.eup %5507  ;;  %v3831_v25 = vsub.f32 %v8494_v21, %v8674_v35  ;;  %v3833_v49 = vsub.f32 %v8498_v22, %v8674_v35  ;;  %5519 = vpow2.f32 %v3968_v53  ;;  %v4018_v1 = vmul.f32 1.442695, %v3924_v28 }
 0x9e6   : > { %v8799_v6 = vpop.eup %5509  ;;  %v3835_v55 = vsub.f32 %v8502_v60, %v8674_v35  ;;  %5521 = vpow2.f32 %v3970_v43  ;;  %v4006_v26 = vmul.f32 1.442695, %v3918_v33  ;;  %v8807_v8 = vpack.c.bf16 %v8728_v15, %v8721_v46 }
 0x9e7   : > { %v5512_v39 = vpop.eup %5511  ;;  %v3837_v57 = vsub.f32 %v8506_v11, %v8674_v35  ;;  %v3839_v28 = vsub.f32 %v8510_v52, %v8674_v35  ;;  %v4010_v3 = vmul.f32 1.442695, %v3920_v16  ;;  %5523 = vpow2.f32 %v4014_v36 }
 0x9e8   : > { %v5514_v10 = vpop.eup %5513  ;;  %v3867_v46 = vpack.c.bf16 %v3809_v58, %v3807_v5  ;;  %5525 = vpow2.f32 %v3974_v63  ;;  %4275 = vmatpush.bf16.msrb.mxu1 %v8807_v8  ;;  %v3901_v16 = vunpack.c.h.bf16 %v8749_v45  ;;  %v3869_v58 = vpack.c.bf16 %v3813_v20, %v3811_v23 }
 0x9e9   : > { %v8820_v15 = vpop.eup %5515  ;;  %5527 = vpow2.f32 %v4018_v1  ;;  %v3998_v63 = vmul.f32 1.442695, %v3914_v59  ;;  %v3871_v36 = vpack.c.bf16 %v3817_v40, %v3815_v9  ;;  %v3873_v44 = vpack.c.bf16 %v3821_v42, %v3819_v56 }
 0x9ea   : > { %v8827_v61 = vpop.eup %5517  ;;  %5529 = vpow2.f32 %v4006_v26  ;;  %v4002_v0 = vmul.f32 1.442695, %v3916_v24  ;;  %v8837_v1 = vpack.c.bf16 %v3825_v29, %v3823_v41  ;;  %v3903_v33 = vunpack.c.l.bf16 %v3867_v46 }
 0x9eb   : > { %v8833_v5 = vpop.eup %5519  ;;  %5531 = vpow2.f32 %v4010_v3  ;;  %v3905_v43 = vunpack.c.h.bf16 %v3867_v46  ;;  %v8840_v20 = vpack.c.bf16 %v3829_v37, %v3827_v30  ;;  %v3972_v59 = vmul.f32 1.442695, %v3901_v16 }
 0x9ec   : > { %v5522_v45 = vpop.eup %5521  ;;  %5533 = vpow2.f32 %v8763_v50  ;;  %v8843_v26 = vpack.c.bf16 %v5512_v39, %v5506_v31  ;;  %v3907_v40 = vunpack.c.l.bf16 %v3869_v58  ;;  %v3909_v54 = vunpack.c.h.bf16 %v3869_v58 }
 0x9ed   : > { %v5524_v23 = vpop.eup %5523  ;;  %5535 = vpow2.f32 %v8765_v62  ;;  %v9652_v24 = vunpack.c.l.bf16 %v8702_v13  ;;  %v3911_v41 = vunpack.c.l.bf16 %v3871_v36  ;;  %v3913_v29 = vunpack.c.h.bf16 %v3871_v36 }
 0x9ee   : > { %v5526_v9 = vpop.eup %5525  ;;  %5537 = vpow2.f32 %v3998_v63  ;;  %v9653_v50 = vunpack.c.h.bf16 %v8702_v13  ;;  %v3976_v37 = vmul.f32 1.442695, %v3903_v33  ;;  %v3980_v46 = vmul.f32 1.442695, %v3905_v43 }
 0x9ef   : > { %v3990_v56 = vmul.f32 1.442695, %v9652_v24  ;;  %v5528_v42 = vpop.eup %5527  ;;  %5539 = vpow2.f32 %v4002_v0  ;;  %v8852_v39 = vpack.c.bf16 %v5522_v45, %v5514_v10  ;;  %v4118_v16 = vunpack.c.l.bf16 %v8843_v26 }
 0x9f0   : > { %v3994_v3 = vmul.f32 1.442695, %v9653_v50  ;;  %v5530_v30 = vpop.eup %5529  ;;  %5541 = vpow2.f32 %v8767_v38  ;;  %v8850_v62 = vpack.c.bf16 %v5528_v42, %v5524_v23  ;;  %v4120_v58 = vunpack.c.h.bf16 %v8843_v26 }
 0x9f1   : > { %v5532_v31 = vpop.eup %5531  ;;  %5543 = vpow2.f32 %v3972_v59  ;;  %v3915_v36 = vunpack.c.l.bf16 %v3873_v44  ;;  %v3917_v13 = vunpack.c.h.bf16 %v3873_v44  ;;  %v3984_v24 = vmul.f32 1.442695, %v3907_v40 }
 0x9f2   : > { %v5534_v63 = vpop.eup %5533  ;;  %5545 = vpow2.f32 %v3990_v56  ;;  %4256 = vmatpush.bf16.msrb.mxu0 %v8850_v62  ;;  %v3919_v38 = vunpack.c.l.bf16 %v8837_v1  ;;  %v3921_v33 = vunpack.c.h.bf16 %v8837_v1  ;;  %v3988_v0 = vmul.f32 1.442695, %v3909_v54 }
 0x9f3   : > { %v5536_v43 = vpop.eup %5535  ;;  %5547 = vpow2.f32 %v3994_v3  ;;  %v3992_v45 = vmul.f32 1.442695, %v3911_v41  ;;  %v3996_v23 = vmul.f32 1.442695, %v3913_v29  ;;  %v8859_v59 = vpack.c.bf16 %v5532_v31, %v5530_v30 }
 0x9f4   : > { %v5538_v10 = vpop.eup %5537  ;;  %5549 = vpow2.f32 %v3976_v37  ;;  %v8861_v44 = vpack.c.bf16 %v5534_v63, %v5526_v9  ;;  %v4122_v40 = vunpack.c.l.bf16 %v8852_v39  ;;  %v4182_v56 = vadd.f32 %v4120_v58, %v4118_v16 }
 0x9f5   : > { %v5540_v42 = vpop.eup %5539  ;;  %5551 = vpow2.f32 %v3980_v46  ;;  %v3923_v53 = vunpack.c.l.bf16 %v8840_v20  ;;  %v3925_v1 = vunpack.c.h.bf16 %v8840_v20  ;;  %v4000_v54 = vmul.f32 1.442695, %v3915_v36 }
 0x9f6   : > { %v5542_v50 = vpop.eup %5541  ;;  %5553 = vpow2.f32 %v3984_v24  ;;  %4257 = vmatpush.bf16.msrb.mxu0 %v8859_v59  ;;  %v4004_v29 = vmul.f32 1.442695, %v3917_v13  ;;  %v4124_v3 = vunpack.c.h.bf16 %v8852_v39  ;;  %v4183_v9 = vadd.f32 %v4182_v56, %v4122_v40  ;;  %v9654_v24 = vld [vmem:[#allocation41_spill] sm:$0xff] }
 0x9f7   : > { %v8867_v41 = vpop.eup %5543  ;;  %5555 = vpow2.f32 %v3988_v0  ;;  %v4008_v37 = vmul.f32 1.442695, %v3919_v38  ;;  %v4012_v46 = vmul.f32 1.442695, %v3921_v33  ;;  %v8870_v31 = vpack.c.bf16 %v5540_v42, %v5538_v10  ;;  %v9655_v0 = vld [vmem:[#allocation81_spill] sm:$0xff]  ;;  %v9656_v42 = vld [vmem:[#allocation86_spill] sm:$0xff] }
 0x9f8   : > { %v5546_v30 = vpop.eup %5545  ;;  %5557 = vpow2.f32 %v3992_v45  ;;  %v4092_v20 = vpack.c.bf16 %v5542_v50, %v5536_v43  ;;  %v4126_v58 = vunpack.c.l.bf16 %v8861_v44  ;;  %v4184_v63 = vadd.f32 %v4183_v9, %v4124_v3 }
 0x9f9   : > { %v5548_v16 = vpop.eup %5547  ;;  %5559 = vpow2.f32 %v3996_v23  ;;  %v3851_v13 = vsub.f32 %v9654_v24, %v8674_v35  ;;  %v3853_v40 = vsub.f32 %v9655_v0, %v8674_v35  ;;  %v4016_v45 = vmul.f32 1.442695, %v3923_v53 }
 0x9fa   : > { %v8873_v36 = vpop.eup %5549  ;;  %5561 = vpow2.f32 %v4000_v54  ;;  %4258 = vmatpush.bf16.msrb.mxu0 %v8870_v31  ;;  %v4020_v33 = vmul.f32 1.442695, %v3925_v1  ;;  %v4128_v43 = vunpack.c.h.bf16 %v8861_v44  ;;  %v4185_v10 = vadd.f32 %v4184_v63, %v4126_v58  ;;  %v9659_v58 = vld [vmem:[#allocation38_spill] sm:$0xff] }
 0x9fb   : > { %v8880_v38 = vpop.eup %5551  ;;  %5563 = vpow2.f32 %v4004_v29  ;;  %v3855_v56 = vsub.f32 %v9656_v42, %v8674_v35  ;;  %v9657_v50 = vunpack.c.l.bf16 %v8710_v32  ;;  %v4094_v54 = vpack.c.bf16 %v5548_v16, %v5546_v30 }
 0x9fc   : > { %v8883_v23 = vpop.eup %5553  ;;  %5565 = vpow2.f32 %v4008_v37  ;;  %v9658_v9 = vunpack.c.h.bf16 %v8710_v32  ;;  %v4130_v1 = vunpack.c.l.bf16 %v4092_v20  ;;  %v4186_v24 = vadd.f32 %v4185_v10, %v4128_v43 }
 0x9fd   : > { %v4022_v3 = vmul.f32 1.442695, %v9657_v50  ;;  %v8889_v53 = vpop.eup %5555  ;;  %5567 = vpow2.f32 %v4012_v46  ;;  %v3857_v63 = vsub.f32 %v9659_v58, %v8674_v35  ;;  %v8903_v30 = vpack.c.bf16 %v3833_v49, %v3831_v25 }
 0x9fe   : > { %v4026_v29 = vmul.f32 1.442695, %v9658_v9  ;;  %v8893_v0 = vpop.eup %5557  ;;  %5569 = vpow2.f32 %v4016_v45  ;;  %v9660_v37 = vunpack.c.l.bf16 %v8712_v48  ;;  %4259 = vmatpush.bf16.msrb.mxu0 %v4094_v54  ;;  %v4070_v16 = vmul.f32 1.442695, %v3950_v47 }
 0x9ff   : > { %v8907_v46 = vpop.eup %5559  ;;  %5571 = vpow2.f32 %v4020_v33  ;;  %v4132_v43 = vunpack.c.h.bf16 %v4092_v20  ;;  %v4187_v10 = vadd.f32 %v4186_v24, %v4130_v1  ;;  %v8919_v21 = vpack.c.bf16 %v3837_v57, %v3835_v55 }
 0xa00   : > { %v4030_v32 = vmul.f32 1.442695, %v9660_v37  ;;  %v8911_v42 = vpop.eup %5561  ;;  %v9661_v22 = vsub.f32 %v8514_v14, %v8674_v35  ;;  %5573 = vpow2.f32 %v4022_v3  ;;  %v9662_v47 = vunpack.c.h.bf16 %v8712_v48 }
 0xa01   : > { %v8931_v45 = vpop.eup %5563  ;;  %5575 = vpow2.f32 %v4026_v29  ;;  %v9663_v60 = vunpack.c.h.bf16 %v8618_v17  ;;  %v4134_v55 = vunpack.c.l.bf16 %v4094_v54  ;;  %v4188_v57 = vadd.f32 %v4187_v10, %v4132_v43 }
 0xa02   : > { %v8927_v25 = vpack.c.bf16 %v9661_v22, %v3839_v28  ;;  %v4034_v49 = vmul.f32 1.442695, %v9662_v47  ;;  %v8935_v33 = vpop.eup %5565  ;;  %v9664_v52 = vsub.f32 %v8518_v51, %v8674_v35  ;;  %v9665_v14 = vsub.f32 %v8522_v19, %v8674_v35  ;;  %4260 = vmatpush.bf16.msrb.mxu0 %v4092_v20 }
 0xa03   : > { %v4074_v11 = vmul.f32 1.442695, %v9663_v60  ;;  %v9666_v48 = vsub.f32 %v8526_v27, %v8674_v35  ;;  %v9667_v50 = vsub.f32 %v8536_v2, %v8674_v35  ;;  %5577 = vpow2.f32 %v4030_v32  ;;  %v8955_v29 = vpop.eup %5567 }
 0xa04   : > { %v8943_v28 = vpack.c.bf16 %v9665_v14, %v9664_v52  ;;  %v9668_v3 = vunpack.c.l.bf16 %v8614_v7  ;;  %v9669_v51 = vunpack.c.h.bf16 %v8614_v7  ;;  %5579 = vpow2.f32 %v4070_v16  ;;  %v5570_v58 = vpop.eup %5569 }
 0xa05   : > { %v8951_v17 = vpack.c.bf16 %v9667_v50, %v9666_v48  ;;  %v4136_v1 = vunpack.c.h.bf16 %v4094_v54  ;;  %v4189_v24 = vadd.f32 %v4188_v57, %v4134_v55  ;;  %v8959_v27 = vpack.c.bf16 %v3853_v40, %v3851_v13  ;;  %v5572_v20 = vpop.eup %5571 }
 0xa06   : > { %v4062_v9 = vmul.f32 1.442695, %v9668_v3  ;;  %v4066_v19 = vmul.f32 1.442695, %v9669_v51  ;;  %5581 = vpow2.f32 %v4034_v49  ;;  %v9670_v2 = vunpack.c.l.bf16 %v8714_v18  ;;  %v5574_v16 = vpop.eup %5573  ;;  %4261 = vmatpush.bf16.msrb.mxu0 %v8861_v44 }
 0xa07   : > { %v8965_v37 = vpack.c.bf16 %v8827_v61, %v8820_v15  ;;  %v9671_v32 = vunpack.c.h.bf16 %v8714_v18  ;;  %5583 = vpow2.f32 %v4074_v11  ;;  %v4138_v7 = vunpack.c.l.bf16 %v8870_v31  ;;  %v5576_v15 = vpop.eup %5575 }
 0xa08   : > { %v4038_v35 = vmul.f32 1.442695, %v9670_v2  ;;  %v4190_v54 = vadd.f32 %v4189_v24, %v4136_v1  ;;  %v8970_v10 = vpack.c.bf16 %v3857_v63, %v3855_v56  ;;  %v3927_v13 = vunpack.c.l.bf16 %v8903_v30 }
 0xa09   : > { %v4042_v43 = vmul.f32 1.442695, %v9671_v32  ;;  %v9672_v40 = vunpack.c.l.bf16 %v8718_v34  ;;  %5585 = vpow2.f32 %v4062_v9  ;;  %v9673_v61 = vunpack.c.h.bf16 %v8718_v34  ;;  %v5578_v60 = vpop.eup %5577 }
 0xa0a   : > { %5587 = vpow2.f32 %v4066_v19  ;;  %v4140_v47 = vunpack.c.h.bf16 %v8870_v31  ;;  %v4191_v49 = vadd.f32 %v4190_v54, %v4138_v7  ;;  %v8981_v56 = vpack.c.bf16 %v8867_v41, %v8833_v5  ;;  %v5580_v55 = vpop.eup %5579  ;;  %4262 = vmatpush.bf16.msrb.mxu0 %v8852_v39 }
 0xa0b   : > { %v4054_v22 = vmul.f32 1.442695, %v9672_v40  ;;  %v4058_v18 = vmul.f32 1.442695, %v9673_v61  ;;  %5589 = vpow2.f32 %v4038_v35  ;;  %v4119_v63 = vunpack.c.l.bf16 %v8965_v37 }
 0xa0c   : > { %v4121_v11 = vunpack.c.h.bf16 %v8965_v37  ;;  %v3929_v44 = vunpack.c.h.bf16 %v8903_v30  ;;  %5591 = vpow2.f32 %v4042_v43  ;;  %v4142_v34 = vunpack.c.l.bf16 %v8859_v59  ;;  %v5582_v52 = vpop.eup %5581 }
 0xa0d   : > { %v4192_v57 = vadd.f32 %v4191_v49, %v4140_v47  ;;  %v3931_v31 = vunpack.c.l.bf16 %v8919_v21  ;;  %v3933_v14 = vunpack.c.h.bf16 %v8919_v21  ;;  %v9674_v48 = vunpack.c.l.bf16 %v8716_v4  ;;  %v5584_v41 = vpop.eup %5583 }
 0xa0e   : > { %5593 = vpow2.f32 %v4054_v22  ;;  %v9675_v50 = vunpack.c.h.bf16 %v8716_v4  ;;  %v4144_v9 = vunpack.c.h.bf16 %v8859_v59  ;;  %v8995_v1 = vpack.c.bf16 %v5584_v41, %v5580_v55  ;;  %4263 = vmatpush.bf16.msrb.mxu0 %v8843_v26 }
 0xa0f   : > { %v4046_v5 = vmul.f32 1.442695, %v9674_v48  ;;  %5595 = vpow2.f32 %v4058_v18  ;;  %v4193_v51 = vadd.f32 %v4192_v57, %v4142_v34  ;;  %v5586_v19 = vpop.eup %5585  ;;  %v8999_v24 = vpack.c.bf16 %v8880_v38, %v8873_v36 }
 0xa10   : > { %v4050_v3 = vmul.f32 1.442695, %v9675_v50  ;;  %v4123_v2 = vunpack.c.l.bf16 %v8981_v56  ;;  %v4219_v35 = vadd.f32 %v4121_v11, %v4119_v63  ;;  %v5588_v32 = vpop.eup %5587  ;;  %v4146_v39 = vunpack.c.l.bf16 %v8850_v62  ;;  %4276 = vmatpush.bf16.msrb.mxu1 %v8995_v1 }
 0xa11   : > { %v9003_v43 = vpack.c.bf16 %v5576_v15, %v5574_v16  ;;  %v4194_v4 = vadd.f32 %v4193_v51, %v4144_v9  ;;  %v9005_v7 = vpack.c.bf16 %v5572_v20, %v5570_v58  ;;  %v5590_v59 = vpop.eup %5589  ;;  %v3935_v54 = vunpack.c.l.bf16 %v8927_v25 }
 0xa12   : > { %5597 = vpow2.f32 %v4046_v5  ;;  %v4125_v36 = vunpack.c.h.bf16 %v8981_v56  ;;  %v4220_v38 = vadd.f32 %v4219_v35, %v4123_v2  ;;  %v5592_v40 = vpop.eup %5591  ;;  %v3937_v22 = vunpack.c.h.bf16 %v8927_v25 }
 0xa13   : > { %5599 = vpow2.f32 %v4050_v3  ;;  %v4148_v16 = vunpack.c.h.bf16 %v8850_v62  ;;  %v4195_v15 = vadd.f32 %v4194_v4, %v4146_v39  ;;  %4294 = vmatpush.bf16.msra.mxu0 %v9005_v7  ;;  %v9014_v20 = vpack.c.bf16 %v5588_v32, %v5586_v19  ;;  %v9676_v62 = vld [vmem:[#allocation51_spill] sm:$0xff] }
 0xa14   : > { %v5594_v58 = vpop.eup %5593  ;;  %v9018_v61 = vpack.c.bf16 %v8889_v53, %v8883_v23  ;;  %v4127_v26 = vunpack.c.l.bf16 %v8999_v24  ;;  %v4221_v18 = vadd.f32 %v4220_v38, %v4125_v36  ;;  %v9021_v49 = vpack.c.bf16 %v5582_v52, %v5578_v60  ;;  %4264 = vmatmul.bf16.vlgmr.msrb.gmra.mxu0 %v9676_v62 }
 0xa15   : > { %v5596_v47 = vpop.eup %5595  ;;  %v4150_v63 = vunpack.c.l.bf16 %v9003_v43  ;;  %v4196_v11 = vadd.f32 %v4195_v15, %v4148_v16  ;;  %v9027_v55 = vpack.c.bf16 %v8955_v29, %v8935_v33  ;;  %v3939_v34 = vunpack.c.l.bf16 %v8943_v28  ;;  %4277 = vmatpush.bf16.msrb.mxu1 %v9014_v20 }
 0xa16   : > { %v3941_v23 = vunpack.c.h.bf16 %v8943_v28  ;;  %v4129_v53 = vunpack.c.h.bf16 %v8999_v24  ;;  %v4222_v57 = vadd.f32 %v4221_v18, %v4127_v26  ;;  %v3943_v60 = vunpack.c.l.bf16 %v8951_v17 }
 0xa17   : > { %v3945_v52 = vunpack.c.h.bf16 %v8951_v17  ;;  %v4152_v48 = vunpack.c.h.bf16 %v9003_v43  ;;  %v4197_v5 = vadd.f32 %v4196_v11, %v4150_v63  ;;  %4295 = vmatpush.bf16.msra.mxu0 %v9027_v55  ;;  %v9037_v29 = vpack.c.bf16 %v5596_v47, %v5594_v58 }
 0xa18   : > { %v5598_v33 = vpop.eup %5597  ;;  %v4095_v41 = vpack.c.bf16 %v8907_v46, %v8893_v0  ;;  %v4131_v50 = vunpack.c.l.bf16 %v9018_v61  ;;  %v4223_v3 = vadd.f32 %v4222_v57, %v4129_v53  ;;  %v4106_v51 = vpack.c.bf16 %v5592_v40, %v5590_v59 }
 0xa19   : > { %v5600_v9 = vpop.eup %5599  ;;  %v4154_v19 = vunpack.c.l.bf16 %v9021_v49  ;;  %v4198_v2 = vadd.f32 %v4197_v5, %v4152_v48  ;;  %v4097_v35 = vpack.c.bf16 %v8931_v45, %v8911_v42  ;;  %v3947_v32 = vunpack.c.l.bf16 %v8959_v27  ;;  %4278 = vmatpush.bf16.msrb.mxu1 %v9037_v29 }
 0xa1a   : > { %v4024_v39 = vmul.f32 1.442695, %v3927_v13  ;;  %v4133_v0 = vunpack.c.h.bf16 %v9018_v61  ;;  %v4224_v46 = vadd.f32 %v4223_v3, %v4131_v50  ;;  %v3951_v4 = vunpack.c.l.bf16 %v8970_v10 }
 0xa1b   : > { %v4028_v59 = vmul.f32 1.442695, %v3929_v44  ;;  %v4156_v36 = vunpack.c.h.bf16 %v9021_v49  ;;  %v4199_v38 = vadd.f32 %v4198_v2, %v4154_v19  ;;  %4296 = vmatpush.bf16.msra.mxu0 %v4097_v35  ;;  %v3953_v42 = vunpack.c.h.bf16 %v8970_v10 }
 0xa1c   : > { %v4108_v45 = vpack.c.bf16 %v5600_v9, %v5598_v33  ;;  %v4135_v40 = vunpack.c.l.bf16 %v4095_v41  ;;  %v4225_v16 = vadd.f32 %v4224_v46, %v4133_v0  ;;  %v3949_v13 = vunpack.c.h.bf16 %v8959_v27 }
 0xa1d   : > { %v4032_v15 = vmul.f32 1.442695, %v3931_v31  ;;  %v4158_v58 = vunpack.c.l.bf16 %v4106_v51  ;;  %v4200_v26 = vadd.f32 %v4199_v38, %v4156_v36  ;;  %5601 = vpow2.f32 %v4024_v39 }
 0xa1e   : > { %v4036_v30 = vmul.f32 1.442695, %v3933_v14  ;;  %4279 = vmatpush.bf16.msrb.mxu1 %v4108_v45  ;;  %v4137_v44 = vunpack.c.h.bf16 %v4095_v41  ;;  %v4226_v18 = vadd.f32 %v4225_v16, %v4135_v40  ;;  %5603 = vpow2.f32 %v4028_v59  ;;  %v9679_v40 = vld [vmem:[#allocation71_spill] sm:$0xff] }
 0xa1f   : > { %v4072_v47 = vmul.f32 1.442695, %v3951_v4  ;;  %v4160_v10 = vunpack.c.h.bf16 %v4106_v51  ;;  %v4201_v63 = vadd.f32 %v4200_v26, %v4158_v58  ;;  %4297 = vmatpush.bf16.msra.mxu0 %v4095_v41  ;;  %v4040_v27 = vmul.f32 1.442695, %v3935_v54 }
 0xa20   : > { %v4076_v11 = vmul.f32 1.442695, %v3953_v42  ;;  %v4139_v53 = vunpack.c.l.bf16 %v4097_v35  ;;  %v4227_v31 = vadd.f32 %v4226_v18, %v4137_v44  ;;  %5605 = vpow2.f32 %v4032_v15 }
 0xa21   : > { %v4044_v57 = vmul.f32 1.442695, %v3937_v22  ;;  %v4162_v21 = vunpack.c.l.bf16 %v4108_v45  ;;  %v4202_v14 = vadd.f32 %v4201_v63, %v4160_v10  ;;  %5607 = vpow2.f32 %v4036_v30 }
 0xa22   : > { %v4048_v48 = vmul.f32 1.442695, %v3939_v34  ;;  %4280 = vmatpush.bf16.msrb.mxu1 %v4106_v51  ;;  %v4141_v5 = vunpack.c.h.bf16 %v4097_v35  ;;  %v4228_v33 = vadd.f32 %v4227_v31, %v4139_v53  ;;  %v4064_v50 = vmul.f32 1.442695, %v3947_v32  ;;  %v9677_v35 = vld [vmem:[#allocation54_spill] sm:$0xff] }
 0xa23   : > { %5609 = vpow2.f32 %v4072_v47  ;;  %v4164_v41 = vunpack.c.h.bf16 %v4108_v45  ;;  %v4203_v3 = vadd.f32 %v4202_v14, %v4162_v21  ;;  %4298 = vmatpush.bf16.msra.mxu0 %v9018_v61  ;;  %v5602_v54 = vpop.eup %5601  ;;  %v4068_v9 = vmul.f32 1.442695, %v3949_v13  ;;  %v9678_v45 = vld [vmem:[#allocation68_spill] sm:$0xff] }
 0xa24   : > { %5611 = vpow2.f32 %v4076_v11  ;;  %v4143_v19 = vunpack.c.l.bf16 %v9027_v55  ;;  %v4229_v25 = vadd.f32 %v4228_v33, %v4141_v5  ;;  %v5604_v22 = vpop.eup %5603  ;;  %v4052_v34 = vmul.f32 1.442695, %v3941_v23  ;;  %4269 = vmatmul.bf16.gmra.mxu0 %v9677_v35 }
 0xa25   : > { %5613 = vpow2.f32 %v4040_v27  ;;  %v4166_v51 = vunpack.c.l.bf16 %v9037_v29  ;;  %v4204_v2 = vadd.f32 %v4203_v3, %v4164_v41  ;;  %v4056_v61 = vmul.f32 1.442695, %v3943_v60 }
 0xa26   : > { %5615 = vpow2.f32 %v4044_v57  ;;  %4281 = vmatpush.bf16.msrb.mxu1 %v9021_v49  ;;  %v4145_v32 = vunpack.c.h.bf16 %v9027_v55  ;;  %v4230_v39 = vadd.f32 %v4229_v25, %v4143_v19  ;;  %v5606_v0 = vpop.eup %5605  ;;  %v4060_v46 = vmul.f32 1.442695, %v3945_v52 }
 0xa27   : > { %5617 = vpow2.f32 %v4064_v50  ;;  %v4168_v28 = vunpack.c.h.bf16 %v9037_v29  ;;  %v4205_v23 = vadd.f32 %v4204_v2, %v4166_v51  ;;  %4299 = vmatpush.bf16.msra.mxu0 %v8999_v24  ;;  %v5608_v4 = vpop.eup %5607  ;;  %v4147_v59 = vunpack.c.l.bf16 %v9005_v7 }
 0xa28   : > { %5619 = vpow2.f32 %v4068_v9  ;;  %v9079_v60 = vpack.c.bf16 %v5604_v22, %v5602_v54  ;;  %v4231_v49 = vadd.f32 %v4230_v39, %v4145_v32  ;;  %v4170_v55 = vunpack.c.l.bf16 %v9014_v20  ;;  %v9680_v32 = vld [vmem:[#allocation75_spill] sm:$0xff]  ;;  %v9681_v39 = vld [vmem:[#allocation78_spill] sm:$0xff] }
 0xa29   : > { %v5610_v36 = vpop.eup %5609  ;;  %5621 = vpow2.f32 %v4048_v48  ;;  %v4206_v38 = vadd.f32 %v4205_v23, %v4168_v28  ;;  %v9084_v17 = vpack.c.bf16 %v8799_v6, %v8793_v12  ;;  %v4149_v24 = vunpack.c.h.bf16 %v9005_v7 }
 0xa2a   : > { %v5612_v52 = vpop.eup %5611  ;;  %5623 = vpow2.f32 %v4052_v34  ;;  %4282 = vmatpush.bf16.msrb.mxu1 %v9003_v43  ;;  %v4232_v29 = vadd.f32 %v4231_v49, %v4147_v59  ;;  %v9090_v16 = vpack.c.bf16 %v9679_v40, %v9678_v45  ;;  %v4172_v13 = vunpack.c.h.bf16 %v9014_v20 }
 0xa2b   : > { %v5614_v42 = vpop.eup %5613  ;;  %5625 = vpow2.f32 %v4056_v61  ;;  %v4207_v15 = vadd.f32 %v4206_v38, %v4170_v55  ;;  %4300 = vmatpush.bf16.msra.mxu0 %v8981_v56  ;;  %v4105_v6 = vpack.c.bf16 %v5608_v4, %v5606_v0  ;;  %v4151_v43 = vunpack.c.l.bf16 %v9079_v60 }
 0xa2c   : > { %v5616_v12 = vpop.eup %5615  ;;  %5627 = vpow2.f32 %v4060_v46  ;;  %v4233_v7 = vadd.f32 %v4232_v29, %v4149_v24  ;;  %v4174_v26 = vunpack.c.l.bf16 %v8995_v1  ;;  %v4115_v44 = vpack.c.bf16 %v5612_v52, %v5610_v36 }
 0xa2d   : > { %v5618_v58 = vpop.eup %5617  ;;  %v4208_v30 = vadd.f32 %v4207_v15, %v4172_v13  ;;  %4283 = vmatmul.bf16.vlgmr.msrb.gmra.mxu1 %v9090_v16  ;;  %v4153_v20 = vunpack.c.h.bf16 %v9079_v60  ;;  %v4176_v56 = vunpack.c.h.bf16 %v8995_v1  ;;  %v4107_v11 = vpack.c.bf16 %v5616_v12, %v5614_v42 }
 0xa2e   : > { %4313 = vmatpush.bf16.msra.mxu1 %v9084_v17  ;;  %v5620_v18 = vpop.eup %5619  ;;  %v4234_v47 = vadd.f32 %v4233_v7, %v4151_v43  ;;  %v4155_v53 = vunpack.c.l.bf16 %v4105_v6  ;;  %v4178_v21 = vunpack.c.l.bf16 %v8807_v8  ;;  %v4157_v33 = vunpack.c.h.bf16 %v4105_v6 }
 0xa2f   : > { %v5622_v10 = vpop.eup %5621  ;;  %v4209_v63 = vadd.f32 %v4208_v30, %v4174_v26  ;;  %4301 = vmatpush.bf16.msra.mxu0 %v8965_v37  ;;  %v4113_v48 = vpack.c.bf16 %v5620_v18, %v5618_v58  ;;  %v4180_v41 = vunpack.c.h.bf16 %v8807_v8  ;;  %v4159_v54 = vunpack.c.l.bf16 %v4107_v11 }
 0xa30   : > { %v5624_v27 = vpop.eup %5623  ;;  %v4235_v31 = vadd.f32 %v4234_v47, %v4153_v20  ;;  %v4161_v25 = vunpack.c.h.bf16 %v4107_v11  ;;  %v3473_v0 = vpack.c.bf16 %v9681_v39, %v9680_v32  ;;  %v4175_v36 = vunpack.c.l.bf16 %v4115_v44 }
 0xa31   : > { %v5626_v57 = vpop.eup %5625  ;;  %v4210_v14 = vadd.f32 %v4209_v63, %v4176_v56  ;;  %v4109_v1 = vpack.c.bf16 %v5624_v27, %v5622_v10  ;;  %v4171_v4 = vunpack.c.l.bf16 %v4113_v48  ;;  %v4177_v38 = vunpack.c.h.bf16 %v4115_v44 }
 0xa32   : > { %4314 = vmatpush.bf16.msra.mxu1 %v4115_v44  ;;  %v5628_v5 = vpop.eup %5627  ;;  %v4236_v50 = vadd.f32 %v4235_v31, %v4155_v53  ;;  %v4179_v24 = vunpack.c.l.bf16 %v9084_v17  ;;  %v4181_v42 = vunpack.c.h.bf16 %v9084_v17 }
 0xa33   : > { %v4211_v3 = vadd.f32 %v4210_v14, %v4178_v21  ;;  %v4111_v19 = vpack.c.bf16 %v5628_v5, %v5626_v57  ;;  %v4163_v34 = vunpack.c.l.bf16 %v4109_v1  ;;  %v4165_v2 = vunpack.c.h.bf16 %v4109_v1 }
 0xa34   : > { %v4237_v9 = vadd.f32 %v4236_v50, %v4157_v33  ;;  %4302 = vmatmul.bf16.vlgmr.msra.gmra.mxu0 %v9676_v62  ;;  %v4173_v62 = vunpack.c.h.bf16 %v4113_v48 }
 0xa35   : > { %v4212_v37 = vadd.f32 %v4211_v3, %v4180_v41  ;;  %v4167_v8 = vunpack.c.l.bf16 %v4111_v19  ;;  %v4169_v28 = vunpack.c.h.bf16 %v4111_v19 }
 0xa36   : > { %4315 = vmatpush.bf16.msra.mxu1 %v4113_v48  ;;  %v4238_v22 = vadd.f32 %v4237_v9, %v4159_v54 }
 0xa37   : > { %v4213_v13 = vrot.slane %v4212_v37, 4 }
 0xa38   : > { %v4239_v51 = vadd.f32 %v4238_v22, %v4161_v25 }
 0xa3a   : > { %4316 = vmatpush.bf16.msra.mxu1 %v4111_v19  ;;  %v4240_v61 = vadd.f32 %v4239_v51, %v4163_v34 }
 0xa3c   : > { %v4241_v46 = vadd.f32 %v4240_v61, %v4165_v2 }
 0xa3d   : > { %4288 = vmatmul.bf16.gmra.mxu1 %v3473_v0 }
 0xa3e   : > { %4317 = vmatpush.bf16.msra.mxu1 %v4109_v1  ;;  %v4242_v23 = vadd.f32 %v4241_v46, %v4167_v8 }
 0xa40   : > { %v4243_v59 = vadd.f32 %v4242_v23, %v4169_v28 }
 0xa42   : > { %4318 = vmatpush.bf16.msra.mxu1 %v4107_v11  ;;  %v4244_v49 = vadd.f32 %v4243_v59, %v4171_v4 }
 0xa44   : > { %v4245_v55 = vadd.f32 %v4244_v49, %v4173_v62  ;;  %4307 = vmatmul.bf16.gmra.mxu0 %v9677_v35 }
 0xa46   : > { %4319 = vmatpush.bf16.msra.mxu1 %v4105_v6  ;;  %v4246_v52 = vadd.f32 %v4245_v55, %v4175_v36  ;;  %v4214_v6 = vadd.f32 %v4213_v13, %v4212_v37 }
 0xa48   : > { %v4247_v29 = vadd.f32 %v4246_v52, %v4177_v38  ;;  %v4215_v35 = vrot.slane %v4214_v6, 2 }
 0xa4a   : > { %4320 = vmatpush.bf16.msra.mxu1 %v9079_v60  ;;  %v4248_v45 = vadd.f32 %v4247_v29, %v4179_v24  ;;  %v4216_v58 = vadd.f32 %v4215_v35, %v4214_v6 }
 0xa4c   : > { %v4249_v40 = vadd.f32 %v4248_v45, %v4181_v42  ;;  %v4217_v30 = vrot.slane %v4216_v58, 1 }
 0xa4d   : > { %4321 = vmatmul.bf16.vlgmr.msra.gmra.mxu1 %v9090_v16 }
 0xa4e   : > { %v4250_v15 = vrot.slane %v4249_v40, 4  ;;  %v4218_v20 = vadd.f32 %v4217_v30, %v4216_v58 }
 0xa50   : > { %v4251_v43 = vadd.f32 %v4250_v15, %v4249_v40  ;;  %5629 = vrcp.f32 %v4218_v20  ;;  %vm4337_vm11 = vweird.f32 %v4218_v20  ;;  %v4343_v41 = vand.u32 2147483648, %v4218_v20 }
 0xa51   : > { %v4341_v1 = vand.u32 2147483647, %v4218_v20 }
 0xa52   : > { %v4252_v7 = vrot.slane %v4251_v43, 2  ;;  %v4344_v25 = vor.u32 1.1754944e-38, %v4343_v41  ;;  %v5045_v41 = vld [vmem:[#allocation2 + $0x34] sm:$0xf] }
 0xa53   : > { %vm4342_vm15 = vcmp.eq.f32.partialorder %v4341_v1, 8.507059e+37 }
 0xa54   : > { %v4253_v26 = vadd.f32 %v4252_v7, %v4251_v43 }
 0xa56   : > { %v4254_v44 = vrot.slane %v4253_v26, 1  ;;  %v5630_v10 = vpop.eup %5629 }
 0xa57   : > { %v4333_v27 = vmul.f32 %v5630_v10, %v4218_v20  ;;  %vm4338_vm0 = vweird.f32 %v5630_v10 }
 0xa58   : > { %v4255_v17 = vadd.f32 %v4254_v44, %v4253_v26  ;;  %vm4339_vm12 = vmor %vm4337_vm11, %vm4338_vm0 }
 0xa59   : > { %v4334_v31 = vsub.f32 1.0, %v4333_v27 }
 0xa5a   : > { %5631 = vrcp.f32 %v4255_v17  ;;  %v4358_v3 = vand.u32 2147483648, %v4255_v17  ;;  %vm4352_vm13 = vweird.f32 %v4255_v17  ;;  %v4356_v54 = vand.u32 2147483647, %v4255_v17 }
 0xa5b   : > { %v4335_v21 = vmul.f32 %v5630_v10, %v4334_v31  ;;  %v4975_v31 = vld [vmem:[#allocation2 + $0x48] sm:$0xf0] }
 0xa5c   : > { %v4359_v34 = vor.u32 1.1754944e-38, %v4358_v3  ;;  %vm4357_vm1 = vcmp.eq.f32.partialorder %v4356_v54, 8.507059e+37  ;;  %v5044_v54 = vld [vmem:[#allocation2 + $0x24] sm:$0xf0] }
 0xa5d   : > { %4326 = vmatmul.bf16.gmra.mxu1 %v3473_v0  ;;  %v4336_v33 = vadd.f32 %v5630_v10, %v4335_v21  ;;  %v5047_v21 = vld [vmem:[#allocation2 + $0x44] sm:$0xf] }
 0xa5f   : > { %v4340_v37 = vsel %vm4339_vm12, %v5630_v10, %v4336_v33  ;;  %v4983_v10 = vld [vmem:[#allocation2 + $0x58] sm:$0xf0] }
 0xa60   : > { %v5632_v56 = vpop.eup %5631  ;;  %v4345_v2 = vsel %vm4342_vm15, %v4344_v25, %v4340_v37  ;;  %v4967_v33 = vld [vmem:[#allocation2 + $0x38] sm:$0xf0]  ;;  %v4396_v37 = vld [vmem:[%s9168_s3] sm:$0xff]  ;;  %v4398_v25 = vld [vmem:[%s9168_s3 + $0x10] sm:$0xff] }
 0xa61   : > { %v4348_v11 = vmul.f32 %v5632_v56, %v4255_v17  ;;  %vm4353_vm10 = vweird.f32 %v5632_v56  ;;  %v4970_v1 = vor.u32 %v5045_v41, %v4967_v33 }
 0xa62   : > { %vm4354_vm14 = vmor %vm4352_vm13, %vm4353_vm10 }
 0xa63   : > { %v4349_v57 = vsub.f32 1.0, %v4348_v11 }
 0xa65   : > { %v4350_v14 = vmul.f32 %v5632_v56, %v4349_v57  ;;  %v4973_v57 = vld [vmem:[#allocation2 + $0x40] sm:$0xf] }
 0xa67   : > { %v4351_v50 = vadd.f32 %v5632_v56, %v4350_v14 }
 0xa69   : > { %v4355_v19 = vsel %vm4354_vm14, %v5632_v56, %v4351_v50  ;;  %v4981_v56 = vld [vmem:[#allocation2 + $0x50] sm:$0xf] }
 0xa6a   : > { %v4360_v61 = vsel %vm4357_vm1, %v4359_v34, %v4355_v19  ;;  %v4965_v50 = vld [vmem:[#allocation2 + $0x30] sm:$0xf]  ;;  %v4959_v19 = vld [vmem:[#allocation2 + $0x28] sm:$0xf0]  ;;  %v4957_v34 = vld [vmem:[#allocation2 + $0x20] sm:$0xf] }
 0xa91   : > { %v4265_v12 = vpop.f32.mrf.mxu0 }
 0xa99   : > { %v4267_v60 = vpop.f32.mrf.mxu0 }
 0xaa1   : > { %v4270_v47 = vpop.f32.mrf.mxu0 }
 0xaa9   : > { %v4272_v63 = vpop.f32.mrf.mxu0 }
 0xaaa   : > { %v4284_v18 = vpop.f32.mrf.mxu1 }
 0xaab   : > { %v4285_v9 = vadd.f32 %v4284_v18, %v4265_v12 }
 0xaad   : > { %v4346_v39 = vmul.f32 %v4345_v2, %v4285_v9  ;;  %v5697_v9 = vmov 0  }
 0xaae   : > { %5102 = vset.pattern.permute.xlu1 %v5697_v9  ;;  %5104 = vset.pattern.permute.xlu0 %v5697_v9 }
 0xaaf   : > { %4402 = vperm.xlu1 %5102, %v4396_v37   ;;  %5103 = vset.pattern.permute.xlu2 %v5697_v9 }
 0xab0   : > { %4412 = vperm.xlu0 %5104, %v4398_v25  }
 0xab1   : > { %v4303_v5 = vpop.f32.mrf.mxu0 }
 0xab2   : > { %v4286_v16 = vpop.f32.mrf.mxu1 }
 0xab3   : > { %v4287_v46 = vadd.f32 %v4286_v16, %v4267_v60  ;;  %v5050_v16 = vld [vmem:[#allocation2 + $0x54] sm:$0xf0] }
 0xab4   : > { %v4982_v27 = vor.u32 %v5050_v16, %v4981_v56 }
 0xab5   : > { %v4362_v4 = vmul.f32 %v4345_v2, %v4287_v46  ;;  %v5041_v46 = vld [vmem:[#allocation2 + $0x14] sm:$0xf] }
 0xab9   : > { %v4305_v32 = vpop.f32.mrf.mxu0 }
 0xaba   : > { %v4289_v53 = vpop.f32.mrf.mxu1 }
 0xabb   : > { %v4290_v36 = vadd.f32 %v4289_v53, %v4270_v47  ;;  %v5048_v53 = vld [vmem:[#allocation2 + $0x44] sm:$0xf0] }
 0xabc   : > { %v4974_v14 = vor.u32 %v5048_v53, %v4973_v57 }
 0xabd   : > { %v4364_v52 = vmul.f32 %v4345_v2, %v4290_v36 }
 0xac1   : > { %v4308_v62 = vpop.f32.mrf.mxu0 }
 0xac2   : > { %v4291_v48 = vpop.f32.mrf.mxu1 }
 0xac3   : > { %v4292_v45 = vadd.f32 %v4291_v48, %v4272_v63  ;;  %v5049_v63 = vld [vmem:[#allocation2 + $0x54] sm:$0xf]  ;;  %v4978_v48 = vor.u32 %v5047_v21, %v4975_v31 }
 0xac4   : > { %v4986_v11 = vor.u32 %v5049_v63, %v4983_v10 }
 0xac5   : > { %v4366_v15 = vmul.f32 %v4345_v2, %v4292_v45  ;;  %v4958_v2 = vor.u32 %v5044_v54, %v4957_v34 }
 0xac9   : > { %v4310_v42 = vpop.f32.mrf.mxu0 }
 0xaca   : > { %v4322_v22 = vpop.f32.mrf.mxu1 }
 0xacb   : > { %v4323_v51 = vadd.f32 %v4322_v22, %v4303_v5  ;;  %v5046_v5 = vld [vmem:[#allocation2 + $0x34] sm:$0xf0]  ;;  %v4397_v22 = vld [vmem:[%s9168_s3 + $0x8] sm:$0xff] }
 0xacc   : > { %v4966_v3 = vor.u32 %v5046_v5, %v4965_v50  ;;  %4407 = vperm.xlu2 %5103, %v4397_v22  }
 0xacd   : > { %v4361_v0 = vmul.f32 %v4360_v61, %v4323_v51  ;;  %v5043_v51 = vld [vmem:[#allocation2 + $0x24] sm:$0xf] }
 0xacf   : > { %v4368_v8 = vpack.c.bf16 %v4361_v0, %v4346_v39  ;;  %v4951_v39 = vld [vmem:[#allocation2 + $0x18] sm:$0xf0] }
 0xad0   : > { %v4399_v0 = vld [vmem:[%s9168_s3 + $0x18] sm:$0xff] }
 0xad1   : > { %4372 = vst [vmem:[#allocation2 + $0x60] sm:$0xff] %v4368_v8  ;;  %v4949_v8 = vld [vmem:[#allocation2 + $0x10] sm:$0xf]  ;;  %4417 = vperm.xlu1 %5102, %v4399_v0  }
 0xad2   : > { %v4324_v28 = vpop.f32.mrf.mxu1 }
 0xad3   : > { %v4325_v23 = vadd.f32 %v4324_v28, %v4305_v32  ;;  %v5042_v32 = vld [vmem:[#allocation2 + $0x14] sm:$0xf0] }
 0xad4   : > { %v4950_v28 = vor.u32 %v5042_v32, %v4949_v8 }
 0xad5   : > { %v4363_v59 = vmul.f32 %v4360_v61, %v4325_v23  ;;  %v4954_v23 = vor.u32 %v5041_v46, %v4951_v39 }
 0xad7   : > { %v4369_v49 = vpack.c.bf16 %v4363_v59, %v4362_v4  ;;  %v5040_v4 = vld [vmem:[#allocation2 + $0x4] sm:$0xf0]  ;;  %v4943_v59 = vld [vmem:[#allocation2 + $0x8] sm:$0xf0] }
 0xad8   : > { %v4989_v18 = vld [vmem:[#allocation2 + $0x60] sm:$0xf]  ;;  %v5051_v20 = vld [vmem:[#allocation2 + $0x64] sm:$0xf] }
 0xad9   : > { %4373 = vst [vmem:[#allocation2 + $0x68] sm:$0xff] %v4369_v49  ;;  %v5039_v49 = vld [vmem:[#allocation2 + $0x4] sm:$0xf] }
 0xada   : > { %v4327_v55 = vpop.f32.mrf.mxu1 }
 0xadb   : > { %v4328_v38 = vadd.f32 %v4327_v55, %v4308_v62  ;;  %v4941_v62 = vld [vmem:[#allocation2] sm:$0xf]  ;;  %v4946_v55 = vor.u32 %v5039_v49, %v4943_v59 }
 0xadc   : > { %v4942_v36 = vor.u32 %v5040_v4, %v4941_v62 }
 0xadd   : > { %v4365_v24 = vmul.f32 %v4360_v61, %v4328_v38  ;;  %v5037_v38 = vld [vmem:[%s9167_s2] sm:$0xff] }
 0xadf   : > { %v4370_v29 = vpack.c.bf16 %v4365_v24, %v4364_v52  ;;  %v5038_v52 = vld [vmem:[%s9167_s2 + $0x8] sm:$0xff] }
 0xae0   : > { %v5052_v30 = vld [vmem:[#allocation2 + $0x64] sm:$0xf0]  ;;  %v4991_v44 = vld [vmem:[#allocation2 + $0x68] sm:$0xf0] }
 0xae1   : > { %4374 = vst [vmem:[#allocation2 + $0x70] sm:$0xff] %v4370_v29  ;;  %v4990_v17 = vor.u32 %v5052_v30, %v4989_v18  ;;  %v4994_v47 = vor.u32 %v5051_v20, %v4991_v44 }
 0xae2   : > { %v4329_v40 = vpop.f32.mrf.mxu1 }
 0xae3   : > { %v4330_v13 = vadd.f32 %v4329_v40, %v4310_v42 }
 0xae5   : > { %v4367_v12 = vmul.f32 %v4360_v61, %v4330_v13  ;;  %v4962_v61 = vor.u32 %v5043_v51, %v4959_v19 }
 0xae7   : > { %v4371_v6 = vpack.c.bf16 %v4367_v12, %v4366_v15 }
 0xae8   : > { %v4997_v43 = vld [vmem:[#allocation2 + $0x70] sm:$0xf]  ;;  %v5053_v7 = vld [vmem:[#allocation2 + $0x74] sm:$0xf] }
 0xae9   : > { %4375 = vst [vmem:[#allocation2 + $0x78] sm:$0xff] %v4371_v6 }
 0xaf0   : > { %v5054_v35 = vld [vmem:[#allocation2 + $0x74] sm:$0xf0]  ;;  %v4999_v58 = vld [vmem:[#allocation2 + $0x78] sm:$0xf0] }
 0xaf1   : > { %v4998_v26 = vor.u32 %v5054_v35, %v4997_v43  ;;  %v5002_v60 = vor.u32 %v5053_v7, %v4999_v58 }
 0xaf3   : > { %4512 = vmatpush.bf16.msrb.mxu0 %v4998_v26  ;;  %4531 = vmatpush.bf16.msrb.mxu1 %v5002_v60 }
 0xaf7   : > { %4513 = vmatpush.bf16.msrb.mxu0 %v4990_v17  ;;  %4532 = vmatpush.bf16.msrb.mxu1 %v4994_v47 }
 0xafb   : > { %4514 = vmatpush.bf16.msrb.mxu0 %v4982_v27  ;;  %4533 = vmatpush.bf16.msrb.mxu1 %v4986_v11 }
 0xaff   : > { %4515 = vmatpush.bf16.msrb.mxu0 %v4974_v14  ;;  %4534 = vmatpush.bf16.msrb.mxu1 %v4978_v48 }
 0xb03   : > { %4516 = vmatpush.bf16.msrb.mxu0 %v4966_v3  ;;  %4535 = vmatpush.bf16.msrb.mxu1 %v4970_v1 }
 0xb07   : > { %4517 = vmatpush.bf16.msrb.mxu0 %v4958_v2  ;;  %4536 = vmatpush.bf16.msrb.mxu1 %v4962_v61 }
 0xb0b   : > { %4518 = vmatpush.bf16.msrb.mxu0 %v4950_v28  ;;  %4537 = vmatpush.bf16.msrb.mxu1 %v4954_v23 }
 0xb0f   : > { %4519 = vmatpush.bf16.msrb.mxu0 %v4942_v36  ;;  %4538 = vmatpush.bf16.msrb.mxu1 %v4946_v55 }
 0xb12   : > { %4520 = vmatmul.bf16.vlgmr.msrb.gmra.mxu0 %v5037_v38  ;;  %4539 = vmatmul.bf16.vlgmr.msrb.gmra.mxu1 %v5037_v38 }
 0xb21   : > { %v4403_v24 = vpop.permute.xlu1 %4402 }
 0xb22   : > { %4525 = vmatmul.bf16.gmra.mxu0 %v5038_v52  ;;  %4544 = vmatmul.bf16.gmra.mxu1 %v5038_v52  ;;  %v4413_v35 = vpop.permute.xlu0 %4412 }
 0xb26   : > { %v4408_v13 = vpop.permute.xlu2 %4407 }
 0xb43   : > { %v4418_v30 = vpop.permute.xlu1 %4417 }
 0xb8f   : > { %v4521_v29 = vpop.f32.mrf.mxu0  ;;  %v4540_v42 = vpop.f32.mrf.mxu1 }
 0xb90   : > { %v4522_v45 = vadd.f32 %v4521_v29, %v4403_v24  ;;  %v4541_v40 = vadd.f32 %v4540_v42, %v4403_v24 }
 0xb92   : > { %4550 = vst [vmem:[%s190_s23] sm:$0xff] %v4522_v45 }
 0xb93   : > { %4551 = vst [vmem:[%s190_s23 + $0x8] sm:$0xff] %v4541_v40 }
 0xb97   : > { %v4523_v15 = vpop.f32.mrf.mxu0  ;;  %v4542_v12 = vpop.f32.mrf.mxu1 }
 0xb98   : > { %v4524_v6 = vadd.f32 %v4523_v15, %v4408_v13  ;;  %v4543_v43 = vadd.f32 %v4542_v12, %v4408_v13 }
 0xb9a   : > { %4552 = vst [vmem:[%s190_s23 + $0x10] sm:$0xff] %v4524_v6 }
 0xb9b   : > { %4553 = vst [vmem:[%s190_s23 + $0x18] sm:$0xff] %v4543_v43 }
 0xb9f   : > { %v4526_v7 = vpop.f32.mrf.mxu0  ;;  %v4545_v58 = vpop.f32.mrf.mxu1 }
 0xba0   : > { %v4527_v26 = vadd.f32 %v4526_v7, %v4413_v35  ;;  %v4546_v60 = vadd.f32 %v4545_v58, %v4413_v35 }
 0xba2   : > { %4554 = vst [vmem:[%s190_s23 + $0x20] sm:$0xff] %v4527_v26 }
 0xba3   : > { %4555 = vst [vmem:[%s190_s23 + $0x28] sm:$0xff] %v4546_v60 }
 0xba7   : > { %v4528_v44 = vpop.f32.mrf.mxu0  ;;  %v4547_v18 = vpop.f32.mrf.mxu1 }
 0xba8   : > { %v4529_v20 = vadd.f32 %v4528_v44, %v4418_v30  ;;  %v4548_v17 = vadd.f32 %v4547_v18, %v4418_v30 }
 0xbaa   : > { %4556 = vst [vmem:[%s190_s23 + $0x30] sm:$0xff] %v4529_v20 }
 0xbab   : > { %4557 = vst [vmem:[%s190_s23 + $0x38] sm:$0xff] %v4548_v17 }
 0xbac   : > { %5660 = shalt.err (!%p5657_p3)
}
 0xbad   : > { %s5698_s14 = smov 256   ;;  %s5699_s20 = smov 16  }
 0xbae   : > { %5060 = dma.vmem_to_hbm [thread:$0]  (%p5763_p5), %s4572_s5, 1024, %s4574_s6, %s4559_s19, %s5698_s14, %s5698_s14, %s5699_s20  }
 0xbaf PF: > { %p5066_p4 = scmp.ge.s32.totalorder %s5695_s18, 2  ;;  %s4588_s22 = sand.u32 1, %s5683_s15  }
 0xbb0   : > { %s4589_s23 = scalar_lea.sflag [#allocation4], %s4588_s22 }
 0xbb1   : > { %p5063_p7 = pnand %p5066_p4, %p5767_p6 }
 0xbb3   : > { %p5064_p8 = pneg %p5063_p7 }
 0xbb5   : > { %5678 = dma.done.wait (%p5064_p8), %s4589_s23, 1024  }
 0xbb6   : > { %5680 = vsyncadd (%p5064_p8), %s4589_s23, 4294966272  ;;  %p14_p9 = scmp.ge.s32.totalorder %s5750_s21, 4   ;;  %s9682_s15 = smov %s5687_s16 }
 0xbb7   : > { %s9683_s16 = smov %s5691_s17  ;;  %s9684_s17 = smov %s5761_s24 }
 0xbb8   : > { %s9685_s18 = smov %s5750_s21  ;;  %16 = sbr.rel (!%p14_p9) target bundleno = 3 (0x3), region = 71 }
 0xbbd   :  { %4595 = vsyncpa [#allocation4], 1 }
 0xbbe   :  { %4597 = vsyncpa [#allocation4 + $0x1], 1 }

</bundles_post_ra>
